<compile_context>
chip_gen: v7x
topology: tpu7x:2x2x1
jax: 0.10.0
libtpu: 0.0.40
codegen_flags: <defaults>
</compile_context>

<pallas_src>
import functools

import jax
import jax.numpy as jnp
from jax.experimental import pallas as pl
from jax.experimental.pallas import tpu as pltpu


# ----------------------------------------------------------------------------
# Device-dependent tiling preferences
# ----------------------------------------------------------------------------
_KIND = ""
try:
    _KIND = jax.devices()[0].device_kind.lower()
except Exception:  # pragma: no cover
    pass
_PREFER_256 = "v5" not in _KIND                          # v5e: keep 128-wide tiles
_TWO_CORE = any(t in _KIND for t in ("v4", "v5p", "7"))  # megacore / dual-TensorCore parts


def _round_up(v, m):
    return (v + m - 1) // m * m


def _pick_tile(dim, prefs):
    for t in prefs:
        if dim >= t and dim % t == 0:
            return t
    return dim  # full extent (exempt from the (8,128) block rule)


# ----------------------------------------------------------------------------
# Pallas kernel: fused matmul (+ f32 accumulate) + bias + optional ReLU
# ----------------------------------------------------------------------------
def _mm_kernel(x_ref, w_ref, b_ref, o_ref, acc_ref, *, relu):
    k = pl.program_id(2)

    @pl.when(k == 0)
    def _():
        acc_ref[...] = jnp.zeros_like(acc_ref)

    acc_ref[...] += jnp.dot(x_ref[...], w_ref[...],
                            preferred_element_type=jnp.float32)

    @pl.when(k == pl.num_programs(2) - 1)
    def _():
        y = acc_ref[...] + b_ref[...]
        if relu:
            y = jnp.maximum(y, 0.0)
        o_ref[...] = y.astype(o_ref.dtype)


def fused_matmul(x, w, bias, relu, out_dtype=jnp.bfloat16):
    """out[m, n] = relu_maybe(sum_k x[m,k] w[k,n] + bias[n]).

    x: (M, K) any float dtype (cast to bf16 for the MXU)
    w: (K, N) weights (BN scale already folded in), bf16
    bias: (N,) float32
    """
    M, K = x.shape
    Kw, Nc = w.shape
    assert K == Kw

    x = x.astype(jnp.bfloat16)
    w = w.astype(jnp.bfloat16)
    b2 = bias.astype(jnp.float32).reshape(1, Nc)

    # Tiny sublane-alignment pads only when actually needed (e.g. Cin=3 backbone convs,
    # M=2 pooled branch). No 128-wide padding round trips.
    Mp = _round_up(M, 8)
    Kp = _round_up(K, 8)
    if Mp != M or Kp != K:
        x = jnp.zeros((Mp, Kp), x.dtype).at[:M, :K].set(x)
    if Kp != K:
        w = jnp.zeros((Kp, Nc), w.dtype).at[:K, :].set(w)

    m_prefs = (256, 128) if _PREFER_256 else (128,)
    n_prefs = (256, 128) if _PREFER_256 else (128,)
    TM = _pick_tile(Mp, m_prefs)
    TN = _pick_tile(Nc, n_prefs)

    # K stays unblocked unless it is large; then add a reduction grid axis.
    TK = Kp
    if Kp >= 2048:
        for cand in (512, 256):
            if Kp % cand == 0:
                TK = cand
                break

    # Dual-core parts (v7x / megacore): make sure there are >=2 parallel blocks.
    if _TWO_CORE and (Mp // TM) * (Nc // TN) == 1:
        if TM >= 16 and TM % 16 == 0:
            TM //= 2
        elif TN % 256 == 0:
            TN //= 2

    grid = (Mp // TM, Nc // TN, Kp // TK)

    out = pl.pallas_call(
        functools.partial(_mm_kernel, relu=relu),
        out_shape=jax.ShapeDtypeStruct((Mp, Nc), out_dtype),
        grid=grid,
        in_specs=[
            pl.BlockSpec((TM, TK), lambda i, j, k: (i, k)),
            pl.BlockSpec((TK, TN), lambda i, j, k: (k, j)),
            pl.BlockSpec((1, TN), lambda i, j, k: (0, j)),
        ],
        out_specs=pl.BlockSpec((TM, TN), lambda i, j, k: (i, j)),
        scratch_shapes=[pltpu.VMEM((TM, TN), jnp.float32)],
        compiler_params=pltpu.CompilerParams(
            dimension_semantics=("parallel", "parallel", "arbitrary")),
    )(x, w, b2)

    return out[:M] if Mp != M else out


# ----------------------------------------------------------------------------
# Conv helpers built on the fused Pallas matmul
# ----------------------------------------------------------------------------
def conv1x1(x, w2d, bias, relu):
    """x: (N,H,W,Cin) NHWC; w2d: (Cin, Cout) with BN scale folded."""
    N, H, W, Cin = x.shape
    Cout = w2d.shape[1]
    y = fused_matmul(x.reshape(-1, Cin), w2d, bias, relu)
    return y.reshape(N, H, W, Cout)


def conv3x3(x, w_hwio, bias, relu, dilation):
    """3x3 conv, padding=dilation (same spatial). Taps whose window lies entirely in
    the zero padding are skipped (only the center tap survives for the ASPP dilated
    branches at this resolution)."""
    N, H, W, Cin = x.shape
    d = dilation
    taps = []
    for kh in range(3):
        for kw in range(3):
            oh, ow = (kh - 1) * d, (kw - 1) * d
            if abs(oh) >= H or abs(ow) >= W:   # samples only zero padding
                continue
            taps.append((kh, kw))

    if len(taps) == 1 and taps[0] == (1, 1):
        return conv1x1(x, w_hwio[1, 1], bias, relu)

    xp = jnp.pad(x, ((0, 0), (d, d), (d, d), (0, 0)))
    cols = [xp[:, kh * d:kh * d + H, kw * d:kw * d + W, :] for (kh, kw) in taps]
    xim = jnp.concatenate(cols, axis=-1)                       # (N,H,W,T*Cin)
    w2d = jnp.concatenate([w_hwio[kh, kw] for (kh, kw) in taps], axis=0)
    return conv1x1(xim, w2d, bias, relu)


# ----------------------------------------------------------------------------
# Bilinear resize (align_corners=False): transpose-free 2-tap gather + lerp per axis,
# channels stay on the lane axis. (Tiny VPU/gather work; done as JAX glue.)
# ----------------------------------------------------------------------------
def _interp_taps(out_size, in_size):
    dst = jnp.arange(out_size, dtype=jnp.float32)
    scale = in_size / out_size
    src = jnp.maximum((dst + 0.5) * scale - 0.5, 0.0)
    i0 = jnp.minimum(jnp.floor(src), in_size - 1).astype(jnp.int32)
    i1 = jnp.minimum(i0 + 1, in_size - 1)
    w1 = src - i0.astype(jnp.float32)
    w0 = 1.0 - w1
    return i0, i1, w0, w1


def bilinear_resize(x, out_hw):
    N, Hin, Win, C = x.shape
    Ho, Wo = out_hw
    y = x.astype(jnp.float32)
    i0, i1, w0, w1 = _interp_taps(Ho, Hin)
    y = (jnp.take(y, i0, axis=1) * w0[None, :, None, None]
         + jnp.take(y, i1, axis=1) * w1[None, :, None, None])
    j0, j1, v0, v1 = _interp_taps(Wo, Win)
    y = (jnp.take(y, j0, axis=2) * v0[None, None, :, None]
         + jnp.take(y, j1, axis=2) * v1[None, None, :, None])
    return y                                                    # (N,Ho,Wo,C) f32


# ----------------------------------------------------------------------------
# Deterministic parameter init (matches module __init__ shapes); BN scale is
# folded into the conv weights here, once, and weights are stored bf16.
# ----------------------------------------------------------------------------
def init_params(key):
    keys = iter(jax.random.split(key, 40))
    nk = lambda: next(keys)

    def conv_w(cin, cout, k=1):
        fan_in = float(cin * k * k)
        return jax.random.normal(nk(), (k, k, cin, cout), jnp.float32) / (fan_in ** 0.5)

    def conv_b(cout):
        return 0.01 * jax.random.normal(nk(), (cout,), jnp.float32)

    def bn_fold(cout):  # eval-mode BN (mean=0, var=1) -> (scale, bias)
        gamma = 1.0 + 0.1 * jax.random.normal(nk(), (cout,), jnp.float32)
        beta = 0.1 * jax.random.normal(nk(), (cout,), jnp.float32)
        mean = jnp.zeros((cout,), jnp.float32)
        var = jnp.ones((cout,), jnp.float32)
        scale = gamma / jnp.sqrt(var + 1e-5)
        return scale, beta - mean * scale

    def conv_bn_1x1(cin, cout):
        w = conv_w(cin, cout).reshape(cin, cout)
        scale, bias = bn_fold(cout)
        return (w * scale[None, :]).astype(jnp.bfloat16), bias

    def conv_bn_3x3(cin, cout):
        w = conv_w(cin, cout, 3)                                # (3,3,cin,cout)
        scale, bias = bn_fold(cout)
        return (w * scale[None, None, None, :]).astype(jnp.bfloat16), bias

    p = {}
    # backbone (mobilenetv2 stub): 1x1 convs with bias, strides 32 / 8
    p['bb1_w'] = conv_w(3, 128).reshape(3, 128).astype(jnp.bfloat16)
    p['bb1_b'] = conv_b(128)
    p['bb2_w'] = conv_w(3, 64).reshape(3, 64).astype(jnp.bfloat16)
    p['bb2_b'] = conv_b(64)
    # encoder ASPP (in=128, out=256, ratios [6,12,18], + global pooling branch)
    p['aspp0'] = conv_bn_1x1(128, 256)
    for name in ('aspp1', 'aspp2', 'aspp3'):
        p[name] = conv_bn_3x3(128, 256)
    p['aspp_pool'] = conv_bn_1x1(128, 256)
    p['concat1x1'] = conv_bn_1x1(5 * 256, 256)
    # decoder (sc_in=64, sc_out=48, enc_in=256, out=256)
    p['conv_sc'] = conv_bn_1x1(64, 48)
    p['dec1'] = conv_bn_3x3(48 + 256, 256)
    p['dec2'] = conv_bn_3x3(256, 256)
    # last: Conv2d(256, 22, 1, bias=True)
    p['last_w'] = conv_w(256, 22).reshape(256, 22).astype(jnp.bfloat16)
    p['last_b'] = conv_b(22)
    return p


# ----------------------------------------------------------------------------
# Forward pass (input/output NCHW like PyTorch)
# ----------------------------------------------------------------------------
@jax.jit
def deeplabv3p_forward(x_nchw, p):
    N, _, H, W = x_nchw.shape
    x = jnp.transpose(x_nchw, (0, 2, 3, 1))                    # -> NHWC

    # --- backbone (mobilenetv2 stub): strided 1x1 convs with bias ---
    data = conv1x1(x[:, ::32, ::32, :], p['bb1_w'], p['bb1_b'], relu=False)   # (N,2,2,128)
    sc = conv1x1(x[:, ::8, ::8, :], p['bb2_w'], p['bb2_b'], relu=False)       # (N,8,8,64)

    # --- encoder: ASPP ---
    feats = [conv1x1(data, *p['aspp0'], relu=True)]
    for dil, name in zip((6, 12, 18), ('aspp1', 'aspp2', 'aspp3')):
        feats.append(conv3x3(data, *p[name], relu=True, dilation=dil))
    pooled = jnp.mean(data.astype(jnp.float32), axis=(1, 2), keepdims=True)   # AdaptiveAvgPool2d(1)
    pooled = conv1x1(pooled, *p['aspp_pool'], relu=True)
    pooled = jnp.broadcast_to(pooled, (N, data.shape[1], data.shape[2], 256))
    feats.append(pooled)
    enc = jnp.concatenate(feats, axis=-1)                                     # (N,2,2,1280)
    enc = conv1x1(enc, *p['concat1x1'], relu=True)       # Dropout(0.9): identity (eval)

    # --- decoder ---
    sc = conv1x1(sc, *p['conv_sc'], relu=True)                                # (N,8,8,48)
    enc_up = bilinear_resize(enc, sc.shape[1:3]).astype(jnp.bfloat16)         # (N,8,8,256)
    cat = jnp.concatenate([sc, enc_up], axis=-1)                              # (N,8,8,304)
    y = conv3x3(cat, *p['dec1'], relu=True, dilation=1)
    y = conv3x3(y, *p['dec2'], relu=True, dilation=1)

    # --- classifier head + final upsample ---
    y = conv1x1(y, p['last_w'], p['last_b'], relu=False)                      # (N,8,8,22)
    y = bilinear_resize(y, (H, W))                                            # (N,H,W,22) f32
    return jnp.transpose(y, (0, 3, 1, 2)).astype(jnp.float32)                 # -> NCHW


if __name__ == "__main__":
    key = jax.random.PRNGKey(0)
    pkey, xkey = jax.random.split(key)
    params = init_params(pkey)
    x = jax.random.normal(xkey, (2, 3, 64, 64), jnp.float32)                  # NCHW
    out = deeplabv3p_forward(x, params)
    out = jax.block_until_ready(out)
    assert out.shape == (2, 22, 64, 64), out.shape
    assert bool(jnp.all(jnp.isfinite(out)))
    print("KERNEL_OK")
</pallas_src>

<mosaic_0001>
module attributes {stable_mosaic.version = 11 : i64} {
  func.func @_mm_kernel(%arg0: i32, %arg1: i32, %arg2: i32, %arg3: memref<8x8xbf16, #tpu.memory_space<vmem>>, %arg4: memref<8x128xbf16, #tpu.memory_space<vmem>>, %arg5: memref<1x128xf32, #tpu.memory_space<vmem>>, %arg6: memref<8x128xbf16, #tpu.memory_space<vmem>>, %arg7: memref<8x128xf32, #tpu.memory_space<vmem>>) attributes {dimension_semantics = [#tpu.dimension_semantics<parallel>, #tpu.dimension_semantics<parallel>, #tpu.dimension_semantics<arbitrary>], iteration_bounds = array<i64: 1, 1, 1>, scalar_prefetch = 0 : i64, scratch_operands = 1 : i64, tpu.core_type = #tpu.core_type<tc>, window_params = [{transform_indices = @transform_0, window_bounds = array<i64: 8, 8>}, {transform_indices = @transform_1, window_bounds = array<i64: 8, 128>}, {transform_indices = @transform_2, window_bounds = array<i64: 1, 128>}, {transform_indices = @transform_3, window_bounds = array<i64: 8, 128>}]} {
    %c0_i32 = arith.constant 0 : i32
    %0 = arith.cmpi eq, %arg2, %c0_i32 : i32
    %1 = arith.extui %0 : i1 to i32
    %c0_i32_0 = arith.constant 0 : i32
    %2 = arith.cmpi ne, %1, %c0_i32_0 : i32
    scf.if %2 {
      %cst_10 = arith.constant 0.000000e+00 : f32
      %12 = vector.broadcast %cst_10 : f32 to vector<8x128xf32>
      %c0_11 = arith.constant 0 : index
      %c0_12 = arith.constant 0 : index
      %13 = vector.load %arg7[%c0_11, %c0_12] : memref<8x128xf32, #tpu.memory_space<vmem>>, vector<8x128xf32>
      tpu.vector_store %arg7[%c0_11, %c0_12], %12 {strides = array<i32>} : memref<8x128xf32, #tpu.memory_space<vmem>>, vector<8x128xf32>,
    } else {
    }
    %c0 = arith.constant 0 : index
    %c0_1 = arith.constant 0 : index
    %3 = vector.load %arg7[%c0, %c0_1] : memref<8x128xf32, #tpu.memory_space<vmem>>, vector<8x128xf32>
    %c0_2 = arith.constant 0 : index
    %c0_3 = arith.constant 0 : index
    %4 = vector.load %arg3[%c0_2, %c0_3] : memref<8x8xbf16, #tpu.memory_space<vmem>>, vector<8x8xbf16>
    %c0_4 = arith.constant 0 : index
    %c0_5 = arith.constant 0 : index
    %5 = vector.load %arg4[%c0_4, %c0_5] : memref<8x128xbf16, #tpu.memory_space<vmem>>, vector<8x128xbf16>
    %cst = arith.constant dense<0.000000e+00> : vector<8x128xf32>
    %6 = tpu.matmul %4, %5, %cst {dimension_numbers = #tpu.dot_dimension_numbers<[1], [0], [0], [1], [0, 0, 1, 1], [], []>} : vector<8x8xbf16>, vector<8x128xbf16>, vector<8x128xf32> -> vector<8x128xf32>
    %7 = arith.addf %3, %6 : vector<8x128xf32>
    %c0_6 = arith.constant 0 : index
    %c0_7 = arith.constant 0 : index
    %8 = vector.load %arg7[%c0_6, %c0_7] : memref<8x128xf32, #tpu.memory_space<vmem>>, vector<8x128xf32>
    tpu.vector_store %arg7[%c0_6, %c0_7], %7 {strides = array<i32>} : memref<8x128xf32, #tpu.memory_space<vmem>>, vector<8x128xf32>,
    %c0_i32_8 = arith.constant 0 : i32
    %9 = arith.cmpi eq, %arg2, %c0_i32_8 : i32
    %10 = arith.extui %9 : i1 to i32
    %c0_i32_9 = arith.constant 0 : i32
    %11 = arith.cmpi ne, %10, %c0_i32_9 : i32
    scf.if %11 {
      %c0_10 = arith.constant 0 : index
      %c0_11 = arith.constant 0 : index
      %12 = vector.load %arg7[%c0_10, %c0_11] : memref<8x128xf32, #tpu.memory_space<vmem>>, vector<8x128xf32>
      %c0_12 = arith.constant 0 : index
      %c0_13 = arith.constant 0 : index
      %13 = vector.load %arg5[%c0_12, %c0_13] : memref<1x128xf32, #tpu.memory_space<vmem>>, vector<1x128xf32>
      %14 = vector.broadcast %13 : vector<1x128xf32> to vector<8x128xf32>
      %15 = arith.addf %12, %14 : vector<8x128xf32>
      %16 = arith.truncf %15 : vector<8x128xf32> to vector<8x128xbf16>
      %c0_14 = arith.constant 0 : index
      %c0_15 = arith.constant 0 : index
      %17 = vector.load %arg6[%c0_14, %c0_15] : memref<8x128xbf16, #tpu.memory_space<vmem>>, vector<8x128xbf16>
      tpu.vector_store %arg6[%c0_14, %c0_15], %16 {strides = array<i32>} : memref<8x128xbf16, #tpu.memory_space<vmem>>, vector<8x128xbf16>,
    } else {
    }
    return
  }
  func.func @transform_0(%arg0: i32, %arg1: i32, %arg2: i32) -> (i32, i32) {
    %c0_i32 = arith.constant 0 : i32
    return %arg0, %arg2 : i32, i32
  }
  func.func @transform_1(%arg0: i32, %arg1: i32, %arg2: i32) -> (i32, i32) {
    %c0_i32 = arith.constant 0 : i32
    return %arg2, %arg1 : i32, i32
  }
  func.func @transform_2(%arg0: i32, %arg1: i32, %arg2: i32) -> (i32, i32) {
    %c0_i32 = arith.constant 0 : i32
    %c0_i32_0 = arith.constant 0 : i32
    return %c0_i32, %arg1 : i32, i32
  }
  func.func @transform_3(%arg0: i32, %arg1: i32, %arg2: i32) -> (i32, i32) {
    %c0_i32 = arith.constant 0 : i32
    return %arg0, %arg1 : i32, i32
  }
}

module attributes {stable_mosaic.version = 11 : i64} {
  func.func @_mm_kernel(%arg0: i32, %arg1: i32, %arg2: i32, %arg3: memref<8x128xbf16, #tpu.memory_space<vmem>>, %arg4: memref<128x256xbf16, #tpu.memory_space<vmem>>, %arg5: memref<1x256xf32, #tpu.memory_space<vmem>>, %arg6: memref<8x256xbf16, #tpu.memory_space<vmem>>, %arg7: memref<8x256xf32, #tpu.memory_space<vmem>>) attributes {dimension_semantics = [#tpu.dimension_semantics<parallel>, #tpu.dimension_semantics<parallel>, #tpu.dimension_semantics<arbitrary>], iteration_bounds = array<i64: 1, 1, 1>, scalar_prefetch = 0 : i64, scratch_operands = 1 : i64, tpu.core_type = #tpu.core_type<tc>, window_params = [{transform_indices = @transform_0, window_bounds = array<i64: 8, 128>}, {transform_indices = @transform_1, window_bounds = array<i64: 128, 256>}, {transform_indices = @transform_2, window_bounds = array<i64: 1, 256>}, {transform_indices = @transform_3, window_bounds = array<i64: 8, 256>}]} {
    %c0_i32 = arith.constant 0 : i32
    %0 = arith.cmpi eq, %arg2, %c0_i32 : i32
    %1 = arith.extui %0 : i1 to i32
    %c0_i32_0 = arith.constant 0 : i32
    %2 = arith.cmpi ne, %1, %c0_i32_0 : i32
    scf.if %2 {
      %cst_10 = arith.constant 0.000000e+00 : f32
      %12 = vector.broadcast %cst_10 : f32 to vector<8x256xf32>
      %c0_11 = arith.constant 0 : index
      %c0_12 = arith.constant 0 : index
      %13 = vector.load %arg7[%c0_11, %c0_12] : memref<8x256xf32, #tpu.memory_space<vmem>>, vector<8x256xf32>
      tpu.vector_store %arg7[%c0_11, %c0_12], %12 {strides = array<i32>} : memref<8x256xf32, #tpu.memory_space<vmem>>, vector<8x256xf32>,
    } else {
    }
    %c0 = arith.constant 0 : index
    %c0_1 = arith.constant 0 : index
    %3 = vector.load %arg7[%c0, %c0_1] : memref<8x256xf32, #tpu.memory_space<vmem>>, vector<8x256xf32>
    %c0_2 = arith.constant 0 : index
    %c0_3 = arith.constant 0 : index
    %4 = vector.load %arg3[%c0_2, %c0_3] : memref<8x128xbf16, #tpu.memory_space<vmem>>, vector<8x128xbf16>
    %c0_4 = arith.constant 0 : index
    %c0_5 = arith.constant 0 : index
    %5 = vector.load %arg4[%c0_4, %c0_5] : memref<128x256xbf16, #tpu.memory_space<vmem>>, vector<128x256xbf16>
    %cst = arith.constant dense<0.000000e+00> : vector<8x256xf32>
    %6 = tpu.matmul %4, %5, %cst {dimension_numbers = #tpu.dot_dimension_numbers<[1], [0], [0], [1], [0, 0, 1, 1], [], []>} : vector<8x128xbf16>, vector<128x256xbf16>, vector<8x256xf32> -> vector<8x256xf32>
    %7 = arith.addf %3, %6 : vector<8x256xf32>
    %c0_6 = arith.constant 0 : index
    %c0_7 = arith.constant 0 : index
    %8 = vector.load %arg7[%c0_6, %c0_7] : memref<8x256xf32, #tpu.memory_space<vmem>>, vector<8x256xf32>
    tpu.vector_store %arg7[%c0_6, %c0_7], %7 {strides = array<i32>} : memref<8x256xf32, #tpu.memory_space<vmem>>, vector<8x256xf32>,
    %c0_i32_8 = arith.constant 0 : i32
    %9 = arith.cmpi eq, %arg2, %c0_i32_8 : i32
    %10 = arith.extui %9 : i1 to i32
    %c0_i32_9 = arith.constant 0 : i32
    %11 = arith.cmpi ne, %10, %c0_i32_9 : i32
    scf.if %11 {
      %c0_10 = arith.constant 0 : index
      %c0_11 = arith.constant 0 : index
      %12 = vector.load %arg7[%c0_10, %c0_11] : memref<8x256xf32, #tpu.memory_space<vmem>>, vector<8x256xf32>
      %c0_12 = arith.constant 0 : index
      %c0_13 = arith.constant 0 : index
      %13 = vector.load %arg5[%c0_12, %c0_13] : memref<1x256xf32, #tpu.memory_space<vmem>>, vector<1x256xf32>
      %14 = vector.broadcast %13 : vector<1x256xf32> to vector<8x256xf32>
      %15 = arith.addf %12, %14 : vector<8x256xf32>
      %cst_14 = arith.constant 0.000000e+00 : f32
      %16 = vector.broadcast %cst_14 : f32 to vector<8x256xf32>
      %17 = arith.maximumf %15, %16 : vector<8x256xf32>
      %18 = arith.truncf %17 : vector<8x256xf32> to vector<8x256xbf16>
      %c0_15 = arith.constant 0 : index
      %c0_16 = arith.constant 0 : index
      %19 = vector.load %arg6[%c0_15, %c0_16] : memref<8x256xbf16, #tpu.memory_space<vmem>>, vector<8x256xbf16>
      tpu.vector_store %arg6[%c0_15, %c0_16], %18 {strides = array<i32>} : memref<8x256xbf16, #tpu.memory_space<vmem>>, vector<8x256xbf16>,
    } else {
    }
    return
  }
  func.func @transform_0(%arg0: i32, %arg1: i32, %arg2: i32) -> (i32, i32) {
    %c0_i32 = arith.constant 0 : i32
    return %arg0, %arg2 : i32, i32
  }
  func.func @transform_1(%arg0: i32, %arg1: i32, %arg2: i32) -> (i32, i32) {
    %c0_i32 = arith.constant 0 : i32
    return %arg2, %arg1 : i32, i32
  }
  func.func @transform_2(%arg0: i32, %arg1: i32, %arg2: i32) -> (i32, i32) {
    %c0_i32 = arith.constant 0 : i32
    %c0_i32_0 = arith.constant 0 : i32
    return %c0_i32, %arg1 : i32, i32
  }
  func.func @transform_3(%arg0: i32, %arg1: i32, %arg2: i32) -> (i32, i32) {
    %c0_i32 = arith.constant 0 : i32
    return %arg0, %arg1 : i32, i32
  }
}

module attributes {stable_mosaic.version = 11 : i64} {
  func.func @_mm_kernel(%arg0: i32, %arg1: i32, %arg2: i32, %arg3: memref<8x128xbf16, #tpu.memory_space<vmem>>, %arg4: memref<128x256xbf16, #tpu.memory_space<vmem>>, %arg5: memref<1x256xf32, #tpu.memory_space<vmem>>, %arg6: memref<8x256xbf16, #tpu.memory_space<vmem>>, %arg7: memref<8x256xf32, #tpu.memory_space<vmem>>) attributes {dimension_semantics = [#tpu.dimension_semantics<parallel>, #tpu.dimension_semantics<parallel>, #tpu.dimension_semantics<arbitrary>], iteration_bounds = array<i64: 1, 1, 1>, scalar_prefetch = 0 : i64, scratch_operands = 1 : i64, tpu.core_type = #tpu.core_type<tc>, window_params = [{transform_indices = @transform_0, window_bounds = array<i64: 8, 128>}, {transform_indices = @transform_1, window_bounds = array<i64: 128, 256>}, {transform_indices = @transform_2, window_bounds = array<i64: 1, 256>}, {transform_indices = @transform_3, window_bounds = array<i64: 8, 256>}]} {
    %c0_i32 = arith.constant 0 : i32
    %0 = arith.cmpi eq, %arg2, %c0_i32 : i32
    %1 = arith.extui %0 : i1 to i32
    %c0_i32_0 = arith.constant 0 : i32
    %2 = arith.cmpi ne, %1, %c0_i32_0 : i32
    scf.if %2 {
      %cst_10 = arith.constant 0.000000e+00 : f32
      %12 = vector.broadcast %cst_10 : f32 to vector<8x256xf32>
      %c0_11 = arith.constant 0 : index
      %c0_12 = arith.constant 0 : index
      %13 = vector.load %arg7[%c0_11, %c0_12] : memref<8x256xf32, #tpu.memory_space<vmem>>, vector<8x256xf32>
      tpu.vector_store %arg7[%c0_11, %c0_12], %12 {strides = array<i32>} : memref<8x256xf32, #tpu.memory_space<vmem>>, vector<8x256xf32>,
    } else {
    }
    %c0 = arith.constant 0 : index
    %c0_1 = arith.constant 0 : index
    %3 = vector.load %arg7[%c0, %c0_1] : memref<8x256xf32, #tpu.memory_space<vmem>>, vector<8x256xf32>
    %c0_2 = arith.constant 0 : index
    %c0_3 = arith.constant 0 : index
    %4 = vector.load %arg3[%c0_2, %c0_3] : memref<8x128xbf16, #tpu.memory_space<vmem>>, vector<8x128xbf16>
    %c0_4 = arith.constant 0 : index
    %c0_5 = arith.constant 0 : index
    %5 = vector.load %arg4[%c0_4, %c0_5] : memref<128x256xbf16, #tpu.memory_space<vmem>>, vector<128x256xbf16>
    %cst = arith.constant dense<0.000000e+00> : vector<8x256xf32>
    %6 = tpu.matmul %4, %5, %cst {dimension_numbers = #tpu.dot_dimension_numbers<[1], [0], [0], [1], [0, 0, 1, 1], [], []>} : vector<8x128xbf16>, vector<128x256xbf16>, vector<8x256xf32> -> vector<8x256xf32>
    %7 = arith.addf %3, %6 : vector<8x256xf32>
    %c0_6 = arith.constant 0 : index
    %c0_7 = arith.constant 0 : index
    %8 = vector.load %arg7[%c0_6, %c0_7] : memref<8x256xf32, #tpu.memory_space<vmem>>, vector<8x256xf32>
    tpu.vector_store %arg7[%c0_6, %c0_7], %7 {strides = array<i32>} : memref<8x256xf32, #tpu.memory_space<vmem>>, vector<8x256xf32>,
    %c0_i32_8 = arith.constant 0 : i32
    %9 = arith.cmpi eq, %arg2, %c0_i32_8 : i32
    %10 = arith.extui %9 : i1 to i32
    %c0_i32_9 = arith.constant 0 : i32
    %11 = arith.cmpi ne, %10, %c0_i32_9 : i32
    scf.if %11 {
      %c0_10 = arith.constant 0 : index
      %c0_11 = arith.constant 0 : index
      %12 = vector.load %arg7[%c0_10, %c0_11] : memref<8x256xf32, #tpu.memory_space<vmem>>, vector<8x256xf32>
      %c0_12 = arith.constant 0 : index
      %c0_13 = arith.constant 0 : index
      %13 = vector.load %arg5[%c0_12, %c0_13] : memref<1x256xf32, #tpu.memory_space<vmem>>, vector<1x256xf32>
      %14 = vector.broadcast %13 : vector<1x256xf32> to vector<8x256xf32>
      %15 = arith.addf %12, %14 : vector<8x256xf32>
      %cst_14 = arith.constant 0.000000e+00 : f32
      %16 = vector.broadcast %cst_14 : f32 to vector<8x256xf32>
      %17 = arith.maximumf %15, %16 : vector<8x256xf32>
      %18 = arith.truncf %17 : vector<8x256xf32> to vector<8x256xbf16>
      %c0_15 = arith.constant 0 : index
      %c0_16 = arith.constant 0 : index
      %19 = vector.load %arg6[%c0_15, %c0_16] : memref<8x256xbf16, #tpu.memory_space<vmem>>, vector<8x256xbf16>
      tpu.vector_store %arg6[%c0_15, %c0_16], %18 {strides = array<i32>} : memref<8x256xbf16, #tpu.memory_space<vmem>>, vector<8x256xbf16>,
    } else {
    }
    return
  }
  func.func @transform_0(%arg0: i32, %arg1: i32, %arg2: i32) -> (i32, i32) {
    %c0_i32 = arith.constant 0 : i32
    return %arg0, %arg2 : i32, i32
  }
  func.func @transform_1(%arg0: i32, %arg1: i32, %arg2: i32) -> (i32, i32) {
    %c0_i32 = arith.constant 0 : i32
    return %arg2, %arg1 : i32, i32
  }
  func.func @transform_2(%arg0: i32, %arg1: i32, %arg2: i32) -> (i32, i32) {
    %c0_i32 = arith.constant 0 : i32
    %c0_i32_0 = arith.constant 0 : i32
    return %c0_i32, %arg1 : i32, i32
  }
  func.func @transform_3(%arg0: i32, %arg1: i32, %arg2: i32) -> (i32, i32) {
    %c0_i32 = arith.constant 0 : i32
    return %arg0, %arg1 : i32, i32
  }
}

module attributes {stable_mosaic.version = 11 : i64} {
  func.func @_mm_kernel(%arg0: i32, %arg1: i32, %arg2: i32, %arg3: memref<8x1280xbf16, #tpu.memory_space<vmem>>, %arg4: memref<1280x256xbf16, #tpu.memory_space<vmem>>, %arg5: memref<1x256xf32, #tpu.memory_space<vmem>>, %arg6: memref<8x256xbf16, #tpu.memory_space<vmem>>, %arg7: memref<8x256xf32, #tpu.memory_space<vmem>>) attributes {dimension_semantics = [#tpu.dimension_semantics<parallel>, #tpu.dimension_semantics<parallel>, #tpu.dimension_semantics<arbitrary>], iteration_bounds = array<i64: 1, 1, 1>, scalar_prefetch = 0 : i64, scratch_operands = 1 : i64, tpu.core_type = #tpu.core_type<tc>, window_params = [{transform_indices = @transform_0, window_bounds = array<i64: 8, 1280>}, {transform_indices = @transform_1, window_bounds = array<i64: 1280, 256>}, {transform_indices = @transform_2, window_bounds = array<i64: 1, 256>}, {transform_indices = @transform_3, window_bounds = array<i64: 8, 256>}]} {
    %c0_i32 = arith.constant 0 : i32
    %0 = arith.cmpi eq, %arg2, %c0_i32 : i32
    %1 = arith.extui %0 : i1 to i32
    %c0_i32_0 = arith.constant 0 : i32
    %2 = arith.cmpi ne, %1, %c0_i32_0 : i32
    scf.if %2 {
      %cst_10 = arith.constant 0.000000e+00 : f32
      %12 = vector.broadcast %cst_10 : f32 to vector<8x256xf32>
      %c0_11 = arith.constant 0 : index
      %c0_12 = arith.constant 0 : index
      %13 = vector.load %arg7[%c0_11, %c0_12] : memref<8x256xf32, #tpu.memory_space<vmem>>, vector<8x256xf32>
      tpu.vector_store %arg7[%c0_11, %c0_12], %12 {strides = array<i32>} : memref<8x256xf32, #tpu.memory_space<vmem>>, vector<8x256xf32>,
    } else {
    }
    %c0 = arith.constant 0 : index
    %c0_1 = arith.constant 0 : index
    %3 = vector.load %arg7[%c0, %c0_1] : memref<8x256xf32, #tpu.memory_space<vmem>>, vector<8x256xf32>
    %c0_2 = arith.constant 0 : index
    %c0_3 = arith.constant 0 : index
    %4 = vector.load %arg3[%c0_2, %c0_3] : memref<8x1280xbf16, #tpu.memory_space<vmem>>, vector<8x1280xbf16>
    %c0_4 = arith.constant 0 : index
    %c0_5 = arith.constant 0 : index
    %5 = vector.load %arg4[%c0_4, %c0_5] : memref<1280x256xbf16, #tpu.memory_space<vmem>>, vector<1280x256xbf16>
    %cst = arith.constant dense<0.000000e+00> : vector<8x256xf32>
    %6 = tpu.matmul %4, %5, %cst {dimension_numbers = #tpu.dot_dimension_numbers<[1], [0], [0], [1], [0, 0, 1, 1], [], []>} : vector<8x1280xbf16>, vector<1280x256xbf16>, vector<8x256xf32> -> vector<8x256xf32>
    %7 = arith.addf %3, %6 : vector<8x256xf32>
    %c0_6 = arith.constant 0 : index
    %c0_7 = arith.constant 0 : index
    %8 = vector.load %arg7[%c0_6, %c0_7] : memref<8x256xf32, #tpu.memory_space<vmem>>, vector<8x256xf32>
    tpu.vector_store %arg7[%c0_6, %c0_7], %7 {strides = array<i32>} : memref<8x256xf32, #tpu.memory_space<vmem>>, vector<8x256xf32>,
    %c0_i32_8 = arith.constant 0 : i32
    %9 = arith.cmpi eq, %arg2, %c0_i32_8 : i32
    %10 = arith.extui %9 : i1 to i32
    %c0_i32_9 = arith.constant 0 : i32
    %11 = arith.cmpi ne, %10, %c0_i32_9 : i32
    scf.if %11 {
      %c0_10 = arith.constant 0 : index
      %c0_11 = arith.constant 0 : index
      %12 = vector.load %arg7[%c0_10, %c0_11] : memref<8x256xf32, #tpu.memory_space<vmem>>, vector<8x256xf32>
      %c0_12 = arith.constant 0 : index
      %c0_13 = arith.constant 0 : index
      %13 = vector.load %arg5[%c0_12, %c0_13] : memref<1x256xf32, #tpu.memory_space<vmem>>, vector<1x256xf32>
      %14 = vector.broadcast %13 : vector<1x256xf32> to vector<8x256xf32>
      %15 = arith.addf %12, %14 : vector<8x256xf32>
      %cst_14 = arith.constant 0.000000e+00 : f32
      %16 = vector.broadcast %cst_14 : f32 to vector<8x256xf32>
      %17 = arith.maximumf %15, %16 : vector<8x256xf32>
      %18 = arith.truncf %17 : vector<8x256xf32> to vector<8x256xbf16>
      %c0_15 = arith.constant 0 : index
      %c0_16 = arith.constant 0 : index
      %19 = vector.load %arg6[%c0_15, %c0_16] : memref<8x256xbf16, #tpu.memory_space<vmem>>, vector<8x256xbf16>
      tpu.vector_store %arg6[%c0_15, %c0_16], %18 {strides = array<i32>} : memref<8x256xbf16, #tpu.memory_space<vmem>>, vector<8x256xbf16>,
    } else {
    }
    return
  }
  func.func @transform_0(%arg0: i32, %arg1: i32, %arg2: i32) -> (i32, i32) {
    %c0_i32 = arith.constant 0 : i32
    return %arg0, %arg2 : i32, i32
  }
  func.func @transform_1(%arg0: i32, %arg1: i32, %arg2: i32) -> (i32, i32) {
    %c0_i32 = arith.constant 0 : i32
    return %arg2, %arg1 : i32, i32
  }
  func.func @transform_2(%arg0: i32, %arg1: i32, %arg2: i32) -> (i32, i32) {
    %c0_i32 = arith.constant 0 : i32
    %c0_i32_0 = arith.constant 0 : i32
    return %c0_i32, %arg1 : i32, i32
  }
  func.func @transform_3(%arg0: i32, %arg1: i32, %arg2: i32) -> (i32, i32) {
    %c0_i32 = arith.constant 0 : i32
    return %arg0, %arg1 : i32, i32
  }
}

module attributes {stable_mosaic.version = 11 : i64} {
  func.func @_mm_kernel(%arg0: i32, %arg1: i32, %arg2: i32, %arg3: memref<128x8xbf16, #tpu.memory_space<vmem>>, %arg4: memref<8x64xbf16, #tpu.memory_space<vmem>>, %arg5: memref<1x64xf32, #tpu.memory_space<vmem>>, %arg6: memref<128x64xbf16, #tpu.memory_space<vmem>>, %arg7: memref<128x64xf32, #tpu.memory_space<vmem>>) attributes {dimension_semantics = [#tpu.dimension_semantics<parallel>, #tpu.dimension_semantics<parallel>, #tpu.dimension_semantics<arbitrary>], iteration_bounds = array<i64: 1, 1, 1>, scalar_prefetch = 0 : i64, scratch_operands = 1 : i64, tpu.core_type = #tpu.core_type<tc>, window_params = [{transform_indices = @transform_0, window_bounds = array<i64: 128, 8>}, {transform_indices = @transform_1, window_bounds = array<i64: 8, 64>}, {transform_indices = @transform_2, window_bounds = array<i64: 1, 64>}, {transform_indices = @transform_3, window_bounds = array<i64: 128, 64>}]} {
    %c0_i32 = arith.constant 0 : i32
    %0 = arith.cmpi eq, %arg2, %c0_i32 : i32
    %1 = arith.extui %0 : i1 to i32
    %c0_i32_0 = arith.constant 0 : i32
    %2 = arith.cmpi ne, %1, %c0_i32_0 : i32
    scf.if %2 {
      %cst_10 = arith.constant 0.000000e+00 : f32
      %12 = vector.broadcast %cst_10 : f32 to vector<128x64xf32>
      %c0_11 = arith.constant 0 : index
      %c0_12 = arith.constant 0 : index
      %13 = vector.load %arg7[%c0_11, %c0_12] : memref<128x64xf32, #tpu.memory_space<vmem>>, vector<128x64xf32>
      tpu.vector_store %arg7[%c0_11, %c0_12], %12 {strides = array<i32>} : memref<128x64xf32, #tpu.memory_space<vmem>>, vector<128x64xf32>,
    } else {
    }
    %c0 = arith.constant 0 : index
    %c0_1 = arith.constant 0 : index
    %3 = vector.load %arg7[%c0, %c0_1] : memref<128x64xf32, #tpu.memory_space<vmem>>, vector<128x64xf32>
    %c0_2 = arith.constant 0 : index
    %c0_3 = arith.constant 0 : index
    %4 = vector.load %arg3[%c0_2, %c0_3] : memref<128x8xbf16, #tpu.memory_space<vmem>>, vector<128x8xbf16>
    %c0_4 = arith.constant 0 : index
    %c0_5 = arith.constant 0 : index
    %5 = vector.load %arg4[%c0_4, %c0_5] : memref<8x64xbf16, #tpu.memory_space<vmem>>, vector<8x64xbf16>
    %cst = arith.constant dense<0.000000e+00> : vector<128x64xf32>
    %6 = tpu.matmul %4, %5, %cst {dimension_numbers = #tpu.dot_dimension_numbers<[1], [0], [0], [1], [0, 0, 1, 1], [], []>} : vector<128x8xbf16>, vector<8x64xbf16>, vector<128x64xf32> -> vector<128x64xf32>
    %7 = arith.addf %3, %6 : vector<128x64xf32>
    %c0_6 = arith.constant 0 : index
    %c0_7 = arith.constant 0 : index
    %8 = vector.load %arg7[%c0_6, %c0_7] : memref<128x64xf32, #tpu.memory_space<vmem>>, vector<128x64xf32>
    tpu.vector_store %arg7[%c0_6, %c0_7], %7 {strides = array<i32>} : memref<128x64xf32, #tpu.memory_space<vmem>>, vector<128x64xf32>,
    %c0_i32_8 = arith.constant 0 : i32
    %9 = arith.cmpi eq, %arg2, %c0_i32_8 : i32
    %10 = arith.extui %9 : i1 to i32
    %c0_i32_9 = arith.constant 0 : i32
    %11 = arith.cmpi ne, %10, %c0_i32_9 : i32
    scf.if %11 {
      %c0_10 = arith.constant 0 : index
      %c0_11 = arith.constant 0 : index
      %12 = vector.load %arg7[%c0_10, %c0_11] : memref<128x64xf32, #tpu.memory_space<vmem>>, vector<128x64xf32>
      %c0_12 = arith.constant 0 : index
      %c0_13 = arith.constant 0 : index
      %13 = vector.load %arg5[%c0_12, %c0_13] : memref<1x64xf32, #tpu.memory_space<vmem>>, vector<1x64xf32>
      %14 = vector.broadcast %13 : vector<1x64xf32> to vector<128x64xf32>
      %15 = arith.addf %12, %14 : vector<128x64xf32>
      %16 = arith.truncf %15 : vector<128x64xf32> to vector<128x64xbf16>
      %c0_14 = arith.constant 0 : index
      %c0_15 = arith.constant 0 : index
      %17 = vector.load %arg6[%c0_14, %c0_15] : memref<128x64xbf16, #tpu.memory_space<vmem>>, vector<128x64xbf16>
      tpu.vector_store %arg6[%c0_14, %c0_15], %16 {strides = array<i32>} : memref<128x64xbf16, #tpu.memory_space<vmem>>, vector<128x64xbf16>,
    } else {
    }
    return
  }
  func.func @transform_0(%arg0: i32, %arg1: i32, %arg2: i32) -> (i32, i32) {
    %c0_i32 = arith.constant 0 : i32
    return %arg0, %arg2 : i32, i32
  }
  func.func @transform_1(%arg0: i32, %arg1: i32, %arg2: i32) -> (i32, i32) {
    %c0_i32 = arith.constant 0 : i32
    return %arg2, %arg1 : i32, i32
  }
  func.func @transform_2(%arg0: i32, %arg1: i32, %arg2: i32) -> (i32, i32) {
    %c0_i32 = arith.constant 0 : i32
    %c0_i32_0 = arith.constant 0 : i32
    return %c0_i32, %arg1 : i32, i32
  }
  func.func @transform_3(%arg0: i32, %arg1: i32, %arg2: i32) -> (i32, i32) {
    %c0_i32 = arith.constant 0 : i32
    return %arg0, %arg1 : i32, i32
  }
}

module attributes {stable_mosaic.version = 11 : i64} {
  func.func @_mm_kernel(%arg0: i32, %arg1: i32, %arg2: i32, %arg3: memref<128x64xbf16, #tpu.memory_space<vmem>>, %arg4: memref<64x48xbf16, #tpu.memory_space<vmem>>, %arg5: memref<1x48xf32, #tpu.memory_space<vmem>>, %arg6: memref<128x48xbf16, #tpu.memory_space<vmem>>, %arg7: memref<128x48xf32, #tpu.memory_space<vmem>>) attributes {dimension_semantics = [#tpu.dimension_semantics<parallel>, #tpu.dimension_semantics<parallel>, #tpu.dimension_semantics<arbitrary>], iteration_bounds = array<i64: 1, 1, 1>, scalar_prefetch = 0 : i64, scratch_operands = 1 : i64, tpu.core_type = #tpu.core_type<tc>, window_params = [{transform_indices = @transform_0, window_bounds = array<i64: 128, 64>}, {transform_indices = @transform_1, window_bounds = array<i64: 64, 48>}, {transform_indices = @transform_2, window_bounds = array<i64: 1, 48>}, {transform_indices = @transform_3, window_bounds = array<i64: 128, 48>}]} {
    %c0_i32 = arith.constant 0 : i32
    %0 = arith.cmpi eq, %arg2, %c0_i32 : i32
    %1 = arith.extui %0 : i1 to i32
    %c0_i32_0 = arith.constant 0 : i32
    %2 = arith.cmpi ne, %1, %c0_i32_0 : i32
    scf.if %2 {
      %cst_10 = arith.constant 0.000000e+00 : f32
      %12 = vector.broadcast %cst_10 : f32 to vector<128x48xf32>
      %c0_11 = arith.constant 0 : index
      %c0_12 = arith.constant 0 : index
      %13 = vector.load %arg7[%c0_11, %c0_12] : memref<128x48xf32, #tpu.memory_space<vmem>>, vector<128x48xf32>
      tpu.vector_store %arg7[%c0_11, %c0_12], %12 {strides = array<i32>} : memref<128x48xf32, #tpu.memory_space<vmem>>, vector<128x48xf32>,
    } else {
    }
    %c0 = arith.constant 0 : index
    %c0_1 = arith.constant 0 : index
    %3 = vector.load %arg7[%c0, %c0_1] : memref<128x48xf32, #tpu.memory_space<vmem>>, vector<128x48xf32>
    %c0_2 = arith.constant 0 : index
    %c0_3 = arith.constant 0 : index
    %4 = vector.load %arg3[%c0_2, %c0_3] : memref<128x64xbf16, #tpu.memory_space<vmem>>, vector<128x64xbf16>
    %c0_4 = arith.constant 0 : index
    %c0_5 = arith.constant 0 : index
    %5 = vector.load %arg4[%c0_4, %c0_5] : memref<64x48xbf16, #tpu.memory_space<vmem>>, vector<64x48xbf16>
    %cst = arith.constant dense<0.000000e+00> : vector<128x48xf32>
    %6 = tpu.matmul %4, %5, %cst {dimension_numbers = #tpu.dot_dimension_numbers<[1], [0], [0], [1], [0, 0, 1, 1], [], []>} : vector<128x64xbf16>, vector<64x48xbf16>, vector<128x48xf32> -> vector<128x48xf32>
    %7 = arith.addf %3, %6 : vector<128x48xf32>
    %c0_6 = arith.constant 0 : index
    %c0_7 = arith.constant 0 : index
    %8 = vector.load %arg7[%c0_6, %c0_7] : memref<128x48xf32, #tpu.memory_space<vmem>>, vector<128x48xf32>
    tpu.vector_store %arg7[%c0_6, %c0_7], %7 {strides = array<i32>} : memref<128x48xf32, #tpu.memory_space<vmem>>, vector<128x48xf32>,
    %c0_i32_8 = arith.constant 0 : i32
    %9 = arith.cmpi eq, %arg2, %c0_i32_8 : i32
    %10 = arith.extui %9 : i1 to i32
    %c0_i32_9 = arith.constant 0 : i32
    %11 = arith.cmpi ne, %10, %c0_i32_9 : i32
    scf.if %11 {
      %c0_10 = arith.constant 0 : index
      %c0_11 = arith.constant 0 : index
      %12 = vector.load %arg7[%c0_10, %c0_11] : memref<128x48xf32, #tpu.memory_space<vmem>>, vector<128x48xf32>
      %c0_12 = arith.constant 0 : index
      %c0_13 = arith.constant 0 : index
      %13 = vector.load %arg5[%c0_12, %c0_13] : memref<1x48xf32, #tpu.memory_space<vmem>>, vector<1x48xf32>
      %14 = vector.broadcast %13 : vector<1x48xf32> to vector<128x48xf32>
      %15 = arith.addf %12, %14 : vector<128x48xf32>
      %cst_14 = arith.constant 0.000000e+00 : f32
      %16 = vector.broadcast %cst_14 : f32 to vector<128x48xf32>
      %17 = arith.maximumf %15, %16 : vector<128x48xf32>
      %18 = arith.truncf %17 : vector<128x48xf32> to vector<128x48xbf16>
      %c0_15 = arith.constant 0 : index
      %c0_16 = arith.constant 0 : index
      %19 = vector.load %arg6[%c0_15, %c0_16] : memref<128x48xbf16, #tpu.memory_space<vmem>>, vector<128x48xbf16>
      tpu.vector_store %arg6[%c0_15, %c0_16], %18 {strides = array<i32>} : memref<128x48xbf16, #tpu.memory_space<vmem>>, vector<128x48xbf16>,
    } else {
    }
    return
  }
  func.func @transform_0(%arg0: i32, %arg1: i32, %arg2: i32) -> (i32, i32) {
    %c0_i32 = arith.constant 0 : i32
    return %arg0, %arg2 : i32, i32
  }
  func.func @transform_1(%arg0: i32, %arg1: i32, %arg2: i32) -> (i32, i32) {
    %c0_i32 = arith.constant 0 : i32
    return %arg2, %arg1 : i32, i32
  }
  func.func @transform_2(%arg0: i32, %arg1: i32, %arg2: i32) -> (i32, i32) {
    %c0_i32 = arith.constant 0 : i32
    %c0_i32_0 = arith.constant 0 : i32
    return %c0_i32, %arg1 : i32, i32
  }
  func.func @transform_3(%arg0: i32, %arg1: i32, %arg2: i32) -> (i32, i32) {
    %c0_i32 = arith.constant 0 : i32
    return %arg0, %arg1 : i32, i32
  }
}

module attributes {stable_mosaic.version = 11 : i64} {
  func.func @_mm_kernel(%arg0: i32, %arg1: i32, %arg2: i32, %arg3: memref<128x2736xbf16, #tpu.memory_space<vmem>>, %arg4: memref<2736x256xbf16, #tpu.memory_space<vmem>>, %arg5: memref<1x256xf32, #tpu.memory_space<vmem>>, %arg6: memref<128x256xbf16, #tpu.memory_space<vmem>>, %arg7: memref<128x256xf32, #tpu.memory_space<vmem>>) attributes {dimension_semantics = [#tpu.dimension_semantics<parallel>, #tpu.dimension_semantics<parallel>, #tpu.dimension_semantics<arbitrary>], iteration_bounds = array<i64: 1, 1, 1>, scalar_prefetch = 0 : i64, scratch_operands = 1 : i64, tpu.core_type = #tpu.core_type<tc>, window_params = [{transform_indices = @transform_0, window_bounds = array<i64: 128, 2736>}, {transform_indices = @transform_1, window_bounds = array<i64: 2736, 256>}, {transform_indices = @transform_2, window_bounds = array<i64: 1, 256>}, {transform_indices = @transform_3, window_bounds = array<i64: 128, 256>}]} {
    %c0_i32 = arith.constant 0 : i32
    %0 = arith.cmpi eq, %arg2, %c0_i32 : i32
    %1 = arith.extui %0 : i1 to i32
    %c0_i32_0 = arith.constant 0 : i32
    %2 = arith.cmpi ne, %1, %c0_i32_0 : i32
    scf.if %2 {
      %cst_10 = arith.constant 0.000000e+00 : f32
      %12 = vector.broadcast %cst_10 : f32 to vector<128x256xf32>
      %c0_11 = arith.constant 0 : index
      %c0_12 = arith.constant 0 : index
      %13 = vector.load %arg7[%c0_11, %c0_12] : memref<128x256xf32, #tpu.memory_space<vmem>>, vector<128x256xf32>
      tpu.vector_store %arg7[%c0_11, %c0_12], %12 {strides = array<i32>} : memref<128x256xf32, #tpu.memory_space<vmem>>, vector<128x256xf32>,
    } else {
    }
    %c0 = arith.constant 0 : index
    %c0_1 = arith.constant 0 : index
    %3 = vector.load %arg7[%c0, %c0_1] : memref<128x256xf32, #tpu.memory_space<vmem>>, vector<128x256xf32>
    %c0_2 = arith.constant 0 : index
    %c0_3 = arith.constant 0 : index
    %4 = vector.load %arg3[%c0_2, %c0_3] : memref<128x2736xbf16, #tpu.memory_space<vmem>>, vector<128x2736xbf16>
    %c0_4 = arith.constant 0 : index
    %c0_5 = arith.constant 0 : index
    %5 = vector.load %arg4[%c0_4, %c0_5] : memref<2736x256xbf16, #tpu.memory_space<vmem>>, vector<2736x256xbf16>
    %cst = arith.constant dense<0.000000e+00> : vector<128x256xf32>
    %6 = tpu.matmul %4, %5, %cst {dimension_numbers = #tpu.dot_dimension_numbers<[1], [0], [0], [1], [0, 0, 1, 1], [], []>} : vector<128x2736xbf16>, vector<2736x256xbf16>, vector<128x256xf32> -> vector<128x256xf32>
    %7 = arith.addf %3, %6 : vector<128x256xf32>
    %c0_6 = arith.constant 0 : index
    %c0_7 = arith.constant 0 : index
    %8 = vector.load %arg7[%c0_6, %c0_7] : memref<128x256xf32, #tpu.memory_space<vmem>>, vector<128x256xf32>
    tpu.vector_store %arg7[%c0_6, %c0_7], %7 {strides = array<i32>} : memref<128x256xf32, #tpu.memory_space<vmem>>, vector<128x256xf32>,
    %c0_i32_8 = arith.constant 0 : i32
    %9 = arith.cmpi eq, %arg2, %c0_i32_8 : i32
    %10 = arith.extui %9 : i1 to i32
    %c0_i32_9 = arith.constant 0 : i32
    %11 = arith.cmpi ne, %10, %c0_i32_9 : i32
    scf.if %11 {
      %c0_10 = arith.constant 0 : index
      %c0_11 = arith.constant 0 : index
      %12 = vector.load %arg7[%c0_10, %c0_11] : memref<128x256xf32, #tpu.memory_space<vmem>>, vector<128x256xf32>
      %c0_12 = arith.constant 0 : index
      %c0_13 = arith.constant 0 : index
      %13 = vector.load %arg5[%c0_12, %c0_13] : memref<1x256xf32, #tpu.memory_space<vmem>>, vector<1x256xf32>
      %14 = vector.broadcast %13 : vector<1x256xf32> to vector<128x256xf32>
      %15 = arith.addf %12, %14 : vector<128x256xf32>
      %cst_14 = arith.constant 0.000000e+00 : f32
      %16 = vector.broadcast %cst_14 : f32 to vector<128x256xf32>
      %17 = arith.maximumf %15, %16 : vector<128x256xf32>
      %18 = arith.truncf %17 : vector<128x256xf32> to vector<128x256xbf16>
      %c0_15 = arith.constant 0 : index
      %c0_16 = arith.constant 0 : index
      %19 = vector.load %arg6[%c0_15, %c0_16] : memref<128x256xbf16, #tpu.memory_space<vmem>>, vector<128x256xbf16>
      tpu.vector_store %arg6[%c0_15, %c0_16], %18 {strides = array<i32>} : memref<128x256xbf16, #tpu.memory_space<vmem>>, vector<128x256xbf16>,
    } else {
    }
    return
  }
  func.func @transform_0(%arg0: i32, %arg1: i32, %arg2: i32) -> (i32, i32) {
    %c0_i32 = arith.constant 0 : i32
    return %arg0, %arg2 : i32, i32
  }
  func.func @transform_1(%arg0: i32, %arg1: i32, %arg2: i32) -> (i32, i32) {
    %c0_i32 = arith.constant 0 : i32
    return %arg2, %arg1 : i32, i32
  }
  func.func @transform_2(%arg0: i32, %arg1: i32, %arg2: i32) -> (i32, i32) {
    %c0_i32 = arith.constant 0 : i32
    %c0_i32_0 = arith.constant 0 : i32
    return %c0_i32, %arg1 : i32, i32
  }
  func.func @transform_3(%arg0: i32, %arg1: i32, %arg2: i32) -> (i32, i32) {
    %c0_i32 = arith.constant 0 : i32
    return %arg0, %arg1 : i32, i32
  }
}

module attributes {stable_mosaic.version = 11 : i64} {
  func.func @_mm_kernel(%arg0: i32, %arg1: i32, %arg2: i32, %arg3: memref<128x256xbf16, #tpu.memory_space<vmem>>, %arg4: memref<256x256xbf16, #tpu.memory_space<vmem>>, %arg5: memref<1x256xf32, #tpu.memory_space<vmem>>, %arg6: memref<128x256xbf16, #tpu.memory_space<vmem>>, %arg7: memref<128x256xf32, #tpu.memory_space<vmem>>) attributes {dimension_semantics = [#tpu.dimension_semantics<parallel>, #tpu.dimension_semantics<parallel>, #tpu.dimension_semantics<arbitrary>], iteration_bounds = array<i64: 1, 1, 9>, scalar_prefetch = 0 : i64, scratch_operands = 1 : i64, tpu.core_type = #tpu.core_type<tc>, window_params = [{transform_indices = @transform_0, window_bounds = array<i64: 128, 256>}, {transform_indices = @transform_1, window_bounds = array<i64: 256, 256>}, {transform_indices = @transform_2, window_bounds = array<i64: 1, 256>}, {transform_indices = @transform_3, window_bounds = array<i64: 128, 256>}]} {
    %c0_i32 = arith.constant 0 : i32
    %0 = arith.cmpi eq, %arg2, %c0_i32 : i32
    %1 = arith.extui %0 : i1 to i32
    %c0_i32_0 = arith.constant 0 : i32
    %2 = arith.cmpi ne, %1, %c0_i32_0 : i32
    scf.if %2 {
      %cst_9 = arith.constant 0.000000e+00 : f32
      %12 = vector.broadcast %cst_9 : f32 to vector<128x256xf32>
      %c0_10 = arith.constant 0 : index
      %c0_11 = arith.constant 0 : index
      %13 = vector.load %arg7[%c0_10, %c0_11] : memref<128x256xf32, #tpu.memory_space<vmem>>, vector<128x256xf32>
      tpu.vector_store %arg7[%c0_10, %c0_11], %12 {strides = array<i32>} : memref<128x256xf32, #tpu.memory_space<vmem>>, vector<128x256xf32>,
    } else {
    }
    %c0 = arith.constant 0 : index
    %c0_1 = arith.constant 0 : index
    %3 = vector.load %arg7[%c0, %c0_1] : memref<128x256xf32, #tpu.memory_space<vmem>>, vector<128x256xf32>
    %c0_2 = arith.constant 0 : index
    %c0_3 = arith.constant 0 : index
    %4 = vector.load %arg3[%c0_2, %c0_3] : memref<128x256xbf16, #tpu.memory_space<vmem>>, vector<128x256xbf16>
    %c0_4 = arith.constant 0 : index
    %c0_5 = arith.constant 0 : index
    %5 = vector.load %arg4[%c0_4, %c0_5] : memref<256x256xbf16, #tpu.memory_space<vmem>>, vector<256x256xbf16>
    %cst = arith.constant dense<0.000000e+00> : vector<128x256xf32>
    %6 = tpu.matmul %4, %5, %cst {dimension_numbers = #tpu.dot_dimension_numbers<[1], [0], [0], [1], [0, 0, 1, 1], [], []>} : vector<128x256xbf16>, vector<256x256xbf16>, vector<128x256xf32> -> vector<128x256xf32>
    %7 = arith.addf %3, %6 : vector<128x256xf32>
    %c0_6 = arith.constant 0 : index
    %c0_7 = arith.constant 0 : index
    %8 = vector.load %arg7[%c0_6, %c0_7] : memref<128x256xf32, #tpu.memory_space<vmem>>, vector<128x256xf32>
    tpu.vector_store %arg7[%c0_6, %c0_7], %7 {strides = array<i32>} : memref<128x256xf32, #tpu.memory_space<vmem>>, vector<128x256xf32>,
    %c8_i32 = arith.constant 8 : i32
    %9 = arith.cmpi eq, %arg2, %c8_i32 : i32
    %10 = arith.extui %9 : i1 to i32
    %c0_i32_8 = arith.constant 0 : i32
    %11 = arith.cmpi ne, %10, %c0_i32_8 : i32
    scf.if %11 {
      %c0_9 = arith.constant 0 : index
      %c0_10 = arith.constant 0 : index
      %12 = vector.load %arg7[%c0_9, %c0_10] : memref<128x256xf32, #tpu.memory_space<vmem>>, vector<128x256xf32>
      %c0_11 = arith.constant 0 : index
      %c0_12 = arith.constant 0 : index
      %13 = vector.load %arg5[%c0_11, %c0_12] : memref<1x256xf32, #tpu.memory_space<vmem>>, vector<1x256xf32>
      %14 = vector.broadcast %13 : vector<1x256xf32> to vector<128x256xf32>
      %15 = arith.addf %12, %14 : vector<128x256xf32>
      %cst_13 = arith.constant 0.000000e+00 : f32
      %16 = vector.broadcast %cst_13 : f32 to vector<128x256xf32>
      %17 = arith.maximumf %15, %16 : vector<128x256xf32>
      %18 = arith.truncf %17 : vector<128x256xf32> to vector<128x256xbf16>
      %c0_14 = arith.constant 0 : index
      %c0_15 = arith.constant 0 : index
      %19 = vector.load %arg6[%c0_14, %c0_15] : memref<128x256xbf16, #tpu.memory_space<vmem>>, vector<128x256xbf16>
      tpu.vector_store %arg6[%c0_14, %c0_15], %18 {strides = array<i32>} : memref<128x256xbf16, #tpu.memory_space<vmem>>, vector<128x256xbf16>,
    } else {
    }
    return
  }
  func.func @transform_0(%arg0: i32, %arg1: i32, %arg2: i32) -> (i32, i32) {
    %c0_i32 = arith.constant 0 : i32
    return %arg0, %arg2 : i32, i32
  }
  func.func @transform_1(%arg0: i32, %arg1: i32, %arg2: i32) -> (i32, i32) {
    %c0_i32 = arith.constant 0 : i32
    return %arg2, %arg1 : i32, i32
  }
  func.func @transform_2(%arg0: i32, %arg1: i32, %arg2: i32) -> (i32, i32) {
    %c0_i32 = arith.constant 0 : i32
    %c0_i32_0 = arith.constant 0 : i32
    return %c0_i32, %arg1 : i32, i32
  }
  func.func @transform_3(%arg0: i32, %arg1: i32, %arg2: i32) -> (i32, i32) {
    %c0_i32 = arith.constant 0 : i32
    return %arg0, %arg1 : i32, i32
  }
}

module attributes {stable_mosaic.version = 11 : i64} {
  func.func @_mm_kernel(%arg0: i32, %arg1: i32, %arg2: i32, %arg3: memref<128x256xbf16, #tpu.memory_space<vmem>>, %arg4: memref<256x22xbf16, #tpu.memory_space<vmem>>, %arg5: memref<1x22xf32, #tpu.memory_space<vmem>>, %arg6: memref<128x22xbf16, #tpu.memory_space<vmem>>, %arg7: memref<128x22xf32, #tpu.memory_space<vmem>>) attributes {dimension_semantics = [#tpu.dimension_semantics<parallel>, #tpu.dimension_semantics<parallel>, #tpu.dimension_semantics<arbitrary>], iteration_bounds = array<i64: 1, 1, 1>, scalar_prefetch = 0 : i64, scratch_operands = 1 : i64, tpu.core_type = #tpu.core_type<tc>, window_params = [{transform_indices = @transform_0, window_bounds = array<i64: 128, 256>}, {transform_indices = @transform_1, window_bounds = array<i64: 256, 22>}, {transform_indices = @transform_2, window_bounds = array<i64: 1, 22>}, {transform_indices = @transform_3, window_bounds = array<i64: 128, 22>}]} {
    %c0_i32 = arith.constant 0 : i32
    %0 = arith.cmpi eq, %arg2, %c0_i32 : i32
    %1 = arith.extui %0 : i1 to i32
    %c0_i32_0 = arith.constant 0 : i32
    %2 = arith.cmpi ne, %1, %c0_i32_0 : i32
    scf.if %2 {
      %cst_10 = arith.constant 0.000000e+00 : f32
      %12 = vector.broadcast %cst_10 : f32 to vector<128x22xf32>
      %c0_11 = arith.constant 0 : index
      %c0_12 = arith.constant 0 : index
      %13 = vector.load %arg7[%c0_11, %c0_12] : memref<128x22xf32, #tpu.memory_space<vmem>>, vector<128x22xf32>
      tpu.vector_store %arg7[%c0_11, %c0_12], %12 {strides = array<i32>} : memref<128x22xf32, #tpu.memory_space<vmem>>, vector<128x22xf32>,
    } else {
    }
    %c0 = arith.constant 0 : index
    %c0_1 = arith.constant 0 : index
    %3 = vector.load %arg7[%c0, %c0_1] : memref<128x22xf32, #tpu.memory_space<vmem>>, vector<128x22xf32>
    %c0_2 = arith.constant 0 : index
    %c0_3 = arith.constant 0 : index
    %4 = vector.load %arg3[%c0_2, %c0_3] : memref<128x256xbf16, #tpu.memory_space<vmem>>, vector<128x256xbf16>
    %c0_4 = arith.constant 0 : index
    %c0_5 = arith.constant 0 : index
    %5 = vector.load %arg4[%c0_4, %c0_5] : memref<256x22xbf16, #tpu.memory_space<vmem>>, vector<256x22xbf16>
    %cst = arith.constant dense<0.000000e+00> : vector<128x22xf32>
    %6 = tpu.matmul %4, %5, %cst {dimension_numbers = #tpu.dot_dimension_numbers<[1], [0], [0], [1], [0, 0, 1, 1], [], []>} : vector<128x256xbf16>, vector<256x22xbf16>, vector<128x22xf32> -> vector<128x22xf32>
    %7 = arith.addf %3, %6 : vector<128x22xf32>
    %c0_6 = arith.constant 0 : index
    %c0_7 = arith.constant 0 : index
    %8 = vector.load %arg7[%c0_6, %c0_7] : memref<128x22xf32, #tpu.memory_space<vmem>>, vector<128x22xf32>
    tpu.vector_store %arg7[%c0_6, %c0_7], %7 {strides = array<i32>} : memref<128x22xf32, #tpu.memory_space<vmem>>, vector<128x22xf32>,
    %c0_i32_8 = arith.constant 0 : i32
    %9 = arith.cmpi eq, %arg2, %c0_i32_8 : i32
    %10 = arith.extui %9 : i1 to i32
    %c0_i32_9 = arith.constant 0 : i32
    %11 = arith.cmpi ne, %10, %c0_i32_9 : i32
    scf.if %11 {
      %c0_10 = arith.constant 0 : index
      %c0_11 = arith.constant 0 : index
      %12 = vector.load %arg7[%c0_10, %c0_11] : memref<128x22xf32, #tpu.memory_space<vmem>>, vector<128x22xf32>
      %c0_12 = arith.constant 0 : index
      %c0_13 = arith.constant 0 : index
      %13 = vector.load %arg5[%c0_12, %c0_13] : memref<1x22xf32, #tpu.memory_space<vmem>>, vector<1x22xf32>
      %14 = vector.broadcast %13 : vector<1x22xf32> to vector<128x22xf32>
      %15 = arith.addf %12, %14 : vector<128x22xf32>
      %16 = arith.truncf %15 : vector<128x22xf32> to vector<128x22xbf16>
      %c0_14 = arith.constant 0 : index
      %c0_15 = arith.constant 0 : index
      %17 = vector.load %arg6[%c0_14, %c0_15] : memref<128x22xbf16, #tpu.memory_space<vmem>>, vector<128x22xbf16>
      tpu.vector_store %arg6[%c0_14, %c0_15], %16 {strides = array<i32>} : memref<128x22xbf16, #tpu.memory_space<vmem>>, vector<128x22xbf16>,
    } else {
    }
    return
  }
  func.func @transform_0(%arg0: i32, %arg1: i32, %arg2: i32) -> (i32, i32) {
    %c0_i32 = arith.constant 0 : i32
    return %arg0, %arg2 : i32, i32
  }
  func.func @transform_1(%arg0: i32, %arg1: i32, %arg2: i32) -> (i32, i32) {
    %c0_i32 = arith.constant 0 : i32
    return %arg2, %arg1 : i32, i32
  }
  func.func @transform_2(%arg0: i32, %arg1: i32, %arg2: i32) -> (i32, i32) {
    %c0_i32 = arith.constant 0 : i32
    %c0_i32_0 = arith.constant 0 : i32
    return %c0_i32, %arg1 : i32, i32
  }
  func.func @transform_3(%arg0: i32, %arg1: i32, %arg2: i32) -> (i32, i32) {
    %c0_i32 = arith.constant 0 : i32
    return %arg0, %arg1 : i32, i32
  }
}

</mosaic_0001>

<bundles_post_ra>
// kernel: deeplabv3p_forward.14
= control target key start
LH: loop header
LB: loop body
LE: loop exit
PB: predicated region body
PF: predicated region fallthrough
CT: control target
= control target key end

     0   :  { %8 = vsyncpa [#allocation4], 0  ;;  %s377_s0 = inlined_call_operand.vmem [shape: bf16[8,128], index: 0, kind: input, shape index: {}]   ;;  %s378_s1 = inlined_call_operand.hbm [shape: bf16[128,256], index: 1, kind: input, shape index: {}]   ;;  %s379_s2 = inlined_call_operand.hbm [shape: f32[1,256], index: 2, kind: input, shape index: {}]   ;;  %s380_s3 = inlined_call_operand.vmem [shape: bf16[8,256], index: 3, kind: output, shape index: {}]  }
   0x1   :  { %9 = vsyncpa [#allocation6], 0  ;;  %s322_s12 = smov [#allocation3]   ;;  %s274_s16 = scalar_lea.hbm %s378_s1, 2048 }
   0x2   :  { %s17_s13 = sshll.u32 %s322_s12, 4  ;;  %p275_p0 = scmp.ne.s32.totalorder %s378_s1, %s274_s16  ;;  %s18_s13 = int_to_ptr.vmem [resolvable:$true] %s17_s13 }
   0x3   :  { %p278_p1 = scmp.lt.u32.totalorder %s274_s16, %s378_s1 }
   0x5   :  { %p280_p2 = pnand %p278_p1, %p275_p0 }
   0x7   :  { %283 = shalt.err (!%p280_p2)
}
   0x8   :  { %s284_s21 = scalar_lea.vmem %s18_s13, 2048  ;;  %p289_p4 = scmp.lt.s32.totalorder %s18_s13, %s18_s13 }
   0x9   :  { %p285_p3 = scmp.ne.s32.totalorder %s18_s13, %s284_s21  ;;  %p290_p5 = scmp.lt.s32.totalorder %s284_s21, %s284_s21 }
   0xb   :  { %p291_p6 = por %p290_p5, %p289_p4 }
   0xd   :  { %p292_p7 = pnand %p291_p6, %p285_p3 }
   0xf   :  { %295 = shalt.err (!%p292_p7)
}
  0x10   :  { %s323_s22 = smov 128   ;;  %s324_s23 = smov 8  }
  0x11   :  { %23 = dma.hbm_to_vmem [thread:$0]  %s378_s1, 2048, %s18_s13, [#allocation4], %s323_s22, %s323_s22, %s324_s23  }
  0x12   :  { %s325_s26 = smov [#allocation5]   ;;  %s296_s30 = scalar_lea.hbm %s379_s2, 32 }
  0x13   :  { %s30_s27 = sshll.u32 %s325_s26, 4  ;;  %p297_p8 = scmp.ne.s32.totalorder %s379_s2, %s296_s30  ;;  %s31_s27 = int_to_ptr.vmem [resolvable:$true] %s30_s27 }
  0x14   :  { %p300_p9 = scmp.lt.u32.totalorder %s296_s30, %s379_s2 }
  0x16   :  { %p302_p10 = pnand %p300_p9, %p297_p8 }
  0x18   :  { %305 = shalt.err (!%p302_p10)
}
  0x19   :  { %s306_s8 = scalar_lea.vmem %s31_s27, 32  ;;  %p311_p12 = scmp.lt.s32.totalorder %s31_s27, %s31_s27 }
  0x1a   :  { %p307_p11 = scmp.ne.s32.totalorder %s31_s27, %s306_s8  ;;  %p312_p13 = scmp.lt.s32.totalorder %s306_s8, %s306_s8 }
  0x1c   :  { %p313_p0 = por %p312_p13, %p311_p12 }
  0x1e   :  { %p314_p1 = pnand %p313_p0, %p307_p11 }
  0x20   :  { %317 = shalt.err (!%p314_p1)
}
  0x21   :  { %33 = dma.hbm_to_vmem [thread:$0]  %s379_s2, 32, %s31_s27, [#allocation6]  }
  0x22   :  { %318 = dma.done.wait [#allocation4], 2048  }
  0x23   :  { %319 = vsyncadd [#allocation4], 4294965248 }
  0x24   :  { %320 = dma.done.wait [#allocation6], 32  }
  0x25   :  { %321 = vsyncadd [#allocation6], 4294967264  ;;  %v326_v0 = vmov 0   ;;  %v250_v1 = vld [vmem:[#allocation3 + $0x4] ss:$8 sps:$4 sm:$0xff]   ;;  %v198_v18 = vlaneseq }
  0x26   :  { %178 = vmatprep.mubr.bf16.mxu0 %v326_v0  ;;  %v252_v2 = vld [vmem:[#allocation3] ss:$8 sps:$4 sm:$0xff]   ;;  %146 = vmatprep.subr.bf16.mxu0 %v250_v1  ;;  %v253_v3 = vld [vmem:[#allocation3 + $0x14] ss:$8 sps:$4 sm:$0xff]   ;;  %v255_v4 = vld [vmem:[#allocation3 + $0x10] ss:$8 sps:$4 sm:$0xff]  }
  0x27   :  { %147 = vmatpush1.bf16.msra.mxu0 %v252_v2  ;;  %v256_v5 = vld [vmem:[#allocation3 + $0x24] ss:$8 sps:$4 sm:$0xff]   ;;  %v258_v6 = vld [vmem:[#allocation3 + $0x20] ss:$8 sps:$4 sm:$0xff]   ;;  %v259_v7 = vld [vmem:[#allocation3 + $0x34] ss:$8 sps:$4 sm:$0xff]  }
  0x28   :  { %148 = vmatprep.subr.bf16.mxu0 %v253_v3  ;;  %v261_v8 = vld [vmem:[#allocation3 + $0x30] ss:$8 sps:$4 sm:$0xff]   ;;  %v262_v9 = vld [vmem:[#allocation3 + $0x44] ss:$8 sps:$4 sm:$0xff]   ;;  %v264_v10 = vld [vmem:[#allocation3 + $0x40] ss:$8 sps:$4 sm:$0xff]  }
  0x29   :  { %v265_v11 = vld [vmem:[#allocation3 + $0x54] ss:$8 sps:$4 sm:$0xff]   ;;  %v267_v12 = vld [vmem:[#allocation3 + $0x50] ss:$8 sps:$4 sm:$0xff]   ;;  %v268_v13 = vld [vmem:[#allocation3 + $0x64] ss:$8 sps:$4 sm:$0xff]  }
  0x2a   :  { %v270_v14 = vld [vmem:[#allocation3 + $0x60] ss:$8 sps:$4 sm:$0xff]   ;;  %v271_v15 = vld [vmem:[#allocation3 + $0x74] ss:$8 sps:$4 sm:$0xff]   ;;  %v273_v16 = vld [vmem:[#allocation3 + $0x70] ss:$8 sps:$4 sm:$0xff]  }
  0x2b   :  { %149 = vmatpush1.bf16.msra.mxu0 %v255_v4  ;;  %v49_v17 = vld [vmem:[%s377_s0] sm:$0xf]  ;;  %v199_v19 = vshrl.u32 %v198_v18, 7 }
  0x2c   :  { %150 = vmatprep.subr.bf16.mxu0 %v256_v5  ;;  %v196_v21 = vld [vmem:[#allocation5] sm:$0x3] }
  0x2d   :  { %v200_v20 = vsub.s32 0, %v199_v19  ;;  %v204_v22 = vsub.s32 1, %v199_v19 }
  0x2f   :  { %151 = vmatpush1.bf16.msra.mxu0 %v258_v6  ;;  %v201_v23 = vrot.slane %v196_v21, %v200_v20  ;;  %v205_v24 = vrot.slane %v196_v21, %v204_v22 }
  0x30   :  { %152 = vmatprep.subr.bf16.mxu0 %v259_v7 }
  0x33   :  { %153 = vmatpush1.bf16.msra.mxu0 %v261_v8 }
  0x34   :  { %154 = vmatprep.subr.bf16.mxu0 %v262_v9 }
  0x37   :  { %155 = vmatpush1.bf16.msra.mxu0 %v264_v10 }
  0x38   :  { %156 = vmatprep.subr.bf16.mxu0 %v265_v11 }
  0x3b   :  { %157 = vmatpush1.bf16.msra.mxu0 %v267_v12 }
  0x3c   :  { %158 = vmatprep.subr.bf16.mxu0 %v268_v13 }
  0x3f   :  { %159 = vmatpush1.bf16.msra.mxu0 %v270_v14 }
  0x40   :  { %160 = vmatprep.subr.bf16.mxu0 %v271_v15 }
  0x43   :  { %161 = vmatpush1.bf16.msra.mxu0 %v273_v16 }
  0x46   :  { %179 = vmatmul.mubr.bf16.vlgmr.msra.gmra.mrb[0].mxu0 %v49_v17 }
 0x119   :  { %v180_v25 = vpop.f32.mrb[0].mxu0 }
 0x11a   :  { %v208_v26 = vadd.f32 %v201_v23, %v180_v25  ;;  %v182_v27 = vpop.f32.mrb[1].mxu0 }
 0x11b   :  { %v209_v28 = vadd.f32 %v205_v24, %v182_v27  ;;  %v184_v29 = vpop.f32.mrb[2].mxu0 }
 0x11c   :  { %v210_v30 = vmax.f32 %v208_v26, 0.0  ;;  %v185_v31 = vpop.f32.mrb[3].mxu0 }
 0x11d   :  { %v211_v32 = vmax.f32 %v209_v28, 0.0 }
 0x11f   :  { %v244_v33 = vpack.c.bf16 %v211_v32, %v210_v30 }
 0x121   :  { %220 = vst [vmem:[%s380_s3] sm:$0xff] %v244_v33 }
 0x122   :  { %225 = vsyncpa [#allocation4], 1 }
 0x123   :  { %226 = vsyncpa [#allocation6], 1 }

// kernel: deeplabv3p_forward.15
= control target key start
LH: loop header
LB: loop body
LE: loop exit
PB: predicated region body
PF: predicated region fallthrough
CT: control target
= control target key end

     0   :  { %8 = vsyncpa [#allocation4], 0  ;;  %s280_s12 = smov [#allocation3]   ;;  %s368_s0 = inlined_call_operand.vmem [shape: bf16[8,128], index: 0, kind: input, shape index: {}]   ;;  %s369_s1 = inlined_call_operand.vmem [shape: bf16[128,256], index: 1, kind: input, shape index: {}]   ;;  %s370_s2 = inlined_call_operand.hbm [shape: f32[1,256], index: 2, kind: input, shape index: {}]   ;;  %s371_s3 = inlined_call_operand.vmem [shape: bf16[8,256], index: 3, kind: output, shape index: {}]  }
   0x1   :  { %s19_s13 = sshll.u32 %s280_s12, 4  ;;  %s256_s16 = scalar_lea.hbm %s370_s2, 32  ;;  %s20_s13 = int_to_ptr.vmem [resolvable:$true] %s19_s13 }
   0x2   :  { %p257_p0 = scmp.ne.s32.totalorder %s370_s2, %s256_s16  ;;  %p260_p1 = scmp.lt.u32.totalorder %s256_s16, %s370_s2 }
   0x4   :  { %p262_p2 = pnand %p260_p1, %p257_p0 }
   0x6   :  { %265 = shalt.err (!%p262_p2)
}
   0x7   :  { %s266_s21 = scalar_lea.vmem %s20_s13, 32  ;;  %p271_p4 = scmp.lt.s32.totalorder %s20_s13, %s20_s13 }
   0x8   :  { %p267_p3 = scmp.ne.s32.totalorder %s20_s13, %s266_s21  ;;  %p272_p5 = scmp.lt.s32.totalorder %s266_s21, %s266_s21 }
   0xa   :  { %p273_p6 = por %p272_p5, %p271_p4 }
   0xc   :  { %p274_p7 = pnand %p273_p6, %p267_p3 }
   0xe   :  { %277 = shalt.err (!%p274_p7)
}
   0xf   :  { %22 = dma.hbm_to_vmem [thread:$0]  %s370_s2, 32, %s20_s13, [#allocation4]  }
  0x10   :  { %278 = dma.done.wait [#allocation4], 32  }
  0x11   :  { %279 = vsyncadd [#allocation4], 4294967264  ;;  %v281_v0 = vmov 0   ;;  %v232_v1 = vld [vmem:[%s369_s1 + $0x4] ss:$8 sps:$4 sm:$0xff]   ;;  %v184_v18 = vlaneseq }
  0x12   :  { %164 = vmatprep.mubr.bf16.mxu0 %v281_v0  ;;  %v234_v2 = vld [vmem:[%s369_s1] ss:$8 sps:$4 sm:$0xff]   ;;  %132 = vmatprep.subr.bf16.mxu0 %v232_v1  ;;  %v235_v3 = vld [vmem:[%s369_s1 + $0x14] ss:$8 sps:$4 sm:$0xff]   ;;  %v237_v4 = vld [vmem:[%s369_s1 + $0x10] ss:$8 sps:$4 sm:$0xff]  }
  0x13   :  { %133 = vmatpush1.bf16.msra.mxu0 %v234_v2  ;;  %v238_v5 = vld [vmem:[%s369_s1 + $0x24] ss:$8 sps:$4 sm:$0xff]   ;;  %v240_v6 = vld [vmem:[%s369_s1 + $0x20] ss:$8 sps:$4 sm:$0xff]   ;;  %v241_v7 = vld [vmem:[%s369_s1 + $0x34] ss:$8 sps:$4 sm:$0xff]  }
  0x14   :  { %134 = vmatprep.subr.bf16.mxu0 %v235_v3  ;;  %v243_v8 = vld [vmem:[%s369_s1 + $0x30] ss:$8 sps:$4 sm:$0xff]   ;;  %v244_v9 = vld [vmem:[%s369_s1 + $0x44] ss:$8 sps:$4 sm:$0xff]   ;;  %v246_v10 = vld [vmem:[%s369_s1 + $0x40] ss:$8 sps:$4 sm:$0xff]  }
  0x15   :  { %v247_v11 = vld [vmem:[%s369_s1 + $0x54] ss:$8 sps:$4 sm:$0xff]   ;;  %v249_v12 = vld [vmem:[%s369_s1 + $0x50] ss:$8 sps:$4 sm:$0xff]   ;;  %v250_v13 = vld [vmem:[%s369_s1 + $0x64] ss:$8 sps:$4 sm:$0xff]  }
  0x16   :  { %v252_v14 = vld [vmem:[%s369_s1 + $0x60] ss:$8 sps:$4 sm:$0xff]   ;;  %v253_v15 = vld [vmem:[%s369_s1 + $0x74] ss:$8 sps:$4 sm:$0xff]   ;;  %v255_v16 = vld [vmem:[%s369_s1 + $0x70] ss:$8 sps:$4 sm:$0xff]  }
  0x17   :  { %135 = vmatpush1.bf16.msra.mxu0 %v237_v4  ;;  %v35_v17 = vld [vmem:[%s368_s0] sm:$0xf]  ;;  %v185_v19 = vshrl.u32 %v184_v18, 7 }
  0x18   :  { %136 = vmatprep.subr.bf16.mxu0 %v238_v5  ;;  %v182_v21 = vld [vmem:[#allocation3] sm:$0x3] }
  0x19   :  { %v186_v20 = vsub.s32 0, %v185_v19  ;;  %v190_v22 = vsub.s32 1, %v185_v19 }
  0x1b   :  { %137 = vmatpush1.bf16.msra.mxu0 %v240_v6  ;;  %v187_v23 = vrot.slane %v182_v21, %v186_v20  ;;  %v191_v24 = vrot.slane %v182_v21, %v190_v22 }
  0x1c   :  { %138 = vmatprep.subr.bf16.mxu0 %v241_v7 }
  0x1f   :  { %139 = vmatpush1.bf16.msra.mxu0 %v243_v8 }
  0x20   :  { %140 = vmatprep.subr.bf16.mxu0 %v244_v9 }
  0x23   :  { %141 = vmatpush1.bf16.msra.mxu0 %v246_v10 }
  0x24   :  { %142 = vmatprep.subr.bf16.mxu0 %v247_v11 }
  0x27   :  { %143 = vmatpush1.bf16.msra.mxu0 %v249_v12 }
  0x28   :  { %144 = vmatprep.subr.bf16.mxu0 %v250_v13 }
  0x2b   :  { %145 = vmatpush1.bf16.msra.mxu0 %v252_v14 }
  0x2c   :  { %146 = vmatprep.subr.bf16.mxu0 %v253_v15 }
  0x2f   :  { %147 = vmatpush1.bf16.msra.mxu0 %v255_v16 }
  0x32   :  { %165 = vmatmul.mubr.bf16.vlgmr.msra.gmra.mrb[0].mxu0 %v35_v17 }
 0x105   :  { %v166_v25 = vpop.f32.mrb[0].mxu0 }
 0x106   :  { %v194_v26 = vadd.f32 %v187_v23, %v166_v25  ;;  %v168_v27 = vpop.f32.mrb[1].mxu0 }
 0x107   :  { %v195_v28 = vadd.f32 %v191_v24, %v168_v27  ;;  %v170_v29 = vpop.f32.mrb[2].mxu0 }
 0x108   :  { %v196_v30 = vmax.f32 %v194_v26, 0.0  ;;  %v171_v31 = vpop.f32.mrb[3].mxu0 }
 0x109   :  { %v197_v32 = vmax.f32 %v195_v28, 0.0 }
 0x10b   :  { %v229_v33 = vpack.c.bf16 %v197_v32, %v196_v30 }
 0x10d   :  { %206 = vst [vmem:[%s371_s3] sm:$0xff] %v229_v33 }
 0x10e   :  { %211 = vsyncpa [#allocation4], 1 }

// kernel: deeplabv3p_forward.12
= control target key start
LH: loop header
LB: loop body
LE: loop exit
PB: predicated region body
PF: predicated region fallthrough
CT: control target
= control target key end

     0   :  { %8 = vsyncpa [#allocation4], 0  ;;  %s141_s12 = smov [#allocation3]   ;;  %s185_s0 = inlined_call_operand.vmem [shape: bf16[8,8], index: 0, kind: input, shape index: {}]   ;;  %s186_s1 = inlined_call_operand.vmem [shape: bf16[8,128], index: 1, kind: input, shape index: {}]   ;;  %s187_s2 = inlined_call_operand.hbm [shape: f32[1,128], index: 2, kind: input, shape index: {}]   ;;  %s188_s3 = inlined_call_operand.vmem [shape: bf16[8,128], index: 3, kind: output, shape index: {}]  }
   0x1   :  { %s19_s13 = sshll.u32 %s141_s12, 4  ;;  %s117_s16 = scalar_lea.hbm %s187_s2, 16  ;;  %s20_s13 = int_to_ptr.vmem [resolvable:$true] %s19_s13 }
   0x2   :  { %p118_p0 = scmp.ne.s32.totalorder %s187_s2, %s117_s16  ;;  %p121_p1 = scmp.lt.u32.totalorder %s117_s16, %s187_s2 }
   0x4   :  { %p123_p2 = pnand %p121_p1, %p118_p0 }
   0x6   :  { %126 = shalt.err (!%p123_p2)
}
   0x7   :  { %s127_s21 = scalar_lea.vmem %s20_s13, 16  ;;  %s131_s22 = scalar_lea.vmem %s20_s13, 32 }
   0x8   :  { %p128_p3 = scmp.ne.s32.totalorder %s20_s13, %s127_s21  ;;  %p132_p4 = scmp.lt.s32.totalorder %s20_s13, %s20_s13 }
   0x9   :  { %p133_p5 = scmp.lt.s32.totalorder %s131_s22, %s127_s21 }
   0xb   :  { %p134_p6 = por %p133_p5, %p132_p4 }
   0xd   :  { %p135_p7 = pnand %p134_p6, %p128_p3 }
   0xf   :  { %138 = shalt.err (!%p135_p7)
}
  0x10   :  { %22 = dma.hbm_to_vmem [thread:$0]  %s187_s2, 16, %s20_s13, [#allocation4]  }
  0x11   :  { %139 = dma.done.wait [#allocation4], 16  }
  0x12   :  { %140 = vsyncadd [#allocation4], 4294967280  ;;  %v142_v0 = vmov 0.0   ;;  %vm143_vm0 = vmmov 0   ;;  %vm39_vm1 = vcmask 1043456   ;;  %vm35_vm2 = vcmask 64512  }
  0x13   :  { %108 = vmatprep.subr.bf16.mxu0 %v142_v0  ;;  %110 = vmatprep.mubr.msk.bf16.mxu0 %vm143_vm0, %v142_v0  ;;  %v34_v1 = vld [vmem:[%s186_s1] sm:$0xf] }
  0x14   :  { %v41_v2 = vsel %vm39_vm1, %v34_v1, 0  ;;  %v33_v3 = vld [vmem:[%s185_s0] sm:$0xf] }
  0x15   :  { %109 = vmatpush3.bf16.msra.mxu0 %v41_v2  ;;  %v105_v4 = vld [vmem:[#allocation3] ss:$0 sm:$0xff] }
  0x18   :  { %111 = vmatmul.mubr.msk.bf16.vlgmr.msra.gmra.mrb[0].mxu0 %vm35_vm2, %v33_v3 }
  0xeb   :  { %v77_v5 = vpop.f32.mrb[0].mxu0 }
  0xec   :  { %v96_v6 = vadd.f32 %v105_v4, %v77_v5  ;;  %v112_v7 = vpop.f32.mrb[1].mxu0 }
  0xed   :  { %v80_v8 = vpop.f32.mrb[2].mxu0 }
  0xee   :  { %v97_v9 = vpack.c.bf16 %v96_v6, %v96_v6  ;;  %v113_v10 = vpop.f32.mrb[3].mxu0 }
  0xf0   :  { %98 = vst [vmem:[%s188_s3] sm:$0xf] %v97_v9 }
  0xf1   :  { %103 = vsyncpa [#allocation4], 1 }

// kernel: deeplabv3p_forward.19
= control target key start
LH: loop header
LB: loop body
LE: loop exit
PB: predicated region body
PF: predicated region fallthrough
CT: control target
= control target key end

     0   :  { %8 = vsyncpa [#allocation4], 0  ;;  %s1725_s12 = smov [#allocation3]   ;;  %s2274_s0 = inlined_call_operand.vmem [shape: bf16[8,1280], index: 0, kind: input, shape index: {}]   ;;  %s2275_s1 = inlined_call_operand.vmem [shape: bf16[1280,256], index: 1, kind: input, shape index: {}]   ;;  %s2276_s2 = inlined_call_operand.hbm [shape: f32[1,256], index: 2, kind: input, shape index: {}]   ;;  %s2277_s3 = inlined_call_operand.vmem [shape: bf16[8,256], index: 3, kind: output, shape index: {}]  }
   0x1   :  { %s19_s13 = sshll.u32 %s1725_s12, 4  ;;  %s1701_s16 = scalar_lea.hbm %s2276_s2, 32  ;;  %s20_s13 = int_to_ptr.vmem [resolvable:$true] %s19_s13 }
   0x2   :  { %p1702_p0 = scmp.ne.s32.totalorder %s2276_s2, %s1701_s16  ;;  %p1705_p1 = scmp.lt.u32.totalorder %s1701_s16, %s2276_s2 }
   0x4   :  { %p1707_p2 = pnand %p1705_p1, %p1702_p0 }
   0x6   :  { %1710 = shalt.err (!%p1707_p2)
}
   0x7   :  { %s1711_s21 = scalar_lea.vmem %s20_s13, 32  ;;  %p1716_p4 = scmp.lt.s32.totalorder %s20_s13, %s20_s13 }
   0x8   :  { %p1712_p3 = scmp.ne.s32.totalorder %s20_s13, %s1711_s21  ;;  %p1717_p5 = scmp.lt.s32.totalorder %s1711_s21, %s1711_s21 }
   0xa   :  { %p1718_p6 = por %p1717_p5, %p1716_p4 }
   0xc   :  { %p1719_p7 = pnand %p1718_p6, %p1712_p3 }
   0xe   :  { %1722 = shalt.err (!%p1719_p7)
}
   0xf   :  { %22 = dma.hbm_to_vmem [thread:$0]  %s2276_s2, 32, %s20_s13, [#allocation4]  }
  0x10   :  { %1723 = dma.done.wait [#allocation4], 32  }
  0x11   :  { %1724 = vsyncadd [#allocation4], 4294967264  ;;  %v1451_v0 = vld [vmem:[%s2275_s1 + $0x4] ss:$8 sps:$4 sm:$0xff]   ;;  %v1455_v2 = vld [vmem:[%s2275_s1] ss:$8 sps:$4 sm:$0xff]  }
  0x12   :  { %v1453_v1 = vld [vmem:[%s2275_s1 + $0x104] ss:$8 sps:$4 sm:$0xff]   ;;  %1034 = vmatprep.subr.bf16.mxu0 %v1451_v0  ;;  %v1456_v3 = vld [vmem:[%s2275_s1 + $0x100] ss:$8 sps:$4 sm:$0xff]   ;;  %v1457_v4 = vld [vmem:[%s2275_s1 + $0x14] ss:$8 sps:$4 sm:$0xff]  }
  0x13   :  { %1075 = vmatprep.subr.bf16.mxu1 %v1453_v1  ;;  %1035 = vmatpush1.bf16.msra.mxu0 %v1455_v2  ;;  %v1459_v5 = vld [vmem:[%s2275_s1 + $0x114] ss:$8 sps:$4 sm:$0xff]   ;;  %v1461_v6 = vld [vmem:[%s2275_s1 + $0x10] ss:$8 sps:$4 sm:$0xff]   ;;  %v1463_v8 = vld [vmem:[%s2275_s1 + $0x24] ss:$8 sps:$4 sm:$0xff]  }
  0x14   :  { %1076 = vmatpush1.bf16.msra.mxu1 %v1456_v3  ;;  %1036 = vmatprep.subr.bf16.mxu0 %v1457_v4  ;;  %v1462_v7 = vld [vmem:[%s2275_s1 + $0x110] ss:$8 sps:$4 sm:$0xff]   ;;  %v1465_v9 = vld [vmem:[%s2275_s1 + $0x124] ss:$8 sps:$4 sm:$0xff]   ;;  %v1467_v10 = vld [vmem:[%s2275_s1 + $0x20] ss:$8 sps:$4 sm:$0xff]  }
  0x15   :  { %1077 = vmatprep.subr.bf16.mxu1 %v1459_v5  ;;  %v1468_v11 = vld [vmem:[%s2275_s1 + $0x120] ss:$8 sps:$4 sm:$0xff]   ;;  %v1469_v12 = vld [vmem:[%s2275_s1 + $0x34] ss:$8 sps:$4 sm:$0xff]   ;;  %v1473_v14 = vld [vmem:[%s2275_s1 + $0x30] ss:$8 sps:$4 sm:$0xff]  }
  0x16   :  { %v1471_v13 = vld [vmem:[%s2275_s1 + $0x134] ss:$8 sps:$4 sm:$0xff]   ;;  %v1474_v15 = vld [vmem:[%s2275_s1 + $0x130] ss:$8 sps:$4 sm:$0xff]   ;;  %v1475_v16 = vld [vmem:[%s2275_s1 + $0x44] ss:$8 sps:$4 sm:$0xff]  }
  0x17   :  { %1037 = vmatpush1.bf16.msra.mxu0 %v1461_v6  ;;  %v1477_v17 = vld [vmem:[%s2275_s1 + $0x144] ss:$8 sps:$4 sm:$0xff]   ;;  %v1479_v18 = vld [vmem:[%s2275_s1 + $0x40] ss:$8 sps:$4 sm:$0xff]   ;;  %v1481_v20 = vld [vmem:[%s2275_s1 + $0x54] ss:$8 sps:$4 sm:$0xff]  }
  0x18   :  { %1078 = vmatpush1.bf16.msra.mxu1 %v1462_v7  ;;  %1038 = vmatprep.subr.bf16.mxu0 %v1463_v8  ;;  %v1480_v19 = vld [vmem:[%s2275_s1 + $0x140] ss:$8 sps:$4 sm:$0xff]   ;;  %v1483_v21 = vld [vmem:[%s2275_s1 + $0x154] ss:$8 sps:$4 sm:$0xff]   ;;  %v1485_v22 = vld [vmem:[%s2275_s1 + $0x50] ss:$8 sps:$4 sm:$0xff]  }
  0x19   :  { %1079 = vmatprep.subr.bf16.mxu1 %v1465_v9  ;;  %v1486_v23 = vld [vmem:[%s2275_s1 + $0x150] ss:$8 sps:$4 sm:$0xff]   ;;  %v1487_v24 = vld [vmem:[%s2275_s1 + $0x64] ss:$8 sps:$4 sm:$0xff]   ;;  %v1491_v26 = vld [vmem:[%s2275_s1 + $0x60] ss:$8 sps:$4 sm:$0xff]  }
  0x1a   :  { %v1489_v25 = vld [vmem:[%s2275_s1 + $0x164] ss:$8 sps:$4 sm:$0xff]   ;;  %v1492_v27 = vld [vmem:[%s2275_s1 + $0x160] ss:$8 sps:$4 sm:$0xff]   ;;  %v1493_v28 = vld [vmem:[%s2275_s1 + $0x74] ss:$8 sps:$4 sm:$0xff]  }
  0x1b   :  { %1039 = vmatpush1.bf16.msra.mxu0 %v1467_v10  ;;  %v1495_v29 = vld [vmem:[%s2275_s1 + $0x174] ss:$8 sps:$4 sm:$0xff]   ;;  %v1497_v30 = vld [vmem:[%s2275_s1 + $0x70] ss:$8 sps:$4 sm:$0xff]   ;;  %v1499_v32 = vld [vmem:[%s2275_s1 + $0x84] ss:$8 sps:$4 sm:$0xff]  }
  0x1c   :  { %1080 = vmatpush1.bf16.msra.mxu1 %v1468_v11  ;;  %1040 = vmatprep.subr.bf16.mxu0 %v1469_v12  ;;  %v1498_v31 = vld [vmem:[%s2275_s1 + $0x170] ss:$8 sps:$4 sm:$0xff]   ;;  %v1501_v33 = vld [vmem:[%s2275_s1 + $0x184] ss:$8 sps:$4 sm:$0xff]   ;;  %v1503_v34 = vld [vmem:[%s2275_s1 + $0x80] ss:$8 sps:$4 sm:$0xff]  }
  0x1d   :  { %1081 = vmatprep.subr.bf16.mxu1 %v1471_v13  ;;  %v1504_v35 = vld [vmem:[%s2275_s1 + $0x180] ss:$8 sps:$4 sm:$0xff]   ;;  %v1505_v36 = vld [vmem:[%s2275_s1 + $0x94] ss:$8 sps:$4 sm:$0xff]   ;;  %v1509_v38 = vld [vmem:[%s2275_s1 + $0x90] ss:$8 sps:$4 sm:$0xff]  }
  0x1e   :  { %v1507_v37 = vld [vmem:[%s2275_s1 + $0x194] ss:$8 sps:$4 sm:$0xff]   ;;  %v1510_v39 = vld [vmem:[%s2275_s1 + $0x190] ss:$8 sps:$4 sm:$0xff]   ;;  %v1511_v40 = vld [vmem:[%s2275_s1 + $0xa4] ss:$8 sps:$4 sm:$0xff]  }
  0x1f   :  { %1041 = vmatpush1.bf16.msra.mxu0 %v1473_v14  ;;  %v1513_v41 = vld [vmem:[%s2275_s1 + $0x1a4] ss:$8 sps:$4 sm:$0xff]   ;;  %v1515_v42 = vld [vmem:[%s2275_s1 + $0xa0] ss:$8 sps:$4 sm:$0xff]   ;;  %v1517_v44 = vld [vmem:[%s2275_s1 + $0xb4] ss:$8 sps:$4 sm:$0xff]  }
  0x20   :  { %1082 = vmatpush1.bf16.msra.mxu1 %v1474_v15  ;;  %1042 = vmatprep.subr.bf16.mxu0 %v1475_v16  ;;  %v1516_v43 = vld [vmem:[%s2275_s1 + $0x1a0] ss:$8 sps:$4 sm:$0xff]   ;;  %v1519_v45 = vld [vmem:[%s2275_s1 + $0x1b4] ss:$8 sps:$4 sm:$0xff]   ;;  %v1521_v49 = vld [vmem:[%s2275_s1 + $0xb0] ss:$8 sps:$4 sm:$0xff]  }
  0x21   :  { %1083 = vmatprep.subr.bf16.mxu1 %v1477_v17  ;;  %v34_v46 = vld [vmem:[%s2274_s0] sm:$0xff]  ;;  %v35_v48 = vld [vmem:[%s2274_s0 + $0x8] sm:$0xff]  ;;  %v1522_v50 = vld [vmem:[%s2275_s1 + $0x1b0] ss:$8 sps:$4 sm:$0xff]  }
  0x22   :  { %v1279_v47 = vcombine.high %v34_v46, %v34_v46  ;;  %v1281_v51 = vcombine.high %v35_v48, %v35_v48  ;;  %v1523_v52 = vld [vmem:[%s2275_s1 + $0xc4] ss:$8 sps:$4 sm:$0xff]   ;;  %v1527_v54 = vld [vmem:[%s2275_s1 + $0xc0] ss:$8 sps:$4 sm:$0xff]   ;;  %v1529_v56 = vld [vmem:[%s2275_s1 + $0xd4] ss:$8 sps:$4 sm:$0xff]   ;;  %v1278_v6 = vcombine.low %v34_v46, %v34_v46  ;;  %v1280_v7 = vcombine.low %v35_v48, %v35_v48 }
  0x23   :  { %1043 = vmatpush1.bf16.msra.mxu0 %v1479_v18  ;;  %v1525_v53 = vld [vmem:[%s2275_s1 + $0x1c4] ss:$8 sps:$4 sm:$0xff]   ;;  %v1528_v55 = vld [vmem:[%s2275_s1 + $0x1c0] ss:$8 sps:$4 sm:$0xff]   ;;  %v1531_v57 = vld [vmem:[%s2275_s1 + $0x1d4] ss:$8 sps:$4 sm:$0xff]  }
  0x24   :  { %1084 = vmatpush1.bf16.msra.mxu1 %v1480_v19  ;;  %1044 = vmatprep.subr.bf16.mxu0 %v1481_v20  ;;  %v1533_v58 = vld [vmem:[%s2275_s1 + $0xd0] ss:$8 sps:$4 sm:$0xff]   ;;  %v1535_v60 = vld [vmem:[%s2275_s1 + $0xe4] ss:$8 sps:$4 sm:$0xff]   ;;  %v1539_v62 = vld [vmem:[%s2275_s1 + $0xe0] ss:$8 sps:$4 sm:$0xff]  }
  0x25   :  { %1085 = vmatprep.subr.bf16.mxu1 %v1483_v21  ;;  %1066 = vmatprep.mubr.bf16.mxu0 %v1279_v47  ;;  %v1534_v59 = vld [vmem:[%s2275_s1 + $0x1d0] ss:$8 sps:$4 sm:$0xff]   ;;  %v1537_v61 = vld [vmem:[%s2275_s1 + $0x1e4] ss:$8 sps:$4 sm:$0xff]   ;;  %v1540_v63 = vld [vmem:[%s2275_s1 + $0x1e0] ss:$8 sps:$4 sm:$0xff]  }
  0x26   :  { %1107 = vmatprep.mubr.bf16.mxu1 %v1281_v51  ;;  %v1541_v0 = vld [vmem:[%s2275_s1 + $0xf4] ss:$8 sps:$4 sm:$0xff]   ;;  %v1545_v2 = vld [vmem:[%s2275_s1 + $0xf0] ss:$8 sps:$4 sm:$0xff]   ;;  %v1553_v4 = vld [vmem:[%s2275_s1 + $0x204] ss:$8 sps:$4 sm:$0xff]  }
  0x27   :  { %1045 = vmatpush1.bf16.msra.mxu0 %v1485_v22  ;;  %v1543_v1 = vld [vmem:[%s2275_s1 + $0x1f4] ss:$8 sps:$4 sm:$0xff]   ;;  %v1546_v3 = vld [vmem:[%s2275_s1 + $0x1f0] ss:$8 sps:$4 sm:$0xff]   ;;  %v1556_v5 = vld [vmem:[%s2275_s1 + $0x304] ss:$8 sps:$4 sm:$0xff]  }
  0x28   :  { %1086 = vmatpush1.bf16.msra.mxu1 %v1486_v23  ;;  %1046 = vmatprep.subr.bf16.mxu0 %v1487_v24  ;;  %v1551_v8 = vld [vmem:[%s2275_s1 + $0x200] ss:$8 sps:$4 sm:$0xff]   ;;  %v1559_v10 = vld [vmem:[%s2275_s1 + $0x214] ss:$8 sps:$4 sm:$0xff]   ;;  %v1557_v12 = vld [vmem:[%s2275_s1 + $0x210] ss:$8 sps:$4 sm:$0xff]  }
  0x29   :  { %1087 = vmatprep.subr.bf16.mxu1 %v1489_v25  ;;  %v1554_v9 = vld [vmem:[%s2275_s1 + $0x300] ss:$8 sps:$4 sm:$0xff]   ;;  %v1562_v11 = vld [vmem:[%s2275_s1 + $0x314] ss:$8 sps:$4 sm:$0xff]   ;;  %v1560_v13 = vld [vmem:[%s2275_s1 + $0x310] ss:$8 sps:$4 sm:$0xff]  }
  0x2a   :  { %v1565_v14 = vld [vmem:[%s2275_s1 + $0x224] ss:$8 sps:$4 sm:$0xff]   ;;  %v1563_v16 = vld [vmem:[%s2275_s1 + $0x220] ss:$8 sps:$4 sm:$0xff]   ;;  %v1571_v18 = vld [vmem:[%s2275_s1 + $0x234] ss:$8 sps:$4 sm:$0xff]  }
  0x2b   :  { %1047 = vmatpush1.bf16.msra.mxu0 %v1491_v26  ;;  %v1568_v15 = vld [vmem:[%s2275_s1 + $0x324] ss:$8 sps:$4 sm:$0xff]   ;;  %v1566_v17 = vld [vmem:[%s2275_s1 + $0x320] ss:$8 sps:$4 sm:$0xff]   ;;  %v1574_v19 = vld [vmem:[%s2275_s1 + $0x334] ss:$8 sps:$4 sm:$0xff]  }
  0x2c   :  { %1088 = vmatpush1.bf16.msra.mxu1 %v1492_v27  ;;  %1048 = vmatprep.subr.bf16.mxu0 %v1493_v28  ;;  %v1569_v20 = vld [vmem:[%s2275_s1 + $0x230] ss:$8 sps:$4 sm:$0xff]   ;;  %v1577_v22 = vld [vmem:[%s2275_s1 + $0x244] ss:$8 sps:$4 sm:$0xff]   ;;  %v1575_v24 = vld [vmem:[%s2275_s1 + $0x240] ss:$8 sps:$4 sm:$0xff]  }
  0x2d   :  { %1089 = vmatprep.subr.bf16.mxu1 %v1495_v29  ;;  %v1572_v21 = vld [vmem:[%s2275_s1 + $0x330] ss:$8 sps:$4 sm:$0xff]   ;;  %v1580_v23 = vld [vmem:[%s2275_s1 + $0x344] ss:$8 sps:$4 sm:$0xff]   ;;  %v1578_v25 = vld [vmem:[%s2275_s1 + $0x340] ss:$8 sps:$4 sm:$0xff]  }
  0x2e   :  { %v1583_v26 = vld [vmem:[%s2275_s1 + $0x254] ss:$8 sps:$4 sm:$0xff]   ;;  %v1581_v28 = vld [vmem:[%s2275_s1 + $0x250] ss:$8 sps:$4 sm:$0xff]   ;;  %v1616_v51 = vld [vmem:[%s2275_s1 + $0x3a4] ss:$8 sps:$4 sm:$0xff]  }
  0x2f   :  { %1049 = vmatpush1.bf16.msra.mxu0 %v1497_v30  ;;  %v1586_v27 = vld [vmem:[%s2275_s1 + $0x354] ss:$8 sps:$4 sm:$0xff]   ;;  %v1584_v29 = vld [vmem:[%s2275_s1 + $0x350] ss:$8 sps:$4 sm:$0xff]   ;;  %v1589_v30 = vld [vmem:[%s2275_s1 + $0x264] ss:$8 sps:$4 sm:$0xff]  }
  0x30   :  { %1090 = vmatpush1.bf16.msra.mxu1 %v1498_v31  ;;  %1050 = vmatprep.subr.bf16.mxu0 %v1499_v32  ;;  %v1592_v31 = vld [vmem:[%s2275_s1 + $0x364] ss:$8 sps:$4 sm:$0xff]   ;;  %v2037_v32 = vld [vmem:[%s2274_s0 + $0x10] sm:$0xff] }
  0x31   :  { %1091 = vmatprep.subr.bf16.mxu1 %v1501_v33  ;;  %v1587_v33 = vld [vmem:[%s2275_s1 + $0x260] ss:$8 sps:$4 sm:$0xff]   ;;  %v1607_v46 = vld [vmem:[%s2275_s1 + $0x294] ss:$8 sps:$4 sm:$0xff]   ;;  %v1605_v48 = vld [vmem:[%s2275_s1 + $0x290] ss:$8 sps:$4 sm:$0xff]  }
  0x32   :  { %v1610_v47 = vld [vmem:[%s2275_s1 + $0x394] ss:$8 sps:$4 sm:$0xff]  }
  0x33   :  { %1051 = vmatpush1.bf16.msra.mxu0 %v1503_v34  ;;  %v1590_v34 = vld [vmem:[%s2275_s1 + $0x360] ss:$8 sps:$4 sm:$0xff]  }
  0x34   :  { %1092 = vmatpush1.bf16.msra.mxu1 %v1504_v35  ;;  %1052 = vmatprep.subr.bf16.mxu0 %v1505_v36  ;;  %v1283_v35 = vcombine.high %v2037_v32, %v2037_v32  ;;  %v2050_v36 = vld [vmem:[%s2274_s0 + $0x18] sm:$0xff] }
  0x35   :  { %1093 = vmatprep.subr.bf16.mxu1 %v1507_v37  ;;  %v1595_v37 = vld [vmem:[%s2275_s1 + $0x274] ss:$8 sps:$4 sm:$0xff]  }
  0x37   :  { %1053 = vmatpush1.bf16.msra.mxu0 %v1509_v38  ;;  %v1285_v38 = vcombine.high %v2050_v36, %v2050_v36 }
  0x38   :  { %1094 = vmatpush1.bf16.msra.mxu1 %v1510_v39  ;;  %1054 = vmatprep.subr.bf16.mxu0 %v1511_v40  ;;  %v1598_v39 = vld [vmem:[%s2275_s1 + $0x374] ss:$8 sps:$4 sm:$0xff]   ;;  %v1593_v40 = vld [vmem:[%s2275_s1 + $0x270] ss:$8 sps:$4 sm:$0xff]  }
  0x39   :  { %1095 = vmatprep.subr.bf16.mxu1 %v1513_v41  ;;  %v1596_v41 = vld [vmem:[%s2275_s1 + $0x370] ss:$8 sps:$4 sm:$0xff]  }
  0x3b   :  { %1055 = vmatpush1.bf16.msra.mxu0 %v1515_v42  ;;  %v1601_v42 = vld [vmem:[%s2275_s1 + $0x284] ss:$8 sps:$4 sm:$0xff]  }
  0x3c   :  { %1096 = vmatpush1.bf16.msra.mxu1 %v1516_v43  ;;  %1056 = vmatprep.subr.bf16.mxu0 %v1517_v44  ;;  %v1604_v43 = vld [vmem:[%s2275_s1 + $0x384] ss:$8 sps:$4 sm:$0xff]   ;;  %v1599_v44 = vld [vmem:[%s2275_s1 + $0x280] ss:$8 sps:$4 sm:$0xff]  }
  0x3d   :  { %1097 = vmatprep.subr.bf16.mxu1 %v1519_v45  ;;  %v1602_v45 = vld [vmem:[%s2275_s1 + $0x380] ss:$8 sps:$4 sm:$0xff]  }
  0x3f   :  { %1057 = vmatpush1.bf16.msra.mxu0 %v1521_v49  ;;  %v1608_v49 = vld [vmem:[%s2275_s1 + $0x390] ss:$8 sps:$4 sm:$0xff]  }
  0x40   :  { %1098 = vmatpush1.bf16.msra.mxu1 %v1522_v50  ;;  %1058 = vmatprep.subr.bf16.mxu0 %v1523_v52  ;;  %v1613_v50 = vld [vmem:[%s2275_s1 + $0x2a4] ss:$8 sps:$4 sm:$0xff]   ;;  %v1611_v52 = vld [vmem:[%s2275_s1 + $0x2a0] ss:$8 sps:$4 sm:$0xff]  }
  0x41   :  { %1099 = vmatprep.subr.bf16.mxu1 %v1525_v53  ;;  %v1614_v53 = vld [vmem:[%s2275_s1 + $0x3a0] ss:$8 sps:$4 sm:$0xff]  }
  0x43   :  { %1059 = vmatpush1.bf16.msra.mxu0 %v1527_v54  ;;  %v1619_v54 = vld [vmem:[%s2275_s1 + $0x2b4] ss:$8 sps:$4 sm:$0xff]  }
  0x44   :  { %1100 = vmatpush1.bf16.msra.mxu1 %v1528_v55  ;;  %1060 = vmatprep.subr.bf16.mxu0 %v1529_v56  ;;  %v1622_v55 = vld [vmem:[%s2275_s1 + $0x3b4] ss:$8 sps:$4 sm:$0xff]   ;;  %v1617_v56 = vld [vmem:[%s2275_s1 + $0x2b0] ss:$8 sps:$4 sm:$0xff]  }
  0x45   :  { %1101 = vmatprep.subr.bf16.mxu1 %v1531_v57  ;;  %v1620_v57 = vld [vmem:[%s2275_s1 + $0x3b0] ss:$8 sps:$4 sm:$0xff]  }
  0x47   :  { %1061 = vmatpush1.bf16.msra.mxu0 %v1533_v58  ;;  %v1625_v58 = vld [vmem:[%s2275_s1 + $0x2c4] ss:$8 sps:$4 sm:$0xff]  }
  0x48   :  { %1102 = vmatpush1.bf16.msra.mxu1 %v1534_v59  ;;  %1062 = vmatprep.subr.bf16.mxu0 %v1535_v60  ;;  %v1628_v59 = vld [vmem:[%s2275_s1 + $0x3c4] ss:$8 sps:$4 sm:$0xff]   ;;  %v1623_v60 = vld [vmem:[%s2275_s1 + $0x2c0] ss:$8 sps:$4 sm:$0xff]  }
  0x49   :  { %1103 = vmatprep.subr.bf16.mxu1 %v1537_v61  ;;  %v1626_v61 = vld [vmem:[%s2275_s1 + $0x3c0] ss:$8 sps:$4 sm:$0xff]  }
  0x4b   :  { %1063 = vmatpush1.bf16.msra.mxu0 %v1539_v62  ;;  %v1631_v62 = vld [vmem:[%s2275_s1 + $0x2d4] ss:$8 sps:$4 sm:$0xff]  }
  0x4c   :  { %1104 = vmatpush1.bf16.msra.mxu1 %v1540_v63  ;;  %1064 = vmatprep.subr.bf16.mxu0 %v1541_v0  ;;  %v1634_v63 = vld [vmem:[%s2275_s1 + $0x3d4] ss:$8 sps:$4 sm:$0xff]   ;;  %v1629_v0 = vld [vmem:[%s2275_s1 + $0x2d0] ss:$8 sps:$4 sm:$0xff]  }
  0x4d   :  { %1105 = vmatprep.subr.bf16.mxu1 %v1543_v1  ;;  %v1632_v1 = vld [vmem:[%s2275_s1 + $0x3d0] ss:$8 sps:$4 sm:$0xff]  }
  0x4f   :  { %1065 = vmatpush1.bf16.msra.mxu0 %v1545_v2  ;;  %v1637_v2 = vld [vmem:[%s2275_s1 + $0x2e4] ss:$8 sps:$4 sm:$0xff]  }
  0x50   :  { %1106 = vmatpush1.bf16.msra.mxu1 %v1546_v3  ;;  %1116 = vmatprep.subr.bf16.mxu0 %v1553_v4  ;;  %v1640_v3 = vld [vmem:[%s2275_s1 + $0x3e4] ss:$8 sps:$4 sm:$0xff]   ;;  %v1635_v4 = vld [vmem:[%s2275_s1 + $0x2e0] ss:$8 sps:$4 sm:$0xff]  }
  0x51   :  { %1157 = vmatprep.subr.bf16.mxu1 %v1556_v5  ;;  %v1638_v5 = vld [vmem:[%s2275_s1 + $0x3e0] ss:$8 sps:$4 sm:$0xff]  }
  0x52   :  { %1067 = vmatmul.mubr.bf16.vlgmr.msra.gmra.mrb[0].mxu0 %v1278_v6  ;;  %v1643_v6 = vld [vmem:[%s2275_s1 + $0x2f4] ss:$8 sps:$4 sm:$0xff]  }
  0x53   :  { %1108 = vmatmul.mubr.bf16.vlgmr.msra.gmra.mrb[0].mxu1 %v1280_v7  ;;  %1117 = vmatpush1.bf16.msra.mxu0 %v1551_v8  ;;  %v1646_v7 = vld [vmem:[%s2275_s1 + $0x3f4] ss:$8 sps:$4 sm:$0xff]   ;;  %v1641_v8 = vld [vmem:[%s2275_s1 + $0x2f0] ss:$8 sps:$4 sm:$0xff]  }
  0x54   :  { %1158 = vmatpush1.bf16.msra.mxu1 %v1554_v9  ;;  %1118 = vmatprep.subr.bf16.mxu0 %v1559_v10  ;;  %v1644_v9 = vld [vmem:[%s2275_s1 + $0x3f0] ss:$8 sps:$4 sm:$0xff]   ;;  %v1651_v10 = vld [vmem:[%s2275_s1 + $0x404] ss:$8 sps:$4 sm:$0xff]  }
  0x55   :  { %1159 = vmatprep.subr.bf16.mxu1 %v1562_v11  ;;  %1148 = vmatprep.mubr.bf16.mxu0 %v1283_v35  ;;  %v2168_v11 = vld [vmem:[%s2274_s0 + $0x20] sm:$0xff] }
  0x56   :  { %1189 = vmatprep.mubr.bf16.mxu1 %v1285_v38  ;;  %v1681_v35 = vld [vmem:[%s2275_s1 + $0x4a0] ss:$8 sps:$4 sm:$0xff]   ;;  %v1689_v38 = vld [vmem:[%s2275_s1 + $0x4c4] ss:$8 sps:$4 sm:$0xff]  }
  0x57   :  { %1119 = vmatpush1.bf16.msra.mxu0 %v1557_v12  ;;  %v1282_v12 = vcombine.low %v2037_v32, %v2037_v32  ;;  %v1680_v32 = vld [vmem:[%s2275_s1 + $0x494] ss:$8 sps:$4 sm:$0xff]  }
  0x58   :  { %1160 = vmatpush1.bf16.msra.mxu1 %v1560_v13  ;;  %1120 = vmatprep.subr.bf16.mxu0 %v1565_v14  ;;  %v1284_v13 = vcombine.low %v2050_v36, %v2050_v36  ;;  %v1649_v14 = vld [vmem:[%s2275_s1 + $0x400] ss:$8 sps:$4 sm:$0xff]   ;;  %v1686_v36 = vld [vmem:[%s2275_s1 + $0x4b4] ss:$8 sps:$4 sm:$0xff]  }
  0x59   :  { %1161 = vmatprep.subr.bf16.mxu1 %v1568_v15  ;;  %v1287_v15 = vcombine.high %v2168_v11, %v2168_v11 }
  0x5b   :  { %1121 = vmatpush1.bf16.msra.mxu0 %v1563_v16  ;;  %v1656_v16 = vld [vmem:[%s2275_s1 + $0x414] ss:$8 sps:$4 sm:$0xff]  }
  0x5c   :  { %1162 = vmatpush1.bf16.msra.mxu1 %v1566_v17  ;;  %1122 = vmatprep.subr.bf16.mxu0 %v1571_v18  ;;  %v1654_v17 = vld [vmem:[%s2275_s1 + $0x410] ss:$8 sps:$4 sm:$0xff]   ;;  %v1659_v18 = vld [vmem:[%s2275_s1 + $0x424] ss:$8 sps:$4 sm:$0xff]  }
  0x5d   :  { %1163 = vmatprep.subr.bf16.mxu1 %v1574_v19  ;;  %v1657_v19 = vld [vmem:[%s2275_s1 + $0x420] ss:$8 sps:$4 sm:$0xff]  }
  0x5f   :  { %1123 = vmatpush1.bf16.msra.mxu0 %v1569_v20  ;;  %v1662_v20 = vld [vmem:[%s2275_s1 + $0x434] ss:$8 sps:$4 sm:$0xff]  }
  0x60   :  { %1164 = vmatpush1.bf16.msra.mxu1 %v1572_v21  ;;  %1124 = vmatprep.subr.bf16.mxu0 %v1577_v22  ;;  %v1660_v21 = vld [vmem:[%s2275_s1 + $0x430] ss:$8 sps:$4 sm:$0xff]   ;;  %v1665_v22 = vld [vmem:[%s2275_s1 + $0x444] ss:$8 sps:$4 sm:$0xff]  }
  0x61   :  { %1165 = vmatprep.subr.bf16.mxu1 %v1580_v23  ;;  %v1663_v23 = vld [vmem:[%s2275_s1 + $0x440] ss:$8 sps:$4 sm:$0xff]  }
  0x63   :  { %1125 = vmatpush1.bf16.msra.mxu0 %v1575_v24  ;;  %v1668_v24 = vld [vmem:[%s2275_s1 + $0x454] ss:$8 sps:$4 sm:$0xff]  }
  0x64   :  { %1166 = vmatpush1.bf16.msra.mxu1 %v1578_v25  ;;  %1126 = vmatprep.subr.bf16.mxu0 %v1583_v26  ;;  %v1666_v25 = vld [vmem:[%s2275_s1 + $0x450] ss:$8 sps:$4 sm:$0xff]   ;;  %v1671_v26 = vld [vmem:[%s2275_s1 + $0x464] ss:$8 sps:$4 sm:$0xff]  }
  0x65   :  { %1167 = vmatprep.subr.bf16.mxu1 %v1586_v27  ;;  %v1669_v27 = vld [vmem:[%s2275_s1 + $0x460] ss:$8 sps:$4 sm:$0xff]  }
  0x67   :  { %1127 = vmatpush1.bf16.msra.mxu0 %v1581_v28  ;;  %v1674_v28 = vld [vmem:[%s2275_s1 + $0x474] ss:$8 sps:$4 sm:$0xff]  }
  0x68   :  { %1168 = vmatpush1.bf16.msra.mxu1 %v1584_v29  ;;  %1128 = vmatprep.subr.bf16.mxu0 %v1589_v30  ;;  %v1672_v29 = vld [vmem:[%s2275_s1 + $0x470] ss:$8 sps:$4 sm:$0xff]   ;;  %v1677_v30 = vld [vmem:[%s2275_s1 + $0x484] ss:$8 sps:$4 sm:$0xff]  }
  0x69   :  { %1169 = vmatprep.subr.bf16.mxu1 %v1592_v31  ;;  %v1675_v31 = vld [vmem:[%s2275_s1 + $0x480] ss:$8 sps:$4 sm:$0xff]  }
  0x6b   :  { %1129 = vmatpush1.bf16.msra.mxu0 %v1587_v33  ;;  %v1678_v33 = vld [vmem:[%s2275_s1 + $0x490] ss:$8 sps:$4 sm:$0xff]  }
  0x6c   :  { %1170 = vmatpush1.bf16.msra.mxu1 %v1590_v34  ;;  %1130 = vmatprep.subr.bf16.mxu0 %v1595_v37  ;;  %v1683_v34 = vld [vmem:[%s2275_s1 + $0x4a4] ss:$8 sps:$4 sm:$0xff]   ;;  %v1684_v37 = vld [vmem:[%s2275_s1 + $0x4b0] ss:$8 sps:$4 sm:$0xff]  }
  0x6d   :  { %1171 = vmatprep.subr.bf16.mxu1 %v1598_v39  ;;  %v1687_v39 = vld [vmem:[%s2275_s1 + $0x4c0] ss:$8 sps:$4 sm:$0xff]  }
  0x6f   :  { %1131 = vmatpush1.bf16.msra.mxu0 %v1593_v40  ;;  %v1692_v40 = vld [vmem:[%s2275_s1 + $0x4d4] ss:$8 sps:$4 sm:$0xff]  }
  0x70   :  { %1172 = vmatpush1.bf16.msra.mxu1 %v1596_v41  ;;  %1132 = vmatprep.subr.bf16.mxu0 %v1601_v42  ;;  %v1690_v41 = vld [vmem:[%s2275_s1 + $0x4d0] ss:$8 sps:$4 sm:$0xff]   ;;  %v1695_v42 = vld [vmem:[%s2275_s1 + $0x4e4] ss:$8 sps:$4 sm:$0xff]  }
  0x71   :  { %1173 = vmatprep.subr.bf16.mxu1 %v1604_v43  ;;  %v1693_v43 = vld [vmem:[%s2275_s1 + $0x4e0] ss:$8 sps:$4 sm:$0xff]  }
  0x73   :  { %1133 = vmatpush1.bf16.msra.mxu0 %v1599_v44  ;;  %v1698_v44 = vld [vmem:[%s2275_s1 + $0x4f4] ss:$8 sps:$4 sm:$0xff]  }
  0x74   :  { %1174 = vmatpush1.bf16.msra.mxu1 %v1602_v45  ;;  %1134 = vmatprep.subr.bf16.mxu0 %v1607_v46  ;;  %v1696_v45 = vld [vmem:[%s2275_s1 + $0x4f0] ss:$8 sps:$4 sm:$0xff]   ;;  %v1286_v46 = vcombine.low %v2168_v11, %v2168_v11 }
  0x75   :  { %1175 = vmatprep.subr.bf16.mxu1 %v1610_v47 }
  0x77   :  { %1135 = vmatpush1.bf16.msra.mxu0 %v1605_v48 }
  0x78   :  { %1176 = vmatpush1.bf16.msra.mxu1 %v1608_v49  ;;  %1136 = vmatprep.subr.bf16.mxu0 %v1613_v50 }
  0x79   :  { %1177 = vmatprep.subr.bf16.mxu1 %v1616_v51 }
  0x7b   :  { %1137 = vmatpush1.bf16.msra.mxu0 %v1611_v52 }
  0x7c   :  { %1178 = vmatpush1.bf16.msra.mxu1 %v1614_v53  ;;  %1138 = vmatprep.subr.bf16.mxu0 %v1619_v54 }
  0x7d   :  { %1179 = vmatprep.subr.bf16.mxu1 %v1622_v55 }
  0x7f   :  { %1139 = vmatpush1.bf16.msra.mxu0 %v1617_v56 }
  0x80   :  { %1180 = vmatpush1.bf16.msra.mxu1 %v1620_v57  ;;  %1140 = vmatprep.subr.bf16.mxu0 %v1625_v58 }
  0x81   :  { %1181 = vmatprep.subr.bf16.mxu1 %v1628_v59 }
  0x83   :  { %1141 = vmatpush1.bf16.msra.mxu0 %v1623_v60 }
  0x84   :  { %1182 = vmatpush1.bf16.msra.mxu1 %v1626_v61  ;;  %1142 = vmatprep.subr.bf16.mxu0 %v1631_v62 }
  0x85   :  { %1183 = vmatprep.subr.bf16.mxu1 %v1634_v63 }
  0x87   :  { %1143 = vmatpush1.bf16.msra.mxu0 %v1629_v0 }
  0x88   :  { %1184 = vmatpush1.bf16.msra.mxu1 %v1632_v1  ;;  %1144 = vmatprep.subr.bf16.mxu0 %v1637_v2 }
  0x89   :  { %1185 = vmatprep.subr.bf16.mxu1 %v1640_v3 }
  0x8b   :  { %1145 = vmatpush1.bf16.msra.mxu0 %v1635_v4 }
  0x8c   :  { %1186 = vmatpush1.bf16.msra.mxu1 %v1638_v5  ;;  %1146 = vmatprep.subr.bf16.mxu0 %v1643_v6  ;;  %v1250_v5 = vlaneseq }
  0x8d   :  { %1187 = vmatprep.subr.bf16.mxu1 %v1646_v7 }
  0x8e   :  { %v1251_v6 = vshrl.u32 %v1250_v5, 7 }
  0x8f   :  { %1147 = vmatpush1.bf16.msra.mxu0 %v1641_v8  ;;  %v1248_v8 = vld [vmem:[#allocation3] sm:$0x3] }
  0x90   :  { %1188 = vmatpush1.bf16.msra.mxu1 %v1644_v9  ;;  %1198 = vmatprep.subr.bf16.mxu0 %v1651_v10  ;;  %v1252_v7 = vsub.s32 0, %v1251_v6  ;;  %v1256_v9 = vsub.s32 1, %v1251_v6 }
  0x92   :  { %1149 = vmatmul.mubr.bf16.vlgmr.msra.gmra.mrb[4].mxu0 %v1282_v12  ;;  %v1253_v10 = vrot.slane %v1248_v8, %v1252_v7  ;;  %v1257_v12 = vrot.slane %v1248_v8, %v1256_v9 }
  0x93   :  { %1190 = vmatmul.mubr.bf16.vlgmr.msra.gmra.mrb[4].mxu1 %v1284_v13  ;;  %1199 = vmatpush1.bf16.msra.mxu0 %v1649_v14 }
  0x94   :  { %1230 = vmatprep.mubr.bf16.mxu0 %v1287_v15  ;;  %1200 = vmatprep.subr.bf16.mxu0 %v1656_v16 }
  0x97   :  { %1201 = vmatpush1.bf16.msra.mxu0 %v1654_v17 }
  0x98   :  { %1202 = vmatprep.subr.bf16.mxu0 %v1659_v18 }
  0x9b   :  { %1203 = vmatpush1.bf16.msra.mxu0 %v1657_v19 }
  0x9c   :  { %1204 = vmatprep.subr.bf16.mxu0 %v1662_v20 }
  0x9f   :  { %1205 = vmatpush1.bf16.msra.mxu0 %v1660_v21 }
  0xa0   :  { %1206 = vmatprep.subr.bf16.mxu0 %v1665_v22 }
  0xa3   :  { %1207 = vmatpush1.bf16.msra.mxu0 %v1663_v23 }
  0xa4   :  { %1208 = vmatprep.subr.bf16.mxu0 %v1668_v24 }
  0xa7   :  { %1209 = vmatpush1.bf16.msra.mxu0 %v1666_v25 }
  0xa8   :  { %1210 = vmatprep.subr.bf16.mxu0 %v1671_v26 }
  0xab   :  { %1211 = vmatpush1.bf16.msra.mxu0 %v1669_v27 }
  0xac   :  { %1212 = vmatprep.subr.bf16.mxu0 %v1674_v28 }
  0xaf   :  { %1213 = vmatpush1.bf16.msra.mxu0 %v1672_v29 }
  0xb0   :  { %1214 = vmatprep.subr.bf16.mxu0 %v1677_v30 }
  0xb3   :  { %1215 = vmatpush1.bf16.msra.mxu0 %v1675_v31 }
  0xb4   :  { %1216 = vmatprep.subr.bf16.mxu0 %v1680_v32 }
  0xb7   :  { %1217 = vmatpush1.bf16.msra.mxu0 %v1678_v33 }
  0xb8   :  { %1218 = vmatprep.subr.bf16.mxu0 %v1683_v34 }
  0xbb   :  { %1219 = vmatpush1.bf16.msra.mxu0 %v1681_v35 }
  0xbc   :  { %1220 = vmatprep.subr.bf16.mxu0 %v1686_v36 }
  0xbf   :  { %1221 = vmatpush1.bf16.msra.mxu0 %v1684_v37 }
  0xc0   :  { %1222 = vmatprep.subr.bf16.mxu0 %v1689_v38 }
  0xc3   :  { %1223 = vmatpush1.bf16.msra.mxu0 %v1687_v39 }
  0xc4   :  { %1224 = vmatprep.subr.bf16.mxu0 %v1692_v40 }
  0xc7   :  { %1225 = vmatpush1.bf16.msra.mxu0 %v1690_v41 }
  0xc8   :  { %1226 = vmatprep.subr.bf16.mxu0 %v1695_v42 }
  0xcb   :  { %1227 = vmatpush1.bf16.msra.mxu0 %v1693_v43 }
  0xcc   :  { %1228 = vmatprep.subr.bf16.mxu0 %v1698_v44 }
  0xcf   :  { %1229 = vmatpush1.bf16.msra.mxu0 %v1696_v45 }
  0xd2   :  { %1231 = vmatmul.mubr.bf16.vlgmr.msra.gmra.mrb[8].mxu0 %v1286_v46 }
 0x125   :  { %v1068_v47 = vpop.f32.mrb[0].mxu0 }
 0x126   :  { %v1109_v48 = vpop.f32.mrb[0].mxu1  ;;  %v1070_v50 = vpop.f32.mrb[1].mxu0 }
 0x127   :  { %v1110_v49 = vadd.f32 %v1109_v48, %v1068_v47  ;;  %v1111_v51 = vpop.f32.mrb[1].mxu1  ;;  %v1072_v53 = vpop.f32.mrb[2].mxu0 }
 0x128   :  { %v1112_v52 = vadd.f32 %v1111_v51, %v1070_v50  ;;  %v1113_v54 = vpop.f32.mrb[2].mxu1  ;;  %v1073_v55 = vpop.f32.mrb[3].mxu0 }
 0x129   :  { %v1114_v56 = vpop.f32.mrb[3].mxu1 }
 0x165   :  { %v1150_v57 = vpop.f32.mrb[4].mxu0 }
 0x166   :  { %v1191_v58 = vpop.f32.mrb[4].mxu1  ;;  %v1151_v59 = vadd.f32 %v1150_v57, %v1110_v49  ;;  %v1152_v60 = vpop.f32.mrb[5].mxu0 }
 0x167   :  { %v1193_v61 = vpop.f32.mrb[5].mxu1  ;;  %v1153_v62 = vadd.f32 %v1152_v60, %v1112_v52  ;;  %v1154_v63 = vpop.f32.mrb[6].mxu0 }
 0x168   :  { %v1195_v0 = vpop.f32.mrb[6].mxu1  ;;  %v1192_v1 = vadd.f32 %v1191_v58, %v1151_v59  ;;  %v1155_v2 = vpop.f32.mrb[7].mxu0 }
 0x169   :  { %v1196_v3 = vpop.f32.mrb[7].mxu1  ;;  %v1194_v4 = vadd.f32 %v1193_v61, %v1153_v62 }
 0x1a5   :  { %v1232_v11 = vpop.f32.mrb[8].mxu0 }
 0x1a6   :  { %v1233_v13 = vadd.f32 %v1232_v11, %v1192_v1  ;;  %v1234_v14 = vpop.f32.mrb[9].mxu0 }
 0x1a7   :  { %v1235_v15 = vadd.f32 %v1234_v14, %v1194_v4  ;;  %v1236_v16 = vpop.f32.mrb[10].mxu0 }
 0x1a8   :  { %v1260_v17 = vadd.f32 %v1253_v10, %v1233_v13  ;;  %v1237_v18 = vpop.f32.mrb[11].mxu0 }
 0x1a9   :  { %v1261_v19 = vadd.f32 %v1257_v12, %v1235_v15 }
 0x1aa   :  { %v1262_v20 = vmax.f32 %v1260_v17, 0.0 }
 0x1ab   :  { %v1263_v21 = vmax.f32 %v1261_v19, 0.0 }
 0x1ad   :  { %v1449_v22 = vpack.c.bf16 %v1263_v21, %v1262_v20 }
 0x1af   :  { %1272 = vst [vmem:[%s2277_s3] sm:$0xff] %v1449_v22 }
 0x1b0   :  { %1277 = vsyncpa [#allocation4], 1 }

// kernel: deeplabv3p_forward.13
= control target key start
LH: loop header
LB: loop body
LE: loop exit
PB: predicated region body
PF: predicated region fallthrough
CT: control target
= control target key end

     0   :  { %vm134_vm0 = vcmask 1043456   ;;  %vm109_vm1 = vcmask 64512   ;;  %vm19_vm2 = vcmask 523264   ;;  %v484_v1 = vmov 0.0   ;;  %s660_s1 = inlined_call_operand.vmem [shape: bf16[8,64], index: 1, kind: input, shape index: {}]   ;;  %s661_s0 = inlined_call_operand.vmem [shape: bf16[128,8], index: 0, kind: input, shape index: {}]   ;;  %s662_s2 = inlined_call_operand.vmem [shape: f32[1,64], index: 2, kind: input, shape index: {}]   ;;  %s663_s3 = inlined_call_operand.vmem [shape: bf16[128,64], index: 3, kind: output, shape index: {}]  }
   0x1   :  { %v68_v0 = vld [vmem:[%s660_s1] sm:$0xf]  ;;  %22 = vst.msk [vmem:[#allocation2 + $0x10] sm:$0xff] %vm19_vm2, %v484_v1  ;;  %20 = vst.msk [vmem:[#allocation2] sm:$0xff] %vm19_vm2, %v484_v1  ;;  %v478_v5 = vld [vmem:[%s661_s0 + $0x8] sm:$0xff]   ;;  %vm374_vm3 = vcmask 519168  }
   0x2   :  { %21 = vst.msk [vmem:[#allocation2 + $0x8] sm:$0xff] %vm19_vm2, %v484_v1  ;;  %23 = vst.msk [vmem:[#allocation2 + $0x18] sm:$0xff] %vm19_vm2, %v484_v1  ;;  %473 = vmatprep.subr.msk.bf16.mxu0 %vm134_vm0, %v68_v0  ;;  %474 = vmatprep.subr.msk.bf16.mxu1 %vm134_vm0, %v68_v0  ;;  %v136_v2 = vsel %vm134_vm0, %v68_v0, 0  ;;  %v476_v3 = vld [vmem:[%s661_s0] sm:$0xff]   ;;  %v479_v6 = vld [vmem:[%s661_s0 + $0x28] sm:$0xff]  }
   0x3   :  { %24 = vst.msk [vmem:[#allocation2 + $0x20] sm:$0xff] %vm19_vm2, %v484_v1  ;;  %25 = vst.msk [vmem:[#allocation2 + $0x28] sm:$0xff] %vm19_vm2, %v484_v1  ;;  %454 = vmatpush3.bf16.msra.mxu0 %v136_v2  ;;  %472 = vmatpush3.bf16.msra.mxu1 %v136_v2  ;;  %v477_v4 = vld [vmem:[%s661_s0 + $0x20] sm:$0xff]   ;;  %v480_v7 = vld [vmem:[%s661_s0 + $0x10] sm:$0xff]  }
   0x4   :  { %26 = vst.msk [vmem:[#allocation2 + $0x30] sm:$0xff] %vm19_vm2, %v484_v1  ;;  %27 = vst.msk [vmem:[#allocation2 + $0x38] sm:$0xff] %vm19_vm2, %v484_v1  ;;  %455 = vmatprep.mubr.msk.bf16.mxu0 %vm109_vm1, %v476_v3  ;;  %463 = vmatprep.mubr.msk.bf16.mxu1 %vm109_vm1, %v477_v4  ;;  %v481_v8 = vld [vmem:[%s661_s0 + $0x30] sm:$0xff]   ;;  %v482_v9 = vld [vmem:[%s661_s0 + $0x18] sm:$0xff]  }
   0x5   :  { %28 = vst.msk [vmem:[#allocation2 + $0x40] sm:$0xff] %vm19_vm2, %v484_v1  ;;  %29 = vst.msk [vmem:[#allocation2 + $0x48] sm:$0xff] %vm19_vm2, %v484_v1  ;;  %v483_v10 = vld [vmem:[%s661_s0 + $0x38] sm:$0xff]   ;;  %v570_v38 = vld [vmem:[%s662_s2] ss:$0 sm:$0xff] }
   0x6   :  { %30 = vst.msk [vmem:[#allocation2 + $0x50] sm:$0xff] %vm19_vm2, %v484_v1  ;;  %31 = vst.msk [vmem:[#allocation2 + $0x58] sm:$0xff] %vm19_vm2, %v484_v1  ;;  %456 = vmatmul.mubr.msk.bf16.vlgmr.msra.gmra.mrb[0].mxu0 %vm109_vm1, %v478_v5  ;;  %464 = vmatmul.mubr.msk.bf16.vlgmr.msra.gmra.mrb[0].mxu1 %vm109_vm1, %v479_v6 }
   0x7   :  { %32 = vst.msk [vmem:[#allocation2 + $0x60] sm:$0xff] %vm19_vm2, %v484_v1  ;;  %33 = vst.msk [vmem:[#allocation2 + $0x68] sm:$0xff] %vm19_vm2, %v484_v1  ;;  %459 = vmatprep.mubr.msk.bf16.mxu0 %vm109_vm1, %v480_v7  ;;  %467 = vmatprep.mubr.msk.bf16.mxu1 %vm109_vm1, %v481_v8 }
   0x8   :  { %34 = vst.msk [vmem:[#allocation2 + $0x70] sm:$0xff] %vm19_vm2, %v484_v1  ;;  %35 = vst.msk [vmem:[#allocation2 + $0x78] sm:$0xff] %vm19_vm2, %v484_v1  ;;  %v38_v11 = vld [vmem:[#allocation2 + $0x10] sm:$0xff]  ;;  %v36_v13 = vld [vmem:[#allocation2] sm:$0xff] }
   0x9   :  { %v39_v16 = vld [vmem:[#allocation2 + $0x18] sm:$0xff]  ;;  %v37_v21 = vld [vmem:[#allocation2 + $0x8] sm:$0xff] }
   0xa   :  { %v40_v37 = vld [vmem:[#allocation2 + $0x20] sm:$0xff]  ;;  %v41_v46 = vld [vmem:[#allocation2 + $0x28] sm:$0xff] }
   0xb   :  { %v42_v35 = vld [vmem:[#allocation2 + $0x30] sm:$0xff]  ;;  %v43_v41 = vld [vmem:[#allocation2 + $0x38] sm:$0xff] }
   0xc   :  { %v44_v15 = vld [vmem:[#allocation2 + $0x40] sm:$0xff]  ;;  %v45_v26 = vld [vmem:[#allocation2 + $0x48] sm:$0xff] }
   0xd   :  { %v46_v12 = vld [vmem:[#allocation2 + $0x50] sm:$0xff]  ;;  %v47_v20 = vld [vmem:[#allocation2 + $0x58] sm:$0xff] }
   0xe   :  { %460 = vmatmul.mubr.msk.bf16.gmra.mrb[4].mxu0 %vm109_vm1, %v482_v9  ;;  %468 = vmatmul.mubr.msk.bf16.gmra.mrb[4].mxu1 %vm109_vm1, %v483_v10  ;;  %v48_v40 = vld [vmem:[#allocation2 + $0x60] sm:$0xff]  ;;  %v49_v52 = vld [vmem:[#allocation2 + $0x68] sm:$0xff] }
   0xf   :  { %v50_v36 = vld [vmem:[#allocation2 + $0x70] sm:$0xff]  ;;  %v51_v45 = vld [vmem:[#allocation2 + $0x78] sm:$0xff] }
  0xd9   :  { %v457_v14 = vpop.f32.mrb[0].mxu0  ;;  %v465_v18 = vpop.f32.mrb[0].mxu1 }
  0xda   :  { %v237_v17 = vadd.f32 %v457_v14, %v38_v11  ;;  %v172_v19 = vpop.f32.mrb[1].mxu0  ;;  %v245_v22 = vadd.f32 %v465_v18, %v46_v12  ;;  %v204_v24 = vpop.f32.mrb[1].mxu1 }
  0xdb   :  { %v235_v23 = vadd.f32 %v172_v19, %v36_v13  ;;  %v458_v25 = vpop.f32.mrb[2].mxu0  ;;  %v243_v27 = vadd.f32 %v204_v24, %v44_v15  ;;  %v466_v29 = vpop.f32.mrb[2].mxu1 }
  0xdc   :  { %254 = vst.msk [vmem:[#allocation2 + $0x10] sm:$0xff] %vm19_vm2, %v237_v17  ;;  %v238_v28 = vadd.f32 %v458_v25, %v39_v16  ;;  %v175_v30 = vpop.f32.mrb[3].mxu0  ;;  %262 = vst.msk [vmem:[#allocation2 + $0x50] sm:$0xff] %vm19_vm2, %v245_v22  ;;  %v246_v31 = vadd.f32 %v466_v29, %v47_v20  ;;  %v207_v33 = vpop.f32.mrb[3].mxu1 }
  0xdd   :  { %252 = vst.msk [vmem:[#allocation2] sm:$0xff] %vm19_vm2, %v235_v23  ;;  %v236_v32 = vadd.f32 %v175_v30, %v37_v21  ;;  %260 = vst.msk [vmem:[#allocation2 + $0x40] sm:$0xff] %vm19_vm2, %v243_v27  ;;  %v244_v34 = vadd.f32 %v207_v33, %v45_v26 }
  0xde   :  { %255 = vst.msk [vmem:[#allocation2 + $0x18] sm:$0xff] %vm19_vm2, %v238_v28  ;;  %263 = vst.msk [vmem:[#allocation2 + $0x58] sm:$0xff] %vm19_vm2, %v246_v31 }
  0xdf   :  { %253 = vst.msk [vmem:[#allocation2 + $0x8] sm:$0xff] %vm19_vm2, %v236_v32  ;;  %261 = vst.msk [vmem:[#allocation2 + $0x48] sm:$0xff] %vm19_vm2, %v244_v34 }
  0xe1   :  { %v461_v39 = vpop.f32.mrb[4].mxu0  ;;  %v469_v43 = vpop.f32.mrb[4].mxu1 }
  0xe2   :  { %v241_v42 = vadd.f32 %v461_v39, %v42_v35  ;;  %v188_v44 = vpop.f32.mrb[5].mxu0  ;;  %v249_v48 = vadd.f32 %v469_v43, %v50_v36  ;;  %v220_v50 = vpop.f32.mrb[5].mxu1 }
  0xe3   :  { %v273_v47 = vld [vmem:[#allocation2 + $0x10] sm:$0xff]  ;;  %v239_v49 = vadd.f32 %v188_v44, %v40_v37  ;;  %v462_v51 = vpop.f32.mrb[6].mxu0  ;;  %v247_v56 = vadd.f32 %v220_v50, %v48_v40  ;;  %v470_v58 = vpop.f32.mrb[6].mxu1 }
  0xe4   :  { %v296_v53 = vadd.f32 %v570_v38, %v273_v47  ;;  %v281_v54 = vld [vmem:[#allocation2 + $0x50] sm:$0xff]  ;;  %v271_v55 = vld [vmem:[#allocation2] sm:$0xff]  ;;  %258 = vst.msk [vmem:[#allocation2 + $0x30] sm:$0xff] %vm19_vm2, %v241_v42  ;;  %v242_v57 = vadd.f32 %v462_v51, %v43_v41  ;;  %v191_v59 = vpop.f32.mrb[7].mxu0  ;;  %266 = vst.msk [vmem:[#allocation2 + $0x70] sm:$0xff] %vm19_vm2, %v249_v48  ;;  %v250_v0 = vadd.f32 %v470_v58, %v51_v45  ;;  %v223_v2 = vpop.f32.mrb[7].mxu1 }
  0xe5   :  { %v304_v60 = vadd.f32 %v570_v38, %v281_v54  ;;  %v294_v61 = vadd.f32 %v570_v38, %v271_v55  ;;  %v279_v62 = vld [vmem:[#allocation2 + $0x40] sm:$0xff]  ;;  %v274_v63 = vld [vmem:[#allocation2 + $0x18] sm:$0xff]  ;;  %256 = vst.msk [vmem:[#allocation2 + $0x20] sm:$0xff] %vm19_vm2, %v239_v49  ;;  %v240_v1 = vadd.f32 %v191_v59, %v41_v46  ;;  %264 = vst.msk [vmem:[#allocation2 + $0x60] sm:$0xff] %vm19_vm2, %v247_v56 }
  0xe6   :  { %v430_v3 = vpack.c.bf16 %v296_v53, %v296_v53  ;;  %v302_v4 = vadd.f32 %v570_v38, %v279_v62  ;;  %v297_v5 = vadd.f32 %v570_v38, %v274_v63  ;;  %v282_v6 = vld [vmem:[#allocation2 + $0x58] sm:$0xff]  ;;  %v272_v7 = vld [vmem:[#allocation2 + $0x8] sm:$0xff]  ;;  %259 = vst.msk [vmem:[#allocation2 + $0x38] sm:$0xff] %vm19_vm2, %v242_v57  ;;  %v248_v8 = vadd.f32 %v223_v2, %v49_v52 }
  0xe7   :  { %v438_v9 = vpack.c.bf16 %v304_v60, %v304_v60  ;;  %v428_v10 = vpack.c.bf16 %v294_v61, %v294_v61  ;;  %v305_v11 = vadd.f32 %v570_v38, %v282_v6  ;;  %v295_v12 = vadd.f32 %v570_v38, %v272_v7  ;;  %v280_v13 = vld [vmem:[#allocation2 + $0x48] sm:$0xff]  ;;  %267 = vst.msk [vmem:[#allocation2 + $0x78] sm:$0xff] %vm19_vm2, %v250_v0 }
  0xe8   :  { %257 = vst.msk [vmem:[#allocation2 + $0x28] sm:$0xff] %vm19_vm2, %v240_v1  ;;  %v436_v14 = vpack.c.bf16 %v302_v4, %v302_v4  ;;  %v431_v15 = vpack.c.bf16 %v297_v5, %v297_v5  ;;  %v303_v16 = vadd.f32 %v570_v38, %v280_v13  ;;  %265 = vst.msk [vmem:[#allocation2 + $0x68] sm:$0xff] %vm19_vm2, %v248_v8 }
  0xe9   :  { %377 = vst.msk [vmem:[%s663_s3 + $0x8] sm:$0xf] %vm374_vm3, %v430_v3  ;;  %385 = vst.msk [vmem:[%s663_s3 + $0x28] sm:$0xf] %vm374_vm3, %v438_v9  ;;  %v439_v17 = vpack.c.bf16 %v305_v11, %v305_v11  ;;  %v429_v18 = vpack.c.bf16 %v295_v12, %v295_v12 }
  0xea   :  { %375 = vst.msk [vmem:[%s663_s3] sm:$0xf] %vm374_vm3, %v428_v10  ;;  %383 = vst.msk [vmem:[%s663_s3 + $0x20] sm:$0xf] %vm374_vm3, %v436_v14  ;;  %v437_v19 = vpack.c.bf16 %v303_v16, %v303_v16 }
  0xeb   :  { %378 = vst.msk [vmem:[%s663_s3 + $0xc] sm:$0xf] %vm374_vm3, %v431_v15  ;;  %386 = vst.msk [vmem:[%s663_s3 + $0x2c] sm:$0xf] %vm374_vm3, %v439_v17  ;;  %v277_v20 = vld [vmem:[#allocation2 + $0x30] sm:$0xff] }
  0xec   :  { %376 = vst.msk [vmem:[%s663_s3 + $0x4] sm:$0xf] %vm374_vm3, %v429_v18  ;;  %384 = vst.msk [vmem:[%s663_s3 + $0x24] sm:$0xf] %vm374_vm3, %v437_v19  ;;  %v300_v21 = vadd.f32 %v570_v38, %v277_v20  ;;  %v285_v22 = vld [vmem:[#allocation2 + $0x70] sm:$0xff]  ;;  %v275_v23 = vld [vmem:[#allocation2 + $0x20] sm:$0xff] }
  0xed   :  { %v308_v24 = vadd.f32 %v570_v38, %v285_v22  ;;  %v298_v25 = vadd.f32 %v570_v38, %v275_v23  ;;  %v283_v26 = vld [vmem:[#allocation2 + $0x60] sm:$0xff]  ;;  %v278_v27 = vld [vmem:[#allocation2 + $0x38] sm:$0xff] }
  0xee   :  { %v434_v28 = vpack.c.bf16 %v300_v21, %v300_v21  ;;  %v306_v29 = vadd.f32 %v570_v38, %v283_v26  ;;  %v301_v30 = vadd.f32 %v570_v38, %v278_v27  ;;  %v286_v31 = vld [vmem:[#allocation2 + $0x78] sm:$0xff] }
  0xef   :  { %v276_v32 = vld [vmem:[#allocation2 + $0x28] sm:$0xff]  ;;  %v442_v33 = vpack.c.bf16 %v308_v24, %v308_v24  ;;  %v432_v34 = vpack.c.bf16 %v298_v25, %v298_v25  ;;  %v309_v35 = vadd.f32 %v570_v38, %v286_v31 }
  0xf0   :  { %v299_v36 = vadd.f32 %v570_v38, %v276_v32  ;;  %v284_v37 = vld [vmem:[#allocation2 + $0x68] sm:$0xff]  ;;  %381 = vst.msk [vmem:[%s663_s3 + $0x18] sm:$0xf] %vm374_vm3, %v434_v28  ;;  %v440_v39 = vpack.c.bf16 %v306_v29, %v306_v29  ;;  %v435_v40 = vpack.c.bf16 %v301_v30, %v301_v30 }
  0xf1   :  { %v307_v41 = vadd.f32 %v570_v38, %v284_v37  ;;  %389 = vst.msk [vmem:[%s663_s3 + $0x38] sm:$0xf] %vm374_vm3, %v442_v33  ;;  %379 = vst.msk [vmem:[%s663_s3 + $0x10] sm:$0xf] %vm374_vm3, %v432_v34  ;;  %v443_v42 = vpack.c.bf16 %v309_v35, %v309_v35 }
  0xf2   :  { %v433_v43 = vpack.c.bf16 %v299_v36, %v299_v36  ;;  %387 = vst.msk [vmem:[%s663_s3 + $0x30] sm:$0xf] %vm374_vm3, %v440_v39  ;;  %382 = vst.msk [vmem:[%s663_s3 + $0x1c] sm:$0xf] %vm374_vm3, %v435_v40 }
  0xf3   :  { %v441_v38 = vpack.c.bf16 %v307_v41, %v307_v41  ;;  %390 = vst.msk [vmem:[%s663_s3 + $0x3c] sm:$0xf] %vm374_vm3, %v443_v42 }
  0xf4   :  { %380 = vst.msk [vmem:[%s663_s3 + $0x14] sm:$0xf] %vm374_vm3, %v433_v43 }
  0xf5   :  { %388 = vst.msk [vmem:[%s663_s3 + $0x34] sm:$0xf] %vm374_vm3, %v441_v38 }

// kernel: deeplabv3p_forward.20
= control target key start
LH: loop header
LB: loop body
LE: loop exit
PB: predicated region body
PF: predicated region fallthrough
CT: control target
= control target key end

     0   :  { %vm19_vm0 = vcmask 392192   ;;  %v548_v1 = vmov 0.0   ;;  %vm140_vm1 = vcmask 523264   ;;  %vm417_vm2 = vcmask 388096   ;;  %s730_s1 = inlined_call_operand.vmem [shape: bf16[64,48], index: 1, kind: input, shape index: {}]   ;;  %s731_s0 = inlined_call_operand.vmem [shape: bf16[128,64], index: 0, kind: input, shape index: {}]   ;;  %s732_s2 = inlined_call_operand.vmem [shape: f32[1,48], index: 2, kind: input, shape index: {}]   ;;  %s733_s3 = inlined_call_operand.vmem [shape: bf16[128,48], index: 3, kind: output, shape index: {}]  }
   0x1   :  { %v536_v0 = vld [vmem:[%s730_s1] sm:$0xff]   ;;  %22 = vst.msk [vmem:[#allocation2 + $0x10] sm:$0xff] %vm19_vm0, %v548_v1  ;;  %20 = vst.msk [vmem:[#allocation2] sm:$0xff] %vm19_vm0, %v548_v1  ;;  %v537_v2 = vld [vmem:[%s730_s1 + $0x8] sm:$0xff]  }
   0x2   :  { %21 = vst.msk [vmem:[#allocation2 + $0x8] sm:$0xff] %vm19_vm0, %v548_v1  ;;  %23 = vst.msk [vmem:[#allocation2 + $0x18] sm:$0xff] %vm19_vm0, %v548_v1  ;;  %503 = vmatprep.subr.bf16.mxu0 %v536_v0  ;;  %527 = vmatprep.subr.bf16.mxu1 %v536_v0  ;;  %v538_v3 = vld [vmem:[%s730_s1 + $0x10] sm:$0xff]   ;;  %v540_v4 = vld [vmem:[%s731_s0] sm:$0xff]  }
   0x3   :  { %24 = vst.msk [vmem:[#allocation2 + $0x20] sm:$0xff] %vm19_vm0, %v548_v1  ;;  %25 = vst.msk [vmem:[#allocation2 + $0x28] sm:$0xff] %vm19_vm0, %v548_v1  ;;  %504 = vmatpush3.bf16.msra.mxu0 %v536_v0  ;;  %531 = vmatpush3.bf16.msra.mxu1 %v536_v0  ;;  %v541_v5 = vld [vmem:[%s731_s0 + $0x20] sm:$0xff]   ;;  %v539_v6 = vld [vmem:[%s730_s1 + $0x18] sm:$0xff]  }
   0x4   :  { %26 = vst.msk [vmem:[#allocation2 + $0x30] sm:$0xff] %vm19_vm0, %v548_v1  ;;  %27 = vst.msk [vmem:[#allocation2 + $0x38] sm:$0xff] %vm19_vm0, %v548_v1  ;;  %505 = vmatprep.subr.bf16.mxu0 %v537_v2  ;;  %528 = vmatprep.subr.bf16.mxu1 %v537_v2  ;;  %v542_v7 = vld [vmem:[%s731_s0 + $0x8] sm:$0xff]   ;;  %v544_v9 = vld [vmem:[%s731_s0 + $0x10] sm:$0xff]  }
   0x5   :  { %28 = vst.msk [vmem:[#allocation2 + $0x40] sm:$0xff] %vm19_vm0, %v548_v1  ;;  %29 = vst.msk [vmem:[#allocation2 + $0x48] sm:$0xff] %vm19_vm0, %v548_v1  ;;  %511 = vmatprep.mubr.msk.bf16.mxu0 %vm140_vm1, %v540_v4  ;;  %519 = vmatprep.mubr.msk.bf16.mxu1 %vm140_vm1, %v541_v5  ;;  %v543_v8 = vld [vmem:[%s731_s0 + $0x28] sm:$0xff]   ;;  %v545_v10 = vld [vmem:[%s731_s0 + $0x30] sm:$0xff]  }
   0x6   :  { %30 = vst.msk [vmem:[#allocation2 + $0x50] sm:$0xff] %vm19_vm0, %v548_v1  ;;  %31 = vst.msk [vmem:[#allocation2 + $0x58] sm:$0xff] %vm19_vm0, %v548_v1  ;;  %v546_v11 = vld [vmem:[%s731_s0 + $0x18] sm:$0xff]   ;;  %v640_v41 = vld [vmem:[%s732_s2] ss:$0 sm:$0xff] }
   0x7   :  { %32 = vst.msk [vmem:[#allocation2 + $0x60] sm:$0xff] %vm19_vm0, %v548_v1  ;;  %33 = vst.msk [vmem:[#allocation2 + $0x68] sm:$0xff] %vm19_vm0, %v548_v1  ;;  %506 = vmatpush3.bf16.msra.mxu0 %v537_v2  ;;  %532 = vmatpush3.bf16.msra.mxu1 %v537_v2  ;;  %v547_v12 = vld [vmem:[%s731_s0 + $0x38] sm:$0xff]  }
   0x8   :  { %34 = vst.msk [vmem:[#allocation2 + $0x70] sm:$0xff] %vm19_vm0, %v548_v1  ;;  %35 = vst.msk [vmem:[#allocation2 + $0x78] sm:$0xff] %vm19_vm0, %v548_v1  ;;  %507 = vmatprep.subr.bf16.mxu0 %v538_v3  ;;  %529 = vmatprep.subr.bf16.mxu1 %v538_v3  ;;  %v38_v13 = vld [vmem:[#allocation2 + $0x10] sm:$0xff]  ;;  %v36_v15 = vld [vmem:[#allocation2] sm:$0xff] }
   0x9   :  { %v39_v19 = vld [vmem:[#allocation2 + $0x18] sm:$0xff]  ;;  %v37_v25 = vld [vmem:[#allocation2 + $0x8] sm:$0xff] }
   0xa   :  { %v40_v39 = vld [vmem:[#allocation2 + $0x20] sm:$0xff]  ;;  %v41_v50 = vld [vmem:[#allocation2 + $0x28] sm:$0xff] }
   0xb   :  { %508 = vmatpush3.bf16.msra.mxu0 %v538_v3  ;;  %533 = vmatpush3.bf16.msra.mxu1 %v538_v3  ;;  %v42_v37 = vld [vmem:[#allocation2 + $0x30] sm:$0xff]  ;;  %v43_v44 = vld [vmem:[#allocation2 + $0x38] sm:$0xff] }
   0xc   :  { %509 = vmatprep.subr.bf16.mxu0 %v539_v6  ;;  %530 = vmatprep.subr.bf16.mxu1 %v539_v6  ;;  %v44_v16 = vld [vmem:[#allocation2 + $0x40] sm:$0xff]  ;;  %v45_v26 = vld [vmem:[#allocation2 + $0x48] sm:$0xff] }
   0xd   :  { %v46_v14 = vld [vmem:[#allocation2 + $0x50] sm:$0xff]  ;;  %v47_v20 = vld [vmem:[#allocation2 + $0x58] sm:$0xff] }
   0xe   :  { %v48_v40 = vld [vmem:[#allocation2 + $0x60] sm:$0xff]  ;;  %v49_v51 = vld [vmem:[#allocation2 + $0x68] sm:$0xff] }
   0xf   :  { %510 = vmatpush3.bf16.msra.mxu0 %v539_v6  ;;  %534 = vmatpush3.bf16.msra.mxu1 %v539_v6  ;;  %v50_v38 = vld [vmem:[#allocation2 + $0x70] sm:$0xff]  ;;  %v51_v45 = vld [vmem:[#allocation2 + $0x78] sm:$0xff] }
  0x12   :  { %512 = vmatmul.mubr.msk.bf16.vlgmr.msra.gmra.mrb[0].mxu0 %vm140_vm1, %v542_v7  ;;  %520 = vmatmul.mubr.msk.bf16.vlgmr.msra.gmra.mrb[0].mxu1 %vm140_vm1, %v543_v8 }
  0x13   :  { %515 = vmatprep.mubr.msk.bf16.mxu0 %vm140_vm1, %v544_v9  ;;  %523 = vmatprep.mubr.msk.bf16.mxu1 %vm140_vm1, %v545_v10 }
  0x1a   :  { %516 = vmatmul.mubr.msk.bf16.gmra.mrb[4].mxu0 %vm140_vm1, %v546_v11  ;;  %524 = vmatmul.mubr.msk.bf16.gmra.mrb[4].mxu1 %vm140_vm1, %v547_v12 }
  0xe5   :  { %v513_v17 = vpop.f32.mrb[0].mxu0  ;;  %v521_v18 = vpop.f32.mrb[0].mxu1 }
  0xe6   :  { %v264_v21 = vadd.f32 %v513_v17, %v38_v13  ;;  %v272_v22 = vadd.f32 %v521_v18, %v46_v14  ;;  %v199_v23 = vpop.f32.mrb[1].mxu0  ;;  %v231_v24 = vpop.f32.mrb[1].mxu1 }
  0xe7   :  { %v262_v27 = vadd.f32 %v199_v23, %v36_v15  ;;  %v270_v28 = vadd.f32 %v231_v24, %v44_v16  ;;  %v514_v29 = vpop.f32.mrb[2].mxu0  ;;  %v522_v30 = vpop.f32.mrb[2].mxu1 }
  0xe8   :  { %281 = vst.msk [vmem:[#allocation2 + $0x10] sm:$0xff] %vm19_vm0, %v264_v21  ;;  %289 = vst.msk [vmem:[#allocation2 + $0x50] sm:$0xff] %vm19_vm0, %v272_v22  ;;  %v265_v31 = vadd.f32 %v514_v29, %v39_v19  ;;  %v273_v32 = vadd.f32 %v522_v30, %v47_v20  ;;  %v202_v33 = vpop.f32.mrb[3].mxu0  ;;  %v234_v34 = vpop.f32.mrb[3].mxu1 }
  0xe9   :  { %279 = vst.msk [vmem:[#allocation2] sm:$0xff] %vm19_vm0, %v262_v27  ;;  %287 = vst.msk [vmem:[#allocation2 + $0x40] sm:$0xff] %vm19_vm0, %v270_v28  ;;  %v263_v35 = vadd.f32 %v202_v33, %v37_v25  ;;  %v271_v36 = vadd.f32 %v234_v34, %v45_v26 }
  0xea   :  { %282 = vst.msk [vmem:[#allocation2 + $0x18] sm:$0xff] %vm19_vm0, %v265_v31  ;;  %290 = vst.msk [vmem:[#allocation2 + $0x58] sm:$0xff] %vm19_vm0, %v273_v32 }
  0xeb   :  { %280 = vst.msk [vmem:[#allocation2 + $0x8] sm:$0xff] %vm19_vm0, %v263_v35  ;;  %288 = vst.msk [vmem:[#allocation2 + $0x48] sm:$0xff] %vm19_vm0, %v271_v36 }
  0xed   :  { %v517_v42 = vpop.f32.mrb[4].mxu0  ;;  %v525_v43 = vpop.f32.mrb[4].mxu1 }
  0xee   :  { %v268_v46 = vadd.f32 %v517_v42, %v42_v37  ;;  %v276_v47 = vadd.f32 %v525_v43, %v50_v38  ;;  %v215_v48 = vpop.f32.mrb[5].mxu0  ;;  %v247_v49 = vpop.f32.mrb[5].mxu1 }
  0xef   :  { %v300_v52 = vld [vmem:[#allocation2 + $0x10] sm:$0xff]  ;;  %v266_v54 = vadd.f32 %v215_v48, %v40_v39  ;;  %v274_v55 = vadd.f32 %v247_v49, %v48_v40  ;;  %v518_v56 = vpop.f32.mrb[6].mxu0  ;;  %v526_v57 = vpop.f32.mrb[6].mxu1 }
  0xf0   :  { %v308_v53 = vld [vmem:[#allocation2 + $0x50] sm:$0xff]  ;;  %v323_v58 = vadd.f32 %v640_v41, %v300_v52  ;;  %v298_v60 = vld [vmem:[#allocation2] sm:$0xff]  ;;  %285 = vst.msk [vmem:[#allocation2 + $0x30] sm:$0xff] %vm19_vm0, %v268_v46  ;;  %293 = vst.msk [vmem:[#allocation2 + $0x70] sm:$0xff] %vm19_vm0, %v276_v47  ;;  %v269_v62 = vadd.f32 %v518_v56, %v43_v44  ;;  %v277_v63 = vadd.f32 %v526_v57, %v51_v45  ;;  %v218_v0 = vpop.f32.mrb[7].mxu0  ;;  %v250_v1 = vpop.f32.mrb[7].mxu1 }
  0xf1   :  { %v331_v59 = vadd.f32 %v640_v41, %v308_v53  ;;  %v306_v61 = vld [vmem:[#allocation2 + $0x40] sm:$0xff]  ;;  %v321_v2 = vadd.f32 %v640_v41, %v298_v60  ;;  %v301_v4 = vld [vmem:[#allocation2 + $0x18] sm:$0xff]  ;;  %283 = vst.msk [vmem:[#allocation2 + $0x20] sm:$0xff] %vm19_vm0, %v266_v54  ;;  %291 = vst.msk [vmem:[#allocation2 + $0x60] sm:$0xff] %vm19_vm0, %v274_v55  ;;  %v267_v6 = vadd.f32 %v218_v0, %v41_v50 }
  0xf2   :  { %v329_v3 = vadd.f32 %v640_v41, %v306_v61  ;;  %v309_v5 = vld [vmem:[#allocation2 + $0x58] sm:$0xff]  ;;  %v275_v7 = vadd.f32 %v250_v1, %v49_v51  ;;  %v339_v8 = vmax.f32 %v323_v58, 0.0  ;;  %v324_v10 = vadd.f32 %v640_v41, %v301_v4  ;;  %v299_v12 = vld [vmem:[#allocation2 + $0x8] sm:$0xff]  ;;  %286 = vst.msk [vmem:[#allocation2 + $0x38] sm:$0xff] %vm19_vm0, %v269_v62  ;;  %294 = vst.msk [vmem:[#allocation2 + $0x78] sm:$0xff] %vm19_vm0, %v277_v63 }
  0xf3   :  { %v347_v9 = vmax.f32 %v331_v59, 0.0  ;;  %v332_v11 = vadd.f32 %v640_v41, %v309_v5  ;;  %v307_v13 = vld [vmem:[#allocation2 + $0x48] sm:$0xff]  ;;  %v337_v14 = vmax.f32 %v321_v2, 0.0  ;;  %v322_v16 = vadd.f32 %v640_v41, %v299_v12  ;;  %284 = vst.msk [vmem:[#allocation2 + $0x28] sm:$0xff] %vm19_vm0, %v267_v6 }
  0xf4   :  { %v345_v15 = vmax.f32 %v329_v3, 0.0  ;;  %v330_v17 = vadd.f32 %v640_v41, %v307_v13  ;;  %292 = vst.msk [vmem:[#allocation2 + $0x68] sm:$0xff] %vm19_vm0, %v275_v7  ;;  %v477_v18 = vpack.c.bf16 %v339_v8, %v339_v8  ;;  %v340_v20 = vmax.f32 %v324_v10, 0.0 }
  0xf5   :  { %v485_v19 = vpack.c.bf16 %v347_v9, %v347_v9  ;;  %v348_v21 = vmax.f32 %v332_v11, 0.0  ;;  %v475_v22 = vpack.c.bf16 %v337_v14, %v337_v14  ;;  %v338_v24 = vmax.f32 %v322_v16, 0.0 }
  0xf6   :  { %v483_v23 = vpack.c.bf16 %v345_v15, %v345_v15  ;;  %v346_v25 = vmax.f32 %v330_v17, 0.0  ;;  %420 = vst.msk [vmem:[%s733_s3 + $0x8] sm:$0xf] %vm417_vm2, %v477_v18  ;;  %v478_v26 = vpack.c.bf16 %v340_v20, %v340_v20 }
  0xf7   :  { %428 = vst.msk [vmem:[%s733_s3 + $0x28] sm:$0xf] %vm417_vm2, %v485_v19  ;;  %v486_v27 = vpack.c.bf16 %v348_v21, %v348_v21  ;;  %418 = vst.msk [vmem:[%s733_s3] sm:$0xf] %vm417_vm2, %v475_v22  ;;  %v476_v28 = vpack.c.bf16 %v338_v24, %v338_v24  ;;  %v304_v30 = vld [vmem:[#allocation2 + $0x30] sm:$0xff] }
  0xf8   :  { %426 = vst.msk [vmem:[%s733_s3 + $0x20] sm:$0xf] %vm417_vm2, %v483_v23  ;;  %v484_v29 = vpack.c.bf16 %v346_v25, %v346_v25  ;;  %v312_v31 = vld [vmem:[#allocation2 + $0x70] sm:$0xff]  ;;  %421 = vst.msk [vmem:[%s733_s3 + $0xc] sm:$0xf] %vm417_vm2, %v478_v26  ;;  %v327_v32 = vadd.f32 %v640_v41, %v304_v30  ;;  %v302_v34 = vld [vmem:[#allocation2 + $0x20] sm:$0xff] }
  0xf9   :  { %429 = vst.msk [vmem:[%s733_s3 + $0x2c] sm:$0xf] %vm417_vm2, %v486_v27  ;;  %v335_v33 = vadd.f32 %v640_v41, %v312_v31  ;;  %v310_v35 = vld [vmem:[#allocation2 + $0x60] sm:$0xff]  ;;  %419 = vst.msk [vmem:[%s733_s3 + $0x4] sm:$0xf] %vm417_vm2, %v476_v28  ;;  %v325_v36 = vadd.f32 %v640_v41, %v302_v34  ;;  %v305_v38 = vld [vmem:[#allocation2 + $0x38] sm:$0xff] }
  0xfa   :  { %427 = vst.msk [vmem:[%s733_s3 + $0x24] sm:$0xf] %vm417_vm2, %v484_v29  ;;  %v333_v37 = vadd.f32 %v640_v41, %v310_v35  ;;  %v313_v39 = vld [vmem:[#allocation2 + $0x78] sm:$0xff]  ;;  %v343_v40 = vmax.f32 %v327_v32, 0.0  ;;  %v328_v43 = vadd.f32 %v640_v41, %v305_v38  ;;  %v303_v45 = vld [vmem:[#allocation2 + $0x28] sm:$0xff] }
  0xfb   :  { %v351_v42 = vmax.f32 %v335_v33, 0.0  ;;  %v336_v44 = vadd.f32 %v640_v41, %v313_v39  ;;  %v311_v46 = vld [vmem:[#allocation2 + $0x68] sm:$0xff]  ;;  %v341_v47 = vmax.f32 %v325_v36, 0.0  ;;  %v326_v49 = vadd.f32 %v640_v41, %v303_v45 }
  0xfc   :  { %v349_v48 = vmax.f32 %v333_v37, 0.0  ;;  %v334_v50 = vadd.f32 %v640_v41, %v311_v46  ;;  %v481_v51 = vpack.c.bf16 %v343_v40, %v343_v40  ;;  %v344_v53 = vmax.f32 %v328_v43, 0.0 }
  0xfd   :  { %v489_v52 = vpack.c.bf16 %v351_v42, %v351_v42  ;;  %v352_v54 = vmax.f32 %v336_v44, 0.0  ;;  %v479_v55 = vpack.c.bf16 %v341_v47, %v341_v47  ;;  %v342_v57 = vmax.f32 %v326_v49, 0.0 }
  0xfe   :  { %v487_v56 = vpack.c.bf16 %v349_v48, %v349_v48  ;;  %v350_v58 = vmax.f32 %v334_v50, 0.0  ;;  %424 = vst.msk [vmem:[%s733_s3 + $0x18] sm:$0xf] %vm417_vm2, %v481_v51  ;;  %v482_v59 = vpack.c.bf16 %v344_v53, %v344_v53 }
  0xff   :  { %432 = vst.msk [vmem:[%s733_s3 + $0x38] sm:$0xf] %vm417_vm2, %v489_v52  ;;  %v490_v41 = vpack.c.bf16 %v352_v54, %v352_v54  ;;  %422 = vst.msk [vmem:[%s733_s3 + $0x10] sm:$0xf] %vm417_vm2, %v479_v55  ;;  %v480_v60 = vpack.c.bf16 %v342_v57, %v342_v57 }
 0x100   :  { %430 = vst.msk [vmem:[%s733_s3 + $0x30] sm:$0xf] %vm417_vm2, %v487_v56  ;;  %v488_v61 = vpack.c.bf16 %v350_v58, %v350_v58  ;;  %425 = vst.msk [vmem:[%s733_s3 + $0x1c] sm:$0xf] %vm417_vm2, %v482_v59 }
 0x101   :  { %433 = vst.msk [vmem:[%s733_s3 + $0x3c] sm:$0xf] %vm417_vm2, %v490_v41  ;;  %423 = vst.msk [vmem:[%s733_s3 + $0x14] sm:$0xf] %vm417_vm2, %v480_v60 }
 0x102   :  { %431 = vst.msk [vmem:[%s733_s3 + $0x34] sm:$0xf] %vm417_vm2, %v488_v61 }

// kernel: deeplabv3p_forward.23
= control target key start
LH: loop header
LB: loop body
LE: loop exit
PB: predicated region body
PF: predicated region fallthrough
CT: control target
= control target key end

     0   :  { %vm19_vm0 = vcmask 179200   ;;  %v719_v32 = vmov 0.0   ;;  %vm512_vm1 = vcmask 175104   ;;  %s953_s1 = inlined_call_operand.vmem [shape: bf16[256,22], index: 1, kind: input, shape index: {}]   ;;  %s954_s0 = inlined_call_operand.vmem [shape: bf16[128,256], index: 0, kind: input, shape index: {}]   ;;  %s955_s2 = inlined_call_operand.vmem [shape: f32[1,22], index: 2, kind: input, shape index: {}]   ;;  %s956_s3 = inlined_call_operand.vmem [shape: bf16[128,22], index: 3, kind: output, shape index: {}]  }
   0x1   :  { %v679_v0 = vld [vmem:[%s953_s1 + $0x40] sm:$0xff]   ;;  %v681_v2 = vld [vmem:[%s953_s1 + $0x48] sm:$0xff]   ;;  %v683_v4 = vld [vmem:[%s953_s1 + $0x50] sm:$0xff]   ;;  %20 = vst.msk [vmem:[#allocation2] sm:$0xff] %vm19_vm0, %v719_v32 }
   0x2   :  { %v680_v1 = vld [vmem:[%s953_s1] sm:$0xff]   ;;  %598 = vmatprep.subr.bf16.mxu0 %v679_v0  ;;  %662 = vmatprep.subr.bf16.mxu1 %v679_v0  ;;  %v682_v3 = vld [vmem:[%s953_s1 + $0x8] sm:$0xff]   ;;  %v684_v5 = vld [vmem:[%s953_s1 + $0x10] sm:$0xff]   ;;  %21 = vst.msk [vmem:[#allocation2 + $0x8] sm:$0xff] %vm19_vm0, %v719_v32 }
   0x3   :  { %599 = vmatpush3.bf16.msra.mxu0 %v680_v1  ;;  %670 = vmatpush3.bf16.msra.mxu1 %v680_v1  ;;  %v685_v6 = vld [vmem:[%s953_s1 + $0x58] sm:$0xff]   ;;  %v687_v8 = vld [vmem:[%s953_s1 + $0x60] sm:$0xff]   ;;  %v689_v10 = vld [vmem:[%s953_s1 + $0x68] sm:$0xff]   ;;  %22 = vst.msk [vmem:[#allocation2 + $0x10] sm:$0xff] %vm19_vm0, %v719_v32 }
   0x4   :  { %600 = vmatprep.subr.bf16.mxu0 %v681_v2  ;;  %663 = vmatprep.subr.bf16.mxu1 %v681_v2  ;;  %v686_v7 = vld [vmem:[%s953_s1 + $0x18] sm:$0xff]   ;;  %v688_v9 = vld [vmem:[%s953_s1 + $0x20] sm:$0xff]   ;;  %v690_v13 = vld [vmem:[%s953_s1 + $0x28] sm:$0xff]   ;;  %23 = vst.msk [vmem:[#allocation2 + $0x18] sm:$0xff] %vm19_vm0, %v719_v32 }
   0x5   :  { %v697_v11 = vld [vmem:[%s954_s0 + $0x4] ss:$8 sps:$4 sm:$0xff]   ;;  %v691_v14 = vld [vmem:[%s953_s1 + $0x70] sm:$0xff]   ;;  %v693_v16 = vld [vmem:[%s953_s1 + $0x78] sm:$0xff]   ;;  %24 = vst.msk [vmem:[#allocation2 + $0x20] sm:$0xff] %vm19_vm0, %v719_v32 }
   0x6   :  { %v700_v12 = vld [vmem:[%s954_s0 + $0x44] ss:$8 sps:$4 sm:$0xff]   ;;  %308 = vmatprep.mubr.bf16.mxu0 %v697_v11  ;;  %v692_v15 = vld [vmem:[%s953_s1 + $0x30] sm:$0xff]   ;;  %v694_v17 = vld [vmem:[%s953_s1 + $0x38] sm:$0xff]   ;;  %25 = vst.msk [vmem:[#allocation2 + $0x28] sm:$0xff] %vm19_vm0, %v719_v32 }
   0x7   :  { %601 = vmatpush3.bf16.msra.mxu0 %v682_v3  ;;  %671 = vmatpush3.bf16.msra.mxu1 %v682_v3  ;;  %v695_v18 = vld [vmem:[%s954_s0] ss:$8 sps:$4 sm:$0xff]   ;;  %v701_v20 = vld [vmem:[%s954_s0 + $0x14] ss:$8 sps:$4 sm:$0xff]   ;;  %v705_v22 = vld [vmem:[%s954_s0 + $0x10] ss:$8 sps:$4 sm:$0xff]  }
   0x8   :  { %602 = vmatprep.subr.bf16.mxu0 %v683_v4  ;;  %664 = vmatprep.subr.bf16.mxu1 %v683_v4  ;;  %v698_v19 = vld [vmem:[%s954_s0 + $0x40] ss:$8 sps:$4 sm:$0xff]   ;;  %v703_v21 = vld [vmem:[%s954_s0 + $0x54] ss:$8 sps:$4 sm:$0xff]   ;;  %v706_v23 = vld [vmem:[%s954_s0 + $0x50] ss:$8 sps:$4 sm:$0xff]  }
   0x9   :  { %340 = vmatprep.mubr.bf16.mxu1 %v700_v12  ;;  %v707_v24 = vld [vmem:[%s954_s0 + $0x24] ss:$8 sps:$4 sm:$0xff]   ;;  %v711_v26 = vld [vmem:[%s954_s0 + $0x20] ss:$8 sps:$4 sm:$0xff]   ;;  %v713_v28 = vld [vmem:[%s954_s0 + $0x34] ss:$8 sps:$4 sm:$0xff]  }
   0xa   :  { %v709_v25 = vld [vmem:[%s954_s0 + $0x64] ss:$8 sps:$4 sm:$0xff]   ;;  %v712_v27 = vld [vmem:[%s954_s0 + $0x60] ss:$8 sps:$4 sm:$0xff]   ;;  %v715_v29 = vld [vmem:[%s954_s0 + $0x74] ss:$8 sps:$4 sm:$0xff]  }
   0xb   :  { %603 = vmatpush3.bf16.msra.mxu0 %v684_v5  ;;  %672 = vmatpush3.bf16.msra.mxu1 %v684_v5  ;;  %v717_v30 = vld [vmem:[%s954_s0 + $0x30] ss:$8 sps:$4 sm:$0xff]   ;;  %26 = vst.msk [vmem:[#allocation2 + $0x30] sm:$0xff] %vm19_vm0, %v719_v32  ;;  %27 = vst.msk [vmem:[#allocation2 + $0x38] sm:$0xff] %vm19_vm0, %v719_v32  ;;  %v36_v35 = vld [vmem:[#allocation2] sm:$0xff] }
   0xc   :  { %604 = vmatprep.subr.bf16.mxu0 %v685_v6  ;;  %665 = vmatprep.subr.bf16.mxu1 %v685_v6  ;;  %v718_v31 = vld [vmem:[%s954_s0 + $0x70] ss:$8 sps:$4 sm:$0xff]   ;;  %28 = vst.msk [vmem:[#allocation2 + $0x40] sm:$0xff] %vm19_vm0, %v719_v32  ;;  %29 = vst.msk [vmem:[#allocation2 + $0x48] sm:$0xff] %vm19_vm0, %v719_v32  ;;  %v37_v43 = vld [vmem:[#allocation2 + $0x8] sm:$0xff] }
   0xd   :  { %30 = vst.msk [vmem:[#allocation2 + $0x50] sm:$0xff] %vm19_vm0, %v719_v32  ;;  %31 = vst.msk [vmem:[#allocation2 + $0x58] sm:$0xff] %vm19_vm0, %v719_v32  ;;  %v38_v55 = vld [vmem:[#allocation2 + $0x10] sm:$0xff]  ;;  %v859_v63 = vld [vmem:[%s955_s2] ss:$0 sm:$0xff] }
   0xe   :  { %32 = vst.msk [vmem:[#allocation2 + $0x60] sm:$0xff] %vm19_vm0, %v719_v32  ;;  %33 = vst.msk [vmem:[#allocation2 + $0x68] sm:$0xff] %vm19_vm0, %v719_v32  ;;  %v39_v0 = vld [vmem:[#allocation2 + $0x18] sm:$0xff] }
   0xf   :  { %605 = vmatpush3.bf16.msra.mxu0 %v686_v7  ;;  %673 = vmatpush3.bf16.msra.mxu1 %v686_v7  ;;  %34 = vst.msk [vmem:[#allocation2 + $0x70] sm:$0xff] %vm19_vm0, %v719_v32  ;;  %35 = vst.msk [vmem:[#allocation2 + $0x78] sm:$0xff] %vm19_vm0, %v719_v32  ;;  %v41_v32 = vld [vmem:[#allocation2 + $0x28] sm:$0xff] }
  0x10   :  { %606 = vmatprep.subr.bf16.mxu0 %v687_v8  ;;  %666 = vmatprep.subr.bf16.mxu1 %v687_v8 }
  0x13   :  { %607 = vmatpush3.bf16.msra.mxu0 %v688_v9  ;;  %674 = vmatpush3.bf16.msra.mxu1 %v688_v9  ;;  %v44_v37 = vld [vmem:[#allocation2 + $0x40] sm:$0xff]  ;;  %v45_v45 = vld [vmem:[#allocation2 + $0x48] sm:$0xff] }
  0x14   :  { %608 = vmatprep.subr.bf16.mxu0 %v689_v10  ;;  %667 = vmatprep.subr.bf16.mxu1 %v689_v10  ;;  %v46_v57 = vld [vmem:[#allocation2 + $0x50] sm:$0xff]  ;;  %v47_v2 = vld [vmem:[#allocation2 + $0x58] sm:$0xff] }
  0x17   :  { %609 = vmatpush3.bf16.msra.mxu0 %v690_v13  ;;  %675 = vmatpush3.bf16.msra.mxu1 %v690_v13 }
  0x18   :  { %610 = vmatprep.subr.bf16.mxu0 %v691_v14  ;;  %668 = vmatprep.subr.bf16.mxu1 %v691_v14 }
  0x1b   :  { %611 = vmatpush3.bf16.msra.mxu0 %v692_v15  ;;  %676 = vmatpush3.bf16.msra.mxu1 %v692_v15 }
  0x1c   :  { %612 = vmatprep.subr.bf16.mxu0 %v693_v16  ;;  %669 = vmatprep.subr.bf16.mxu1 %v693_v16 }
  0x1f   :  { %613 = vmatpush3.bf16.msra.mxu0 %v694_v17  ;;  %677 = vmatpush3.bf16.msra.mxu1 %v694_v17 }
  0x22   :  { %309 = vmatmul.mubr.bf16.vlgmr.msra.gmra.mrb[0].mxu0 %v695_v18  ;;  %341 = vmatmul.mubr.bf16.vlgmr.msra.gmra.mrb[0].mxu1 %v698_v19 }
  0x23   :  { %316 = vmatprep.mubr.bf16.mxu0 %v701_v20  ;;  %348 = vmatprep.mubr.bf16.mxu1 %v703_v21 }
  0x2a   :  { %317 = vmatmul.mubr.bf16.gmra.mrb[4].mxu0 %v705_v22  ;;  %349 = vmatmul.mubr.bf16.gmra.mrb[4].mxu1 %v706_v23  ;;  %v40_v22 = vld [vmem:[#allocation2 + $0x20] sm:$0xff] }
  0x2b   :  { %324 = vmatprep.mubr.bf16.mxu0 %v707_v24  ;;  %356 = vmatprep.mubr.bf16.mxu1 %v709_v25  ;;  %v48_v24 = vld [vmem:[#allocation2 + $0x60] sm:$0xff] }
  0x32   :  { %325 = vmatmul.mubr.bf16.gmra.mrb[8].mxu0 %v711_v26  ;;  %357 = vmatmul.mubr.bf16.gmra.mrb[8].mxu1 %v712_v27 }
  0x33   :  { %332 = vmatprep.mubr.bf16.mxu0 %v713_v28  ;;  %364 = vmatprep.mubr.bf16.mxu1 %v715_v29 }
  0x3a   :  { %333 = vmatmul.mubr.bf16.gmra.mrb[12].mxu0 %v717_v30  ;;  %365 = vmatmul.mubr.bf16.gmra.mrb[12].mxu1 %v718_v31 }
  0xf5   :  { %v614_v33 = vpop.f32.mrb[0].mxu0  ;;  %v638_v34 = vpop.f32.mrb[0].mxu1 }
  0xf6   :  { %v615_v36 = vpop.f32.mrb[1].mxu0  ;;  %v639_v38 = vpop.f32.mrb[1].mxu1 }
  0xf7   :  { %v616_v39 = vadd.f32 %v615_v36, %v614_v33  ;;  %v640_v40 = vadd.f32 %v639_v38, %v638_v34  ;;  %v617_v41 = vpop.f32.mrb[2].mxu0  ;;  %v641_v42 = vpop.f32.mrb[2].mxu1  ;;  %v49_v34 = vld [vmem:[#allocation2 + $0x68] sm:$0xff] }
  0xf8   :  { %v618_v44 = vpop.f32.mrb[3].mxu0  ;;  %v642_v46 = vpop.f32.mrb[3].mxu1 }
  0xf9   :  { %v373_v47 = vadd.f32 %v616_v39, %v36_v35  ;;  %v381_v48 = vadd.f32 %v640_v40, %v44_v37  ;;  %v619_v49 = vadd.f32 %v618_v44, %v617_v41  ;;  %v643_v50 = vadd.f32 %v642_v46, %v641_v42 }
  0xfb   :  { %390 = vst.msk [vmem:[#allocation2] sm:$0xff] %vm19_vm0, %v373_v47  ;;  %398 = vst.msk [vmem:[#allocation2 + $0x40] sm:$0xff] %vm19_vm0, %v381_v48  ;;  %v374_v51 = vadd.f32 %v619_v49, %v37_v43  ;;  %v382_v52 = vadd.f32 %v643_v50, %v45_v45 }
  0xfd   :  { %391 = vst.msk [vmem:[#allocation2 + $0x8] sm:$0xff] %vm19_vm0, %v374_v51  ;;  %399 = vst.msk [vmem:[#allocation2 + $0x48] sm:$0xff] %vm19_vm0, %v382_v52  ;;  %v620_v53 = vpop.f32.mrb[4].mxu0  ;;  %v644_v54 = vpop.f32.mrb[4].mxu1 }
  0xfe   :  { %v621_v56 = vpop.f32.mrb[5].mxu0  ;;  %v645_v58 = vpop.f32.mrb[5].mxu1 }
  0xff   :  { %v622_v59 = vadd.f32 %v621_v56, %v620_v53  ;;  %v646_v60 = vadd.f32 %v645_v58, %v644_v54  ;;  %v623_v61 = vpop.f32.mrb[6].mxu0  ;;  %v647_v62 = vpop.f32.mrb[6].mxu1  ;;  %v42_v54 = vld [vmem:[#allocation2 + $0x30] sm:$0xff] }
 0x100   :  { %v624_v1 = vpop.f32.mrb[7].mxu0  ;;  %v648_v3 = vpop.f32.mrb[7].mxu1  ;;  %v50_v56 = vld [vmem:[#allocation2 + $0x70] sm:$0xff] }
 0x101   :  { %v375_v4 = vadd.f32 %v622_v59, %v38_v55  ;;  %v383_v5 = vadd.f32 %v646_v60, %v46_v57  ;;  %v625_v6 = vadd.f32 %v624_v1, %v623_v61  ;;  %v649_v7 = vadd.f32 %v648_v3, %v647_v62  ;;  %v43_v1 = vld [vmem:[#allocation2 + $0x38] sm:$0xff] }
 0x102   :  { %v409_v8 = vld [vmem:[#allocation2] sm:$0xff]  ;;  %v51_v3 = vld [vmem:[#allocation2 + $0x78] sm:$0xff] }
 0x103   :  { %v417_v9 = vld [vmem:[#allocation2 + $0x40] sm:$0xff]  ;;  %v432_v10 = vadd.f32 %v859_v63, %v409_v8  ;;  %392 = vst.msk [vmem:[#allocation2 + $0x10] sm:$0xff] %vm19_vm0, %v375_v4  ;;  %400 = vst.msk [vmem:[#allocation2 + $0x50] sm:$0xff] %vm19_vm0, %v383_v5  ;;  %v376_v12 = vadd.f32 %v625_v6, %v39_v0  ;;  %v384_v13 = vadd.f32 %v649_v7, %v47_v2 }
 0x104   :  { %v440_v11 = vadd.f32 %v859_v63, %v417_v9  ;;  %v410_v14 = vld [vmem:[#allocation2 + $0x8] sm:$0xff] }
 0x105   :  { %v418_v15 = vld [vmem:[#allocation2 + $0x48] sm:$0xff]  ;;  %v582_v16 = vpack.c.bf16 %v432_v10, %v432_v10  ;;  %v433_v18 = vadd.f32 %v859_v63, %v410_v14  ;;  %393 = vst.msk [vmem:[#allocation2 + $0x18] sm:$0xff] %vm19_vm0, %v376_v12  ;;  %401 = vst.msk [vmem:[#allocation2 + $0x58] sm:$0xff] %vm19_vm0, %v384_v13  ;;  %v626_v20 = vpop.f32.mrb[8].mxu0  ;;  %v650_v21 = vpop.f32.mrb[8].mxu1 }
 0x106   :  { %v590_v17 = vpack.c.bf16 %v440_v11, %v440_v11  ;;  %v441_v19 = vadd.f32 %v859_v63, %v418_v15  ;;  %v627_v23 = vpop.f32.mrb[9].mxu0  ;;  %v651_v25 = vpop.f32.mrb[9].mxu1 }
 0x107   :  { %513 = vst.msk [vmem:[%s956_s3] sm:$0xf] %vm512_vm1, %v582_v16  ;;  %v583_v26 = vpack.c.bf16 %v433_v18, %v433_v18  ;;  %v628_v28 = vadd.f32 %v627_v23, %v626_v20  ;;  %v652_v29 = vadd.f32 %v651_v25, %v650_v21  ;;  %v629_v30 = vpop.f32.mrb[10].mxu0  ;;  %v653_v31 = vpop.f32.mrb[10].mxu1 }
 0x108   :  { %521 = vst.msk [vmem:[%s956_s3 + $0x20] sm:$0xf] %vm512_vm1, %v590_v17  ;;  %v591_v27 = vpack.c.bf16 %v441_v19, %v441_v19  ;;  %v630_v33 = vpop.f32.mrb[11].mxu0  ;;  %v654_v35 = vpop.f32.mrb[11].mxu1 }
 0x109   :  { %514 = vst.msk [vmem:[%s956_s3 + $0x4] sm:$0xf] %vm512_vm1, %v583_v26  ;;  %v377_v36 = vadd.f32 %v628_v28, %v40_v22  ;;  %v385_v37 = vadd.f32 %v652_v29, %v48_v24  ;;  %v631_v38 = vadd.f32 %v630_v33, %v629_v30  ;;  %v655_v39 = vadd.f32 %v654_v35, %v653_v31 }
 0x10a   :  { %522 = vst.msk [vmem:[%s956_s3 + $0x24] sm:$0xf] %vm512_vm1, %v591_v27  ;;  %v411_v40 = vld [vmem:[#allocation2 + $0x10] sm:$0xff] }
 0x10b   :  { %v419_v41 = vld [vmem:[#allocation2 + $0x50] sm:$0xff]  ;;  %v434_v42 = vadd.f32 %v859_v63, %v411_v40  ;;  %394 = vst.msk [vmem:[#allocation2 + $0x20] sm:$0xff] %vm19_vm0, %v377_v36  ;;  %402 = vst.msk [vmem:[#allocation2 + $0x60] sm:$0xff] %vm19_vm0, %v385_v37  ;;  %v378_v44 = vadd.f32 %v631_v38, %v41_v32  ;;  %v386_v45 = vadd.f32 %v655_v39, %v49_v34 }
 0x10c   :  { %v442_v43 = vadd.f32 %v859_v63, %v419_v41  ;;  %v412_v46 = vld [vmem:[#allocation2 + $0x18] sm:$0xff] }
 0x10d   :  { %v420_v47 = vld [vmem:[#allocation2 + $0x58] sm:$0xff]  ;;  %v584_v48 = vpack.c.bf16 %v434_v42, %v434_v42  ;;  %v435_v50 = vadd.f32 %v859_v63, %v412_v46  ;;  %395 = vst.msk [vmem:[#allocation2 + $0x28] sm:$0xff] %vm19_vm0, %v378_v44  ;;  %403 = vst.msk [vmem:[#allocation2 + $0x68] sm:$0xff] %vm19_vm0, %v386_v45  ;;  %v632_v52 = vpop.f32.mrb[12].mxu0  ;;  %v656_v53 = vpop.f32.mrb[12].mxu1 }
 0x10e   :  { %v592_v49 = vpack.c.bf16 %v442_v43, %v442_v43  ;;  %v443_v51 = vadd.f32 %v859_v63, %v420_v47  ;;  %v633_v55 = vpop.f32.mrb[13].mxu0  ;;  %v657_v57 = vpop.f32.mrb[13].mxu1 }
 0x10f   :  { %515 = vst.msk [vmem:[%s956_s3 + $0x8] sm:$0xf] %vm512_vm1, %v584_v48  ;;  %v585_v58 = vpack.c.bf16 %v435_v50, %v435_v50  ;;  %v634_v60 = vadd.f32 %v633_v55, %v632_v52  ;;  %v658_v61 = vadd.f32 %v657_v57, %v656_v53  ;;  %v635_v62 = vpop.f32.mrb[14].mxu0  ;;  %v659_v0 = vpop.f32.mrb[14].mxu1 }
 0x110   :  { %523 = vst.msk [vmem:[%s956_s3 + $0x28] sm:$0xf] %vm512_vm1, %v592_v49  ;;  %v593_v59 = vpack.c.bf16 %v443_v51, %v443_v51  ;;  %v636_v2 = vpop.f32.mrb[15].mxu0  ;;  %v660_v4 = vpop.f32.mrb[15].mxu1 }
 0x111   :  { %516 = vst.msk [vmem:[%s956_s3 + $0xc] sm:$0xf] %vm512_vm1, %v585_v58  ;;  %v379_v5 = vadd.f32 %v634_v60, %v42_v54  ;;  %v387_v6 = vadd.f32 %v658_v61, %v50_v56  ;;  %v637_v7 = vadd.f32 %v636_v2, %v635_v62  ;;  %v661_v8 = vadd.f32 %v660_v4, %v659_v0 }
 0x112   :  { %524 = vst.msk [vmem:[%s956_s3 + $0x2c] sm:$0xf] %vm512_vm1, %v593_v59  ;;  %v413_v9 = vld [vmem:[#allocation2 + $0x20] sm:$0xff] }
 0x113   :  { %v421_v10 = vld [vmem:[#allocation2 + $0x60] sm:$0xff]  ;;  %v436_v11 = vadd.f32 %v859_v63, %v413_v9  ;;  %396 = vst.msk [vmem:[#allocation2 + $0x30] sm:$0xff] %vm19_vm0, %v379_v5  ;;  %404 = vst.msk [vmem:[#allocation2 + $0x70] sm:$0xff] %vm19_vm0, %v387_v6  ;;  %v380_v13 = vadd.f32 %v637_v7, %v43_v1  ;;  %v388_v14 = vadd.f32 %v661_v8, %v51_v3 }
 0x114   :  { %v444_v12 = vadd.f32 %v859_v63, %v421_v10  ;;  %v414_v15 = vld [vmem:[#allocation2 + $0x28] sm:$0xff] }
 0x115   :  { %v422_v16 = vld [vmem:[#allocation2 + $0x68] sm:$0xff]  ;;  %v586_v17 = vpack.c.bf16 %v436_v11, %v436_v11  ;;  %v437_v19 = vadd.f32 %v859_v63, %v414_v15  ;;  %397 = vst.msk [vmem:[#allocation2 + $0x38] sm:$0xff] %vm19_vm0, %v380_v13  ;;  %405 = vst.msk [vmem:[#allocation2 + $0x78] sm:$0xff] %vm19_vm0, %v388_v14 }
 0x116   :  { %v594_v18 = vpack.c.bf16 %v444_v12, %v444_v12  ;;  %v445_v20 = vadd.f32 %v859_v63, %v422_v16 }
 0x117   :  { %517 = vst.msk [vmem:[%s956_s3 + $0x10] sm:$0xf] %vm512_vm1, %v586_v17  ;;  %v587_v21 = vpack.c.bf16 %v437_v19, %v437_v19 }
 0x118   :  { %525 = vst.msk [vmem:[%s956_s3 + $0x30] sm:$0xf] %vm512_vm1, %v594_v18  ;;  %v595_v22 = vpack.c.bf16 %v445_v20, %v445_v20 }
 0x119   :  { %518 = vst.msk [vmem:[%s956_s3 + $0x14] sm:$0xf] %vm512_vm1, %v587_v21 }
 0x11a   :  { %526 = vst.msk [vmem:[%s956_s3 + $0x34] sm:$0xf] %vm512_vm1, %v595_v22  ;;  %v415_v23 = vld [vmem:[#allocation2 + $0x30] sm:$0xff] }
 0x11b   :  { %v423_v24 = vld [vmem:[#allocation2 + $0x70] sm:$0xff]  ;;  %v438_v25 = vadd.f32 %v859_v63, %v415_v23 }
 0x11c   :  { %v446_v26 = vadd.f32 %v859_v63, %v423_v24  ;;  %v416_v27 = vld [vmem:[#allocation2 + $0x38] sm:$0xff] }
 0x11d   :  { %v424_v28 = vld [vmem:[#allocation2 + $0x78] sm:$0xff]  ;;  %v588_v29 = vpack.c.bf16 %v438_v25, %v438_v25  ;;  %v439_v31 = vadd.f32 %v859_v63, %v416_v27 }
 0x11e   :  { %v596_v30 = vpack.c.bf16 %v446_v26, %v446_v26  ;;  %v447_v32 = vadd.f32 %v859_v63, %v424_v28 }
 0x11f   :  { %519 = vst.msk [vmem:[%s956_s3 + $0x18] sm:$0xf] %vm512_vm1, %v588_v29  ;;  %v589_v33 = vpack.c.bf16 %v439_v31, %v439_v31 }
 0x120   :  { %527 = vst.msk [vmem:[%s956_s3 + $0x38] sm:$0xf] %vm512_vm1, %v596_v30  ;;  %v597_v34 = vpack.c.bf16 %v447_v32, %v447_v32 }
 0x121   :  { %520 = vst.msk [vmem:[%s956_s3 + $0x1c] sm:$0xf] %vm512_vm1, %v589_v33 }
 0x122   :  { %528 = vst.msk [vmem:[%s956_s3 + $0x3c] sm:$0xf] %vm512_vm1, %v597_v34 }

// kernel: deeplabv3p_forward.22
= control target key start
LH: loop header
LB: loop body
LE: loop exit
PB: predicated region body
PF: predicated region fallthrough
CT: control target
= control target key end

     0   :  { %s1552_s12 = smov 0   ;;  %s1554_s13 = smov 0   ;;  %s1776_s0 = inlined_call_operand.vmem [shape: bf16[128,2304], index: 0, kind: input, shape index: {}]   ;;  %s1777_s1 = inlined_call_operand.vmem [shape: bf16[2304,256], index: 1, kind: input, shape index: {}]   ;;  %s1778_s2 = inlined_call_operand.vmem [shape: f32[1,256], index: 2, kind: input, shape index: {}]   ;;  %s1779_s3 = inlined_call_operand.vmem [shape: bf16[128,256], index: 3, kind: output, shape index: {}]  }
   0x1   :  { %s1556_s14 = smov 0   ;;  %s1558_s15 = smov 0  }
   0x2   :  { %s1560_s16 = smov 0  }
   0x3 LB: > { %s25_s17 = sadd.s32 1, %s1525_s15  ;;  %p48_p1 = scmp.ne.s32.totalorder %s1517_s13, %s1513_s12  ;;  %s1529_s16 = sphi %s1560_s16, %s13_s16   ;;  %s1525_s15 = sphi %s1558_s15, %s1783_s15   ;;  %s1521_s14 = sphi %s1556_s14, %s1782_s14   ;;  %s1517_s13 = sphi %s1554_s13, %s1781_s13   ;;  %s1513_s12 = sphi %s1552_s12, %s1780_s12  }
   0x4   : > { %p26_p0 = scmp.ge.s32.totalorder %s25_s17, 9  ;;  %p49_p2 = scmp.eq.s32.totalorder %s1529_s16, 0 }
   0x5   : > { %s41_s19 = sadd.s32 1, %s1517_s13  ;;  %p1249_p5 = scmp.ge.s32.totalorder %s1529_s16, 9 }
   0x6   : > { %s1785_s17 = smov (%p26_p0, %s25_s17), 0  ;;  %p50_p3 = por %p49_p2, %p48_p1 }
   0x7   : > { %s37_s18 = ssub.s32 %s1525_s15, %s1785_s17  ;;  %164 = sbr.rel (%p1249_p5) target bundleno = 26 (0x1a), region = 20 }
   0x8   : > { %p39_p4 = scmp.eq.s32.totalorder %s37_s18, 0 }
   0xa   : > { %s1587_s20 = scalar_select %p39_p4, %s1517_s13, %s41_s19  }
   0xe   : > { %167 = sbr.rel (!%p50_p3) target bundleno = 26 (0x1a), region = 24  ;;  %s169_s21 = sand.u32 (%p50_p3), 1, %s1517_s13  }
   0xf   : > { %s1328_s22 = sshll.u32 (%p50_p3), %s1525_s15, 3  ;;  %s1250_s23 = sshll.u32 (%p50_p3), %s169_s21, 7 }
  0x10   : > { %s1595_s26 = scalar_lea.vmem (%p50_p3), %s1776_s0, %s1328_s22  ;;  %s171_s27 = scalar_lea.vmem (%p50_p3), [#allocation3], %s1250_s23 }
  0x11   : > { %v235_v0 = vld [vmem:[%s1595_s26] sm:$0xff] (%p50_p3)  ;;  %v237_v1 = vld [vmem:[%s1595_s26 + $0x48] sm:$0xff] (%p50_p3)  ;;  %v239_v2 = vld [vmem:[%s1595_s26 + $0x90] sm:$0xff] (%p50_p3) }
  0x12   : > { %236 = vst [vmem:[%s171_s27] sm:$0xff] (%p50_p3), %v235_v0  ;;  %238 = vst [vmem:[%s171_s27 + $0x8] sm:$0xff] (%p50_p3), %v237_v1  ;;  %v241_v3 = vld [vmem:[%s1595_s26 + $0xd8] sm:$0xff] (%p50_p3)  ;;  %v243_v4 = vld [vmem:[%s1595_s26 + $0x120] sm:$0xff] (%p50_p3) }
  0x13   : > { %240 = vst [vmem:[%s171_s27 + $0x10] sm:$0xff] (%p50_p3), %v239_v2  ;;  %v245_v5 = vld [vmem:[%s1595_s26 + $0x168] sm:$0xff] (%p50_p3)  ;;  %242 = vst [vmem:[%s171_s27 + $0x18] sm:$0xff] (%p50_p3), %v241_v3  ;;  %v247_v6 = vld [vmem:[%s1595_s26 + $0x1b0] sm:$0xff] (%p50_p3) }
  0x14   : > { %244 = vst [vmem:[%s171_s27 + $0x20] sm:$0xff] (%p50_p3), %v243_v4  ;;  %246 = vst [vmem:[%s171_s27 + $0x28] sm:$0xff] (%p50_p3), %v245_v5  ;;  %v249_v7 = vld [vmem:[%s1595_s26 + $0x1f8] sm:$0xff] (%p50_p3)  ;;  %v251_v8 = vld [vmem:[%s1595_s26 + $0x240] sm:$0xff] (%p50_p3) }
  0x15   : > { %248 = vst [vmem:[%s171_s27 + $0x30] sm:$0xff] %v247_v6  ;;  %250 = vst [vmem:[%s171_s27 + $0x38] sm:$0xff] %v249_v7  ;;  %v253_v9 = vld [vmem:[%s1595_s26 + $0x288] sm:$0xff]  ;;  %v255_v10 = vld [vmem:[%s1595_s26 + $0x2d0] sm:$0xff] }
  0x16   : > { %252 = vst [vmem:[%s171_s27 + $0x40] sm:$0xff] %v251_v8  ;;  %v257_v11 = vld [vmem:[%s1595_s26 + $0x318] sm:$0xff]  ;;  %254 = vst [vmem:[%s171_s27 + $0x48] sm:$0xff] %v253_v9  ;;  %v259_v12 = vld [vmem:[%s1595_s26 + $0x360] sm:$0xff] }
  0x17   : > { %256 = vst [vmem:[%s171_s27 + $0x50] sm:$0xff] %v255_v10  ;;  %258 = vst [vmem:[%s171_s27 + $0x58] sm:$0xff] %v257_v11  ;;  %v261_v13 = vld [vmem:[%s1595_s26 + $0x3a8] sm:$0xff]  ;;  %v263_v14 = vld [vmem:[%s1595_s26 + $0x3f0] sm:$0xff] }
  0x18   : > { %260 = vst [vmem:[%s171_s27 + $0x60] sm:$0xff] %v259_v12  ;;  %262 = vst [vmem:[%s171_s27 + $0x68] sm:$0xff] %v261_v13  ;;  %v265_v15 = vld [vmem:[%s1595_s26 + $0x438] sm:$0xff] }
  0x19   : > { %264 = vst [vmem:[%s171_s27 + $0x70] sm:$0xff] %v263_v14  ;;  %266 = vst [vmem:[%s171_s27 + $0x78] sm:$0xff] %v265_v15 }
  0x1a PF: > { %p1253_p6 = scmp.ge.s32.totalorder %s1529_s16, 1  ;;  %p286_p7 = scmp.lt.s32.totalorder %s1529_s16, 10 }
  0x1c   : > { %p287_p8 = pnand %p1253_p6, %p286_p7 }
  0x1d   : > { %s293_s28 = sand.u32 (!%p287_p8), 1, %s1513_s12   ;;  %s1255_s29 = sshll.u32 (!%p287_p8), %s1521_s14, 5 }
  0x1e   : > { %290 = sbr.rel (%p287_p8) target bundleno = 378 (0x17a), region = 66  ;;  %s1254_s30 = sshll.u32 (!%p287_p8), %s293_s28, 7 }
  0x1f   : > { %p339_p9 = scmp.lt.s32.totalorder (!%p287_p8), %s1255_s29, 287  ;;  %s1622_s8 = scalar_lea.vmem (!%p287_p8), [#allocation3], %s1254_s30 }
  0x20   : > { %p1258_p10 = scmp.ne.s32.totalorder (!%p287_p8), %s1521_s14, 0 }
  0x25   : > { %s1787_s29 = smov (!%p339_p9, %s1255_s29), 287  ;;  %369 = sbr.rel (%p1258_p10) target bundleno = 55 (0x37), region = 74 }
  0x26   : > { %s1329_s4 = sshll.u32 %s1787_s29, 3  ;;  %v1531_v16 = vmov (!%p1258_p10), 0.0  }
  0x27   : > { %s1620_s7 = scalar_lea.vmem %s1777_s1, %s1329_s4  ;;  %370 = vst [vmem:[#allocation2] sm:$0xff] (!%p1258_p10), %v1531_v16  ;;  %371 = vst [vmem:[#allocation2 + $0x8] sm:$0xff] (!%p1258_p10), %v1531_v16 }
  0x28   : > { %372 = vst [vmem:[#allocation2 + $0x10] sm:$0xff] (!%p1258_p10), %v1531_v16  ;;  %373 = vst [vmem:[#allocation2 + $0x18] sm:$0xff] (!%p1258_p10), %v1531_v16 }
  0x29   : > { %374 = vst [vmem:[#allocation2 + $0x20] sm:$0xff] (!%p1258_p10), %v1531_v16  ;;  %375 = vst [vmem:[#allocation2 + $0x28] sm:$0xff] (!%p1258_p10), %v1531_v16 }
  0x2a   : > { %376 = vst [vmem:[#allocation2 + $0x30] sm:$0xff] (!%p1258_p10), %v1531_v16  ;;  %377 = vst [vmem:[#allocation2 + $0x38] sm:$0xff] (!%p1258_p10), %v1531_v16 }
  0x2b   : > { %378 = vst [vmem:[#allocation2 + $0x40] sm:$0xff] (!%p1258_p10), %v1531_v16  ;;  %379 = vst [vmem:[#allocation2 + $0x48] sm:$0xff] (!%p1258_p10), %v1531_v16 }
  0x2c   : > { %380 = vst [vmem:[#allocation2 + $0x50] sm:$0xff] %v1531_v16  ;;  %381 = vst [vmem:[#allocation2 + $0x58] sm:$0xff] %v1531_v16 }
  0x2d   : > { %382 = vst [vmem:[#allocation2 + $0x60] sm:$0xff] %v1531_v16  ;;  %383 = vst [vmem:[#allocation2 + $0x68] sm:$0xff] %v1531_v16 }
  0x2e   : > { %384 = vst [vmem:[#allocation2 + $0x70] sm:$0xff] %v1531_v16  ;;  %385 = vst [vmem:[#allocation2 + $0x78] sm:$0xff] %v1531_v16 }
  0x2f   : > { %386 = vst [vmem:[#allocation2 + $0x80] sm:$0xff] %v1531_v16  ;;  %387 = vst [vmem:[#allocation2 + $0x88] sm:$0xff] %v1531_v16 }
  0x30   : > { %388 = vst [vmem:[#allocation2 + $0x90] sm:$0xff] %v1531_v16  ;;  %389 = vst [vmem:[#allocation2 + $0x98] sm:$0xff] %v1531_v16 }
  0x31   : > { %390 = vst [vmem:[#allocation2 + $0xa0] sm:$0xff] %v1531_v16  ;;  %391 = vst [vmem:[#allocation2 + $0xa8] sm:$0xff] %v1531_v16 }
  0x32   : > { %392 = vst [vmem:[#allocation2 + $0xb0] sm:$0xff] %v1531_v16  ;;  %393 = vst [vmem:[#allocation2 + $0xb8] sm:$0xff] %v1531_v16 }
  0x33   : > { %394 = vst [vmem:[#allocation2 + $0xc0] sm:$0xff] %v1531_v16  ;;  %395 = vst [vmem:[#allocation2 + $0xc8] sm:$0xff] %v1531_v16 }
  0x34   : > { %396 = vst [vmem:[#allocation2 + $0xd0] sm:$0xff] %v1531_v16  ;;  %397 = vst [vmem:[#allocation2 + $0xd8] sm:$0xff] %v1531_v16 }
  0x35   : > { %398 = vst [vmem:[#allocation2 + $0xe0] sm:$0xff] %v1531_v16  ;;  %399 = vst [vmem:[#allocation2 + $0xe8] sm:$0xff] %v1531_v16 }
  0x36   : > { %400 = vst [vmem:[#allocation2 + $0xf0] sm:$0xff] %v1531_v16  ;;  %401 = vst [vmem:[#allocation2 + $0xf8] sm:$0xff] %v1531_v16 }
  0x37 PF: > { %v1419_v17 = vld [vmem:[%s1620_s7 + $0x4] ss:$8 sps:$4 sm:$0xff]   ;;  %v1421_v18 = vld [vmem:[%s1620_s7] ss:$8 sps:$4 sm:$0xff]   ;;  %v1422_v19 = vld [vmem:[%s1620_s7 + $0x14] ss:$8 sps:$4 sm:$0xff]  }
  0x38   : > { %722 = vmatprep.subr.bf16.mxu0 %v1419_v17  ;;  %1346 = vmatprep.subr.bf16.mxu1 %v1419_v17  ;;  %v1424_v20 = vld [vmem:[%s1620_s7 + $0x10] ss:$8 sps:$4 sm:$0xff]   ;;  %v1425_v21 = vld [vmem:[%s1620_s7 + $0x24] ss:$8 sps:$4 sm:$0xff]   ;;  %v1427_v22 = vld [vmem:[%s1620_s7 + $0x20] ss:$8 sps:$4 sm:$0xff]  }
  0x39   : > { %723 = vmatpush1.bf16.msra.mxu0 %v1421_v18  ;;  %1362 = vmatpush1.bf16.msra.mxu1 %v1421_v18  ;;  %v1428_v23 = vld [vmem:[%s1620_s7 + $0x34] ss:$8 sps:$4 sm:$0xff]   ;;  %v1430_v24 = vld [vmem:[%s1620_s7 + $0x30] ss:$8 sps:$4 sm:$0xff]   ;;  %v1431_v25 = vld [vmem:[%s1620_s7 + $0x44] ss:$8 sps:$4 sm:$0xff]  }
  0x3a   : > { %724 = vmatprep.subr.bf16.mxu0 %v1422_v19  ;;  %1347 = vmatprep.subr.bf16.mxu1 %v1422_v19  ;;  %v1433_v26 = vld [vmem:[%s1620_s7 + $0x40] ss:$8 sps:$4 sm:$0xff]   ;;  %v1434_v27 = vld [vmem:[%s1620_s7 + $0x54] ss:$8 sps:$4 sm:$0xff]   ;;  %v1436_v28 = vld [vmem:[%s1620_s7 + $0x50] ss:$8 sps:$4 sm:$0xff]  }
  0x3b   : > { %v1437_v29 = vld [vmem:[%s1620_s7 + $0x64] ss:$8 sps:$4 sm:$0xff]   ;;  %v1439_v31 = vld [vmem:[%s1620_s7 + $0x60] ss:$8 sps:$4 sm:$0xff]   ;;  %v1440_v33 = vld [vmem:[%s1620_s7 + $0x74] ss:$8 sps:$4 sm:$0xff]  }
  0x3c   : > { %v1469_v30 = vld [vmem:[%s1622_s8 + $0x4] ss:$8 sps:$4 sm:$0xff]   ;;  %v1442_v34 = vld [vmem:[%s1620_s7 + $0x70] ss:$8 sps:$4 sm:$0xff]   ;;  %v1445_v36 = vld [vmem:[%s1620_s7 + $0x80] ss:$8 sps:$4 sm:$0xff]  }
  0x3d   : > { %725 = vmatpush1.bf16.msra.mxu0 %v1424_v20  ;;  %1363 = vmatpush1.bf16.msra.mxu1 %v1424_v20  ;;  %v1472_v32 = vld [vmem:[%s1622_s8 + $0x44] ss:$8 sps:$4 sm:$0xff]   ;;  %v1446_v37 = vld [vmem:[%s1620_s7 + $0x94] ss:$8 sps:$4 sm:$0xff]   ;;  %v1448_v38 = vld [vmem:[%s1620_s7 + $0x90] ss:$8 sps:$4 sm:$0xff]  }
  0x3e   : > { %726 = vmatprep.subr.bf16.mxu0 %v1425_v21  ;;  %1348 = vmatprep.subr.bf16.mxu1 %v1425_v21  ;;  %v1443_v35 = vld [vmem:[%s1620_s7 + $0x84] ss:$8 sps:$4 sm:$0xff]   ;;  %v1451_v40 = vld [vmem:[%s1620_s7 + $0xa0] ss:$8 sps:$4 sm:$0xff]   ;;  %v1452_v41 = vld [vmem:[%s1620_s7 + $0xb4] ss:$8 sps:$4 sm:$0xff]  }
  0x3f   : > { %754 = vmatprep.mubr.bf16.mxu0 %v1469_v30  ;;  %794 = vmatprep.mubr.bf16.mxu1 %v1472_v32  ;;  %v1449_v39 = vld [vmem:[%s1620_s7 + $0xa4] ss:$8 sps:$4 sm:$0xff]   ;;  %v1454_v42 = vld [vmem:[%s1620_s7 + $0xb0] ss:$8 sps:$4 sm:$0xff]   ;;  %v1457_v44 = vld [vmem:[%s1620_s7 + $0xc0] ss:$8 sps:$4 sm:$0xff]  }
  0x40   : > { %v1455_v43 = vld [vmem:[%s1620_s7 + $0xc4] ss:$8 sps:$4 sm:$0xff]   ;;  %v1458_v45 = vld [vmem:[%s1620_s7 + $0xd4] ss:$8 sps:$4 sm:$0xff]   ;;  %v1460_v46 = vld [vmem:[%s1620_s7 + $0xd0] ss:$8 sps:$4 sm:$0xff]  }
  0x41   : > { %727 = vmatpush1.bf16.msra.mxu0 %v1427_v22  ;;  %1364 = vmatpush1.bf16.msra.mxu1 %v1427_v22  ;;  %v1461_v47 = vld [vmem:[%s1620_s7 + $0xe4] ss:$8 sps:$4 sm:$0xff]   ;;  %v1463_v48 = vld [vmem:[%s1620_s7 + $0xe0] ss:$8 sps:$4 sm:$0xff]   ;;  %v1464_v49 = vld [vmem:[%s1620_s7 + $0xf4] ss:$8 sps:$4 sm:$0xff]  }
  0x42   : > { %728 = vmatprep.subr.bf16.mxu0 %v1428_v23  ;;  %1349 = vmatprep.subr.bf16.mxu1 %v1428_v23  ;;  %v1466_v50 = vld [vmem:[%s1620_s7 + $0xf0] ss:$8 sps:$4 sm:$0xff]   ;;  %v1467_v51 = vld [vmem:[%s1622_s8] ss:$8 sps:$4 sm:$0xff]   ;;  %v1473_v53 = vld [vmem:[%s1622_s8 + $0x14] ss:$8 sps:$4 sm:$0xff]  }
  0x43   : > { %v1470_v52 = vld [vmem:[%s1622_s8 + $0x40] ss:$8 sps:$4 sm:$0xff]   ;;  %v1475_v54 = vld [vmem:[%s1622_s8 + $0x54] ss:$8 sps:$4 sm:$0xff]   ;;  %v1477_v55 = vld [vmem:[%s1622_s8 + $0x10] ss:$8 sps:$4 sm:$0xff]  }
  0x44   : > { %v1478_v56 = vld [vmem:[%s1622_s8 + $0x50] ss:$8 sps:$4 sm:$0xff]   ;;  %v1479_v57 = vld [vmem:[%s1622_s8 + $0x24] ss:$8 sps:$4 sm:$0xff]   ;;  %v1483_v59 = vld [vmem:[%s1622_s8 + $0x20] ss:$8 sps:$4 sm:$0xff]  }
  0x45   : > { %729 = vmatpush1.bf16.msra.mxu0 %v1430_v24  ;;  %1365 = vmatpush1.bf16.msra.mxu1 %v1430_v24  ;;  %v1481_v58 = vld [vmem:[%s1622_s8 + $0x64] ss:$8 sps:$4 sm:$0xff]   ;;  %v1484_v60 = vld [vmem:[%s1622_s8 + $0x60] ss:$8 sps:$4 sm:$0xff]   ;;  %v1485_v61 = vld [vmem:[%s1622_s8 + $0x34] ss:$8 sps:$4 sm:$0xff]  }
  0x46   : > { %730 = vmatprep.subr.bf16.mxu0 %v1431_v25  ;;  %1350 = vmatprep.subr.bf16.mxu1 %v1431_v25  ;;  %v1487_v62 = vld [vmem:[%s1622_s8 + $0x74] ss:$8 sps:$4 sm:$0xff]   ;;  %v1489_v63 = vld [vmem:[%s1622_s8 + $0x30] ss:$8 sps:$4 sm:$0xff]   ;;  %v402_v1 = vld [vmem:[#allocation2] sm:$0xff]  ;;  %p1307_p11 = scmp.ne.s32.totalorder %s1521_s14, 8 }
  0x47   : > { %v1490_v0 = vld [vmem:[%s1622_s8 + $0x70] ss:$8 sps:$4 sm:$0xff]   ;;  %v418_v2 = vld [vmem:[#allocation2 + $0x80] sm:$0xff]  ;;  %v403_v3 = vld [vmem:[#allocation2 + $0x8] sm:$0xff] }
  0x48   : > { %v419_v4 = vld [vmem:[#allocation2 + $0x88] sm:$0xff]  ;;  %v404_v7 = vld [vmem:[#allocation2 + $0x10] sm:$0xff]  ;;  %v405_v13 = vld [vmem:[#allocation2 + $0x18] sm:$0xff] }
  0x49   : > { %731 = vmatpush1.bf16.msra.mxu0 %v1433_v26  ;;  %1366 = vmatpush1.bf16.msra.mxu1 %v1433_v26  ;;  %v420_v8 = vld [vmem:[#allocation2 + $0x90] sm:$0xff]  ;;  %v421_v14 = vld [vmem:[#allocation2 + $0x98] sm:$0xff]  ;;  %v406_v25 = vld [vmem:[#allocation2 + $0x20] sm:$0xff] }
  0x4a   : > { %732 = vmatprep.subr.bf16.mxu0 %v1434_v27  ;;  %1351 = vmatprep.subr.bf16.mxu1 %v1434_v27  ;;  %v422_v26 = vld [vmem:[#allocation2 + $0xa0] sm:$0xff]  ;;  %v407_v27 = vld [vmem:[#allocation2 + $0x28] sm:$0xff]  ;;  %v424_v32 = vld [vmem:[#allocation2 + $0xb0] sm:$0xff] }
  0x4d   : > { %733 = vmatpush1.bf16.msra.mxu0 %v1436_v28  ;;  %1367 = vmatpush1.bf16.msra.mxu1 %v1436_v28  ;;  %v423_v28 = vld [vmem:[#allocation2 + $0xa8] sm:$0xff] }
  0x4e   : > { %734 = vmatprep.subr.bf16.mxu0 %v1437_v29  ;;  %1352 = vmatprep.subr.bf16.mxu1 %v1437_v29 }
  0x51   : > { %735 = vmatpush1.bf16.msra.mxu0 %v1439_v31  ;;  %1368 = vmatpush1.bf16.msra.mxu1 %v1439_v31  ;;  %v408_v31 = vld [vmem:[#allocation2 + $0x30] sm:$0xff] }
  0x52   : > { %736 = vmatprep.subr.bf16.mxu0 %v1440_v33  ;;  %1353 = vmatprep.subr.bf16.mxu1 %v1440_v33 }
  0x55   : > { %737 = vmatpush1.bf16.msra.mxu0 %v1442_v34  ;;  %1369 = vmatpush1.bf16.msra.mxu1 %v1442_v34 }
  0x56   : > { %738 = vmatprep.subr.bf16.mxu0 %v1443_v35  ;;  %1354 = vmatprep.subr.bf16.mxu1 %v1443_v35 }
  0x59   : > { %739 = vmatpush1.bf16.msra.mxu0 %v1445_v36  ;;  %1370 = vmatpush1.bf16.msra.mxu1 %v1445_v36 }
  0x5a   : > { %740 = vmatprep.subr.bf16.mxu0 %v1446_v37  ;;  %1355 = vmatprep.subr.bf16.mxu1 %v1446_v37  ;;  %v409_v37 = vld [vmem:[#allocation2 + $0x38] sm:$0xff] }
  0x5d   : > { %741 = vmatpush1.bf16.msra.mxu0 %v1448_v38  ;;  %1371 = vmatpush1.bf16.msra.mxu1 %v1448_v38  ;;  %v425_v38 = vld [vmem:[#allocation2 + $0xb8] sm:$0xff] }
  0x5e   : > { %742 = vmatprep.subr.bf16.mxu0 %v1449_v39  ;;  %1356 = vmatprep.subr.bf16.mxu1 %v1449_v39 }
  0x61   : > { %743 = vmatpush1.bf16.msra.mxu0 %v1451_v40  ;;  %1372 = vmatpush1.bf16.msra.mxu1 %v1451_v40 }
  0x62   : > { %744 = vmatprep.subr.bf16.mxu0 %v1452_v41  ;;  %1357 = vmatprep.subr.bf16.mxu1 %v1452_v41 }
  0x65   : > { %745 = vmatpush1.bf16.msra.mxu0 %v1454_v42  ;;  %1373 = vmatpush1.bf16.msra.mxu1 %v1454_v42 }
  0x66   : > { %746 = vmatprep.subr.bf16.mxu0 %v1455_v43  ;;  %1358 = vmatprep.subr.bf16.mxu1 %v1455_v43 }
  0x69   : > { %747 = vmatpush1.bf16.msra.mxu0 %v1457_v44  ;;  %1374 = vmatpush1.bf16.msra.mxu1 %v1457_v44 }
  0x6a   : > { %748 = vmatprep.subr.bf16.mxu0 %v1458_v45  ;;  %1359 = vmatprep.subr.bf16.mxu1 %v1458_v45 }
  0x6d   : > { %749 = vmatpush1.bf16.msra.mxu0 %v1460_v46  ;;  %1375 = vmatpush1.bf16.msra.mxu1 %v1460_v46 }
  0x6e   : > { %750 = vmatprep.subr.bf16.mxu0 %v1461_v47  ;;  %1360 = vmatprep.subr.bf16.mxu1 %v1461_v47 }
  0x71   : > { %751 = vmatpush1.bf16.msra.mxu0 %v1463_v48  ;;  %1376 = vmatpush1.bf16.msra.mxu1 %v1463_v48 }
  0x72   : > { %752 = vmatprep.subr.bf16.mxu0 %v1464_v49  ;;  %1361 = vmatprep.subr.bf16.mxu1 %v1464_v49  ;;  %v410_v49 = vld [vmem:[#allocation2 + $0x40] sm:$0xff] }
  0x75   : > { %753 = vmatpush1.bf16.msra.mxu0 %v1466_v50  ;;  %1377 = vmatpush1.bf16.msra.mxu1 %v1466_v50  ;;  %v426_v50 = vld [vmem:[#allocation2 + $0xc0] sm:$0xff] }
  0x78   : > { %755 = vmatmul.mubr.bf16.vlgmr.msra.gmra.mrb[0].mxu0 %v1467_v51  ;;  %795 = vmatmul.mubr.bf16.vlgmr.msra.gmra.mrb[0].mxu1 %v1470_v52  ;;  %v411_v51 = vld [vmem:[#allocation2 + $0x48] sm:$0xff] }
  0x79   : > { %764 = vmatprep.mubr.bf16.mxu0 %v1473_v53  ;;  %804 = vmatprep.mubr.bf16.mxu1 %v1475_v54  ;;  %v427_v52 = vld [vmem:[#allocation2 + $0xc8] sm:$0xff] }
  0x80   : > { %765 = vmatmul.mubr.bf16.gmra.mrb[4].mxu0 %v1477_v55  ;;  %805 = vmatmul.mubr.bf16.gmra.mrb[4].mxu1 %v1478_v56  ;;  %v412_v55 = vld [vmem:[#allocation2 + $0x50] sm:$0xff] }
  0x81   : > { %774 = vmatprep.mubr.bf16.mxu0 %v1479_v57  ;;  %814 = vmatprep.mubr.bf16.mxu1 %v1481_v58  ;;  %v428_v56 = vld [vmem:[#allocation2 + $0xd0] sm:$0xff] }
  0x88   : > { %775 = vmatmul.mubr.bf16.gmra.mrb[8].mxu0 %v1483_v59  ;;  %815 = vmatmul.mubr.bf16.gmra.mrb[8].mxu1 %v1484_v60 }
  0x89   : > { %784 = vmatprep.mubr.bf16.mxu0 %v1485_v61  ;;  %824 = vmatprep.mubr.bf16.mxu1 %v1487_v62  ;;  %v413_v61 = vld [vmem:[#allocation2 + $0x58] sm:$0xff] }
  0x8a   : > { %v429_v62 = vld [vmem:[#allocation2 + $0xd8] sm:$0xff] }
  0x90   : > { %785 = vmatmul.mubr.bf16.gmra.mrb[12].mxu0 %v1489_v63  ;;  %825 = vmatmul.mubr.bf16.gmra.mrb[12].mxu1 %v1490_v0 }
 0x14b   : > { %v756_v5 = vpop.f32.mrb[0].mxu0  ;;  %v796_v6 = vpop.f32.mrb[0].mxu1 }
 0x14c   : > { %v835_v9 = vadd.f32 %v756_v5, %v402_v1  ;;  %v851_v10 = vadd.f32 %v796_v6, %v418_v2  ;;  %v758_v11 = vpop.f32.mrb[1].mxu0  ;;  %v798_v12 = vpop.f32.mrb[1].mxu1 }
 0x14d   : > { %v836_v15 = vadd.f32 %v758_v11, %v403_v3  ;;  %v852_v16 = vadd.f32 %v798_v12, %v419_v4  ;;  %v760_v17 = vpop.f32.mrb[2].mxu0  ;;  %v800_v18 = vpop.f32.mrb[2].mxu1  ;;  %v415_v11 = vld [vmem:[#allocation2 + $0x68] sm:$0xff] }
 0x14e   : > { %867 = vst [vmem:[#allocation2] sm:$0xff] %v835_v9  ;;  %883 = vst [vmem:[#allocation2 + $0x80] sm:$0xff] %v851_v10  ;;  %v837_v19 = vadd.f32 %v760_v17, %v404_v7  ;;  %v853_v20 = vadd.f32 %v800_v18, %v420_v8  ;;  %v762_v21 = vpop.f32.mrb[3].mxu0  ;;  %v802_v22 = vpop.f32.mrb[3].mxu1  ;;  %v414_v9 = vld [vmem:[#allocation2 + $0x60] sm:$0xff]  ;;  %v431_v12 = vld [vmem:[#allocation2 + $0xe8] sm:$0xff] }
 0x14f   : > { %868 = vst [vmem:[#allocation2 + $0x8] sm:$0xff] %v836_v15  ;;  %884 = vst [vmem:[#allocation2 + $0x88] sm:$0xff] %v852_v16  ;;  %v838_v23 = vadd.f32 %v762_v21, %v405_v13  ;;  %v854_v24 = vadd.f32 %v802_v22, %v421_v14  ;;  %v430_v10 = vld [vmem:[#allocation2 + $0xe0] sm:$0xff]  ;;  %v416_v15 = vld [vmem:[#allocation2 + $0x70] sm:$0xff] }
 0x150   : > { %869 = vst [vmem:[#allocation2 + $0x10] sm:$0xff] %v837_v19  ;;  %885 = vst [vmem:[#allocation2 + $0x90] sm:$0xff] %v853_v20  ;;  %v432_v16 = vld [vmem:[#allocation2 + $0xf0] sm:$0xff]  ;;  %v417_v21 = vld [vmem:[#allocation2 + $0x78] sm:$0xff] }
 0x151   : > { %870 = vst [vmem:[#allocation2 + $0x18] sm:$0xff] %v838_v23  ;;  %886 = vst [vmem:[#allocation2 + $0x98] sm:$0xff] %v854_v24  ;;  %v433_v22 = vld [vmem:[#allocation2 + $0xf8] sm:$0xff] }
 0x153   : > { %v766_v29 = vpop.f32.mrb[4].mxu0  ;;  %v806_v30 = vpop.f32.mrb[4].mxu1 }
 0x154   : > { %v839_v33 = vadd.f32 %v766_v29, %v406_v25  ;;  %v855_v34 = vadd.f32 %v806_v30, %v422_v26  ;;  %v768_v35 = vpop.f32.mrb[5].mxu0  ;;  %v808_v36 = vpop.f32.mrb[5].mxu1 }
 0x155   : > { %v840_v39 = vadd.f32 %v768_v35, %v407_v27  ;;  %v856_v40 = vadd.f32 %v808_v36, %v423_v28  ;;  %v770_v41 = vpop.f32.mrb[6].mxu0  ;;  %v810_v42 = vpop.f32.mrb[6].mxu1  ;;  %v935_v35 = vld [vmem:[%s1778_s2] sm:$0x3] (!%p1307_p11) }
 0x156   : > { %871 = vst [vmem:[#allocation2 + $0x20] sm:$0xff] %v839_v33  ;;  %887 = vst [vmem:[#allocation2 + $0xa0] sm:$0xff] %v855_v34  ;;  %v841_v43 = vadd.f32 %v770_v41, %v408_v31  ;;  %v857_v44 = vadd.f32 %v810_v42, %v424_v32  ;;  %v772_v45 = vpop.f32.mrb[7].mxu0  ;;  %v812_v46 = vpop.f32.mrb[7].mxu1  ;;  %v937_v33 = vlaneseq (!%p1307_p11)  ;;  %v903_v36 = vld [vmem:[#allocation2] sm:$0xff] (!%p1307_p11) }
 0x157   : > { %872 = vst [vmem:[#allocation2 + $0x28] sm:$0xff] %v840_v39  ;;  %888 = vst [vmem:[#allocation2 + $0xa8] sm:$0xff] %v856_v40  ;;  %v842_v47 = vadd.f32 %v772_v45, %v409_v37  ;;  %v858_v48 = vadd.f32 %v812_v46, %v425_v38  ;;  %v904_v37 = vld [vmem:[#allocation2 + $0x8] sm:$0xff] (!%p1307_p11)  ;;  %v905_v40 = vld [vmem:[#allocation2 + $0x10] sm:$0xff] (!%p1307_p11) }
 0x158   : > { %873 = vst [vmem:[#allocation2 + $0x30] sm:$0xff] %v841_v43  ;;  %889 = vst [vmem:[#allocation2 + $0xb0] sm:$0xff] %v857_v44  ;;  %v938_v34 = vshrl.u32 (!%p1307_p11), %v937_v33, 7  ;;  %v906_v41 = vld [vmem:[#allocation2 + $0x18] sm:$0xff] (!%p1307_p11) }
 0x159   : > { %874 = vst [vmem:[#allocation2 + $0x38] sm:$0xff] %v842_v47  ;;  %890 = vst [vmem:[#allocation2 + $0xb8] sm:$0xff] %v858_v48 }
 0x15a   : > { %v939_v38 = vsub.s32 (!%p1307_p11), 0, %v938_v34  ;;  %v943_v39 = vsub.s32 (!%p1307_p11), 1, %v938_v34 }
 0x15b   : > { %v776_v53 = vpop.f32.mrb[8].mxu0  ;;  %v816_v54 = vpop.f32.mrb[8].mxu1 }
 0x15c   : > { %v843_v57 = vadd.f32 %v776_v53, %v410_v49  ;;  %v859_v58 = vadd.f32 %v816_v54, %v426_v50  ;;  %v778_v59 = vpop.f32.mrb[9].mxu0  ;;  %v818_v60 = vpop.f32.mrb[9].mxu1  ;;  %v1677_v43 = vrot.slane (!%p1307_p11), %v935_v35, %v939_v38  ;;  %v1679_v44 = vrot.slane (!%p1307_p11), %v935_v35, %v943_v39 }
 0x15d   : > { %v844_v63 = vadd.f32 %v778_v59, %v411_v51  ;;  %v860_v0 = vadd.f32 %v818_v60, %v427_v52  ;;  %v780_v1 = vpop.f32.mrb[10].mxu0  ;;  %v820_v2 = vpop.f32.mrb[10].mxu1  ;;  %v907_v42 = vld [vmem:[#allocation2 + $0x20] sm:$0xff] (!%p1307_p11) }
 0x15e   : > { %875 = vst [vmem:[#allocation2 + $0x40] sm:$0xff] %v843_v57  ;;  %891 = vst [vmem:[#allocation2 + $0xc0] sm:$0xff] %v859_v58  ;;  %v845_v3 = vadd.f32 %v780_v1, %v412_v55  ;;  %v861_v4 = vadd.f32 %v820_v2, %v428_v56  ;;  %v782_v5 = vpop.f32.mrb[11].mxu0  ;;  %v822_v6 = vpop.f32.mrb[11].mxu1  ;;  %v908_v45 = vld [vmem:[#allocation2 + $0x28] sm:$0xff] (!%p1307_p11)  ;;  %v947_v48 = vadd.f32 (!%p1307_p11), %v1677_v43, %v903_v36 }
 0x15f   : > { %876 = vst [vmem:[#allocation2 + $0x48] sm:$0xff] %v844_v63  ;;  %892 = vst [vmem:[#allocation2 + $0xc8] sm:$0xff] %v860_v0  ;;  %v846_v7 = vadd.f32 %v782_v5, %v413_v61  ;;  %v862_v8 = vadd.f32 %v822_v6, %v429_v62  ;;  %v909_v46 = vld [vmem:[#allocation2 + $0x30] sm:$0xff] (!%p1307_p11)  ;;  %v948_v49 = vadd.f32 (!%p1307_p11), %v1679_v44, %v904_v37  ;;  %v924_v33 = vld [vmem:[#allocation2 + $0xa8] sm:$0xff] (!%p1307_p11) }
 0x160   : > { %877 = vst [vmem:[#allocation2 + $0x50] sm:$0xff] %v845_v3  ;;  %893 = vst [vmem:[#allocation2 + $0xd0] sm:$0xff] %v861_v4  ;;  %v910_v47 = vld [vmem:[#allocation2 + $0x38] sm:$0xff] (!%p1307_p11)  ;;  %v949_v50 = vadd.f32 (!%p1307_p11), %v1677_v43, %v905_v40  ;;  %v950_v51 = vadd.f32 (!%p1307_p11), %v1679_v44, %v906_v41  ;;  %v951_v52 = vadd.f32 (!%p1307_p11), %v1677_v43, %v907_v42  ;;  %v979_v58 = vmax.f32 (!%p1307_p11), %v947_v48, 0.0  ;;  %v925_v38 = vld [vmem:[#allocation2 + $0xb0] sm:$0xff] (!%p1307_p11) }
 0x161   : > { %878 = vst [vmem:[#allocation2 + $0x58] sm:$0xff] %v846_v7  ;;  %894 = vst [vmem:[#allocation2 + $0xd8] sm:$0xff] %v862_v8  ;;  %v952_v53 = vadd.f32 (!%p1307_p11), %v1679_v44, %v908_v45  ;;  %v953_v54 = vadd.f32 (!%p1307_p11), %v1677_v43, %v909_v46  ;;  %v954_v55 = vadd.f32 (!%p1307_p11), %v1679_v44, %v910_v47  ;;  %v980_v59 = vmax.f32 (!%p1307_p11), %v948_v49, 0.0  ;;  %v926_v39 = vld [vmem:[#allocation2 + $0xb8] sm:$0xff] (!%p1307_p11) }
 0x162   : > { %v981_v60 = vmax.f32 (!%p1307_p11), %v949_v50, 0.0  ;;  %v982_v61 = vmax.f32 (!%p1307_p11), %v950_v51, 0.0  ;;  %v983_v0 = vmax.f32 (!%p1307_p11), %v951_v52, 0.0  ;;  %v968_v50 = vadd.f32 (!%p1307_p11), %v1679_v44, %v924_v33 }
 0x163   : > { %v786_v13 = vpop.f32.mrb[12].mxu0  ;;  %v826_v14 = vpop.f32.mrb[12].mxu1  ;;  %902 = sbr.rel (%p1307_p11) target bundleno = 378 (0x17a), region = 78  ;;  %v984_v1 = vmax.f32 (!%p1307_p11), %v952_v53, 0.0  ;;  %v985_v2 = vmax.f32 (!%p1307_p11), %v953_v54, 0.0  ;;  %v986_v3 = vmax.f32 (!%p1307_p11), %v954_v55, 0.0  ;;  %v1330_v6 = vpack.c.bf16 (!%p1307_p11), %v980_v59, %v979_v58 }
 0x164   : > { %v847_v17 = vadd.f32 %v786_v13, %v414_v9  ;;  %v863_v18 = vadd.f32 %v826_v14, %v430_v10  ;;  %v788_v19 = vpop.f32.mrb[13].mxu0  ;;  %v828_v20 = vpop.f32.mrb[13].mxu1  ;;  %v1331_v7 = vpack.c.bf16 (!%p1307_p11), %v982_v61, %v981_v60  ;;  %v969_v54 = vadd.f32 (!%p1307_p11), %v1677_v43, %v925_v38 }
 0x165   : > { %v848_v23 = vadd.f32 %v788_v19, %v415_v11  ;;  %v864_v24 = vadd.f32 %v828_v20, %v431_v12  ;;  %v790_v25 = vpop.f32.mrb[14].mxu0  ;;  %v830_v26 = vpop.f32.mrb[14].mxu1  ;;  %v911_v56 = vld [vmem:[#allocation2 + $0x40] sm:$0xff] (!%p1307_p11)  ;;  %v1332_v12 = vpack.c.bf16 (!%p1307_p11), %v984_v1, %v983_v0  ;;  %v1333_v13 = vpack.c.bf16 (!%p1307_p11), %v986_v3, %v985_v2  ;;  %1107 = vst [vmem:[%s1779_s3] sm:$0xff] (!%p1307_p11), %v1330_v6 }
 0x166   : > { %879 = vst [vmem:[#allocation2 + $0x60] sm:$0xff] %v847_v17  ;;  %895 = vst [vmem:[#allocation2 + $0xe0] sm:$0xff] %v863_v18  ;;  %v849_v27 = vadd.f32 %v790_v25, %v416_v15  ;;  %v865_v28 = vadd.f32 %v830_v26, %v432_v16  ;;  %v792_v29 = vpop.f32.mrb[15].mxu0  ;;  %v832_v30 = vpop.f32.mrb[15].mxu1  ;;  %v912_v57 = vld [vmem:[#allocation2 + $0x48] sm:$0xff] (!%p1307_p11)  ;;  %v955_v8 = vadd.f32 (!%p1307_p11), %v1677_v43, %v911_v56  ;;  %v919_v16 = vld [vmem:[#allocation2 + $0x80] sm:$0xff] (!%p1307_p11) }
 0x167   : > { %880 = vst [vmem:[#allocation2 + $0x68] sm:$0xff] %v848_v23  ;;  %896 = vst [vmem:[#allocation2 + $0xe8] sm:$0xff] %v864_v24  ;;  %v850_v31 = vadd.f32 %v792_v29, %v417_v21  ;;  %v866_v32 = vadd.f32 %v832_v30, %v433_v22  ;;  %v913_v62 = vld [vmem:[#allocation2 + $0x50] sm:$0xff] (!%p1307_p11)  ;;  %v956_v9 = vadd.f32 (!%p1307_p11), %v1679_v44, %v912_v57  ;;  %v920_v21 = vld [vmem:[#allocation2 + $0x88] sm:$0xff] (!%p1307_p11)  ;;  %v1000_v60 = vmax.f32 (!%p1307_p11), %v968_v50, 0.0 }
 0x168   : > { %881 = vst [vmem:[#allocation2 + $0x70] sm:$0xff] %v849_v27  ;;  %897 = vst [vmem:[#allocation2 + $0xf0] sm:$0xff] %v865_v28  ;;  %v914_v63 = vld [vmem:[#allocation2 + $0x58] sm:$0xff] (!%p1307_p11)  ;;  %v957_v14 = vadd.f32 (!%p1307_p11), %v1677_v43, %v913_v62  ;;  %v987_v17 = vmax.f32 (!%p1307_p11), %v955_v8, 0.0  ;;  %v921_v26 = vld [vmem:[#allocation2 + $0x90] sm:$0xff] (!%p1307_p11)  ;;  %v964_v37 = vadd.f32 (!%p1307_p11), %v1679_v44, %v920_v21  ;;  %v970_v55 = vadd.f32 (!%p1307_p11), %v1679_v44, %v926_v39 }
 0x169   : > { %882 = vst [vmem:[#allocation2 + $0x78] sm:$0xff] %v850_v31  ;;  %898 = vst [vmem:[#allocation2 + $0xf8] sm:$0xff] %v866_v32  ;;  %v958_v15 = vadd.f32 (!%p1307_p11), %v1679_v44, %v914_v63  ;;  %v988_v18 = vmax.f32 (!%p1307_p11), %v956_v9, 0.0  ;;  %v922_v27 = vld [vmem:[#allocation2 + $0x98] sm:$0xff] (!%p1307_p11)  ;;  %v963_v31 = vadd.f32 (!%p1307_p11), %v1677_v43, %v919_v16  ;;  %v923_v32 = vld [vmem:[#allocation2 + $0xa0] sm:$0xff] (!%p1307_p11)  ;;  %v965_v42 = vadd.f32 (!%p1307_p11), %v1677_v43, %v921_v26 }
 0x16a   : > { %1108 = vst [vmem:[%s1779_s3 + $0x8] sm:$0xff] %v1331_v7  ;;  %1109 = vst [vmem:[%s1779_s3 + $0x10] sm:$0xff] %v1332_v12  ;;  %v989_v22 = vmax.f32 %v957_v14, 0.0  ;;  %v966_v45 = vadd.f32 %v1679_v44, %v922_v27  ;;  %v927_v46 = vld [vmem:[#allocation2 + $0xc0] sm:$0xff]  ;;  %v996_v48 = vmax.f32 %v964_v37, 0.0  ;;  %v967_v49 = vadd.f32 %v1677_v43, %v923_v32  ;;  %v928_v51 = vld [vmem:[#allocation2 + $0xc8] sm:$0xff] }
 0x16b   : > { %1110 = vst [vmem:[%s1779_s3 + $0x18] sm:$0xff] %v1333_v13  ;;  %v990_v23 = vmax.f32 %v958_v15, 0.0  ;;  %v1334_v28 = vpack.c.bf16 %v988_v18, %v987_v17  ;;  %v995_v41 = vmax.f32 %v963_v31, 0.0  ;;  %v997_v52 = vmax.f32 %v965_v42, 0.0  ;;  %v929_v56 = vld [vmem:[#allocation2 + $0xd0] sm:$0xff]  ;;  %v930_v57 = vld [vmem:[#allocation2 + $0xd8] sm:$0xff] }
 0x16c   : > { %v998_v53 = vmax.f32 %v966_v45, 0.0  ;;  %v999_v59 = vmax.f32 %v967_v49, 0.0  ;;  %v971_v61 = vadd.f32 %v1677_v43, %v927_v46  ;;  %v1001_v1 = vmax.f32 %v969_v54, 0.0 }
 0x16d   : > { %v915_v4 = vld [vmem:[#allocation2 + $0x60] sm:$0xff]  ;;  %v1335_v34 = vpack.c.bf16 %v990_v23, %v989_v22  ;;  %1111 = vst [vmem:[%s1779_s3 + $0x20] sm:$0xff] %v1334_v28  ;;  %v1338_v58 = vpack.c.bf16 %v996_v48, %v995_v41  ;;  %v1002_v2 = vmax.f32 %v970_v55, 0.0  ;;  %v972_v3 = vadd.f32 %v1679_v44, %v928_v51 }
 0x16e   : > { %v916_v5 = vld [vmem:[#allocation2 + $0x68] sm:$0xff]  ;;  %v959_v19 = vadd.f32 %v1677_v43, %v915_v4  ;;  %v931_v62 = vld [vmem:[#allocation2 + $0xe0] sm:$0xff]  ;;  %v1339_v0 = vpack.c.bf16 %v998_v53, %v997_v52  ;;  %v1340_v6 = vpack.c.bf16 %v1000_v60, %v999_v59  ;;  %v1003_v7 = vmax.f32 %v971_v61, 0.0 }
 0x16f   : > { %v917_v10 = vld [vmem:[#allocation2 + $0x70] sm:$0xff]  ;;  %v960_v20 = vadd.f32 %v1679_v44, %v916_v5  ;;  %1112 = vst [vmem:[%s1779_s3 + $0x28] sm:$0xff] %v1335_v34  ;;  %v932_v63 = vld [vmem:[#allocation2 + $0xe8] sm:$0xff]  ;;  %1115 = vst [vmem:[%s1779_s3 + $0x40] sm:$0xff] %v1338_v58  ;;  %v973_v8 = vadd.f32 %v1677_v43, %v929_v56  ;;  %v974_v9 = vadd.f32 %v1679_v44, %v930_v57 }
 0x170   : > { %v918_v11 = vld [vmem:[#allocation2 + $0x78] sm:$0xff]  ;;  %v961_v24 = vadd.f32 %v1677_v43, %v917_v10  ;;  %v991_v29 = vmax.f32 %v959_v19, 0.0  ;;  %v933_v4 = vld [vmem:[#allocation2 + $0xf0] sm:$0xff]  ;;  %1116 = vst [vmem:[%s1779_s3 + $0x48] sm:$0xff] %v1339_v0  ;;  %v1341_v10 = vpack.c.bf16 %v1002_v2, %v1001_v1  ;;  %v975_v12 = vadd.f32 %v1677_v43, %v931_v62  ;;  %1117 = vst [vmem:[%s1779_s3 + $0x50] sm:$0xff] %v1340_v6 }
 0x171   : > { %v962_v25 = vadd.f32 %v1679_v44, %v918_v11  ;;  %v992_v30 = vmax.f32 %v960_v20, 0.0  ;;  %v934_v5 = vld [vmem:[#allocation2 + $0xf8] sm:$0xff]  ;;  %v1004_v11 = vmax.f32 %v972_v3, 0.0  ;;  %v976_v13 = vadd.f32 %v1679_v44, %v932_v63 }
 0x172   : > { %v993_v35 = vmax.f32 %v961_v24, 0.0  ;;  %v1005_v14 = vmax.f32 %v973_v8, 0.0  ;;  %v1006_v15 = vmax.f32 %v974_v9, 0.0  ;;  %v977_v16 = vadd.f32 %v1677_v43, %v933_v4  ;;  %1118 = vst [vmem:[%s1779_s3 + $0x58] sm:$0xff] %v1341_v10 }
 0x173   : > { %v994_v36 = vmax.f32 %v962_v25, 0.0  ;;  %v1336_v40 = vpack.c.bf16 %v992_v30, %v991_v29  ;;  %v978_v17 = vadd.f32 %v1679_v44, %v934_v5  ;;  %v1342_v18 = vpack.c.bf16 %v1004_v11, %v1003_v7 }
 0x174   : > { %v1007_v19 = vmax.f32 %v975_v12, 0.0  ;;  %v1008_v20 = vmax.f32 %v976_v13, 0.0  ;;  %v1343_v21 = vpack.c.bf16 %v1006_v15, %v1005_v14  ;;  %v1009_v22 = vmax.f32 %v977_v16, 0.0 }
 0x175   : > { %v1337_v47 = vpack.c.bf16 %v994_v36, %v993_v35  ;;  %1113 = vst [vmem:[%s1779_s3 + $0x30] sm:$0xff] %v1336_v40  ;;  %v1010_v23 = vmax.f32 %v978_v17, 0.0  ;;  %1119 = vst [vmem:[%s1779_s3 + $0x60] sm:$0xff] %v1342_v18 }
 0x176   : > { %v1344_v24 = vpack.c.bf16 %v1008_v20, %v1007_v19  ;;  %1120 = vst [vmem:[%s1779_s3 + $0x68] sm:$0xff] %v1343_v21 }
 0x177   : > { %1114 = vst [vmem:[%s1779_s3 + $0x38] sm:$0xff] %v1337_v47  ;;  %v1345_v43 = vpack.c.bf16 %v1010_v23, %v1009_v22 }
 0x178   : > { %1121 = vst [vmem:[%s1779_s3 + $0x70] sm:$0xff] %v1344_v24 }
 0x179   : > { %1122 = vst [vmem:[%s1779_s3 + $0x78] sm:$0xff] %v1345_v43 }
 0x17a PF: > { %s13_s16 = sadd.s32 1, %s1529_s16   ;;  %s1780_s12 = smov %s1517_s13 }
 0x17b   : > { %p10_p12 = scmp.ge.s32.totalorder %s13_s16, 11   ;;  %s1781_s13 = smov %s1587_s20 }
 0x17c   : > { %s1782_s14 = smov %s1525_s15  ;;  %s1783_s15 = smov %s1785_s17 }
 0x17d   :  { %12 = sbr.rel (!%p10_p12) target bundleno = 3 (0x3), region = 119 }

// kernel: deeplabv3p_forward.21
= control target key start
LH: loop header
LB: loop body
LE: loop exit
PB: predicated region body
PF: predicated region fallthrough
CT: control target
= control target key end

     0   :  { %vm3183_vm0 = vcmask 392192   ;;  %s8175_s1 = inlined_call_operand.vmem [shape: bf16[2736,256], index: 1, kind: input, shape index: {}]   ;;  %s8176_s0 = inlined_call_operand.vmem [shape: bf16[128,2736], index: 0, kind: input, shape index: {}]   ;;  %s8177_s2 = inlined_call_operand.vmem [shape: f32[1,256], index: 2, kind: input, shape index: {}]   ;;  %s8178_s3 = inlined_call_operand.vmem [shape: bf16[128,256], index: 3, kind: output, shape index: {}]  }
   0x1   :  { %v5642_v0 = vld [vmem:[%s8175_s1 + $0x4] ss:$8 sps:$4 sm:$0xff]   ;;  %v5646_v2 = vld [vmem:[%s8175_s1] ss:$8 sps:$4 sm:$0xff]   ;;  %v5648_v4 = vld [vmem:[%s8175_s1 + $0x14] ss:$8 sps:$4 sm:$0xff]  }
   0x2   :  { %v5644_v1 = vld [vmem:[%s8175_s1 + $0x504] ss:$8 sps:$4 sm:$0xff]   ;;  %3208 = vmatprep.subr.bf16.mxu1 %v5642_v0  ;;  %v5647_v3 = vld [vmem:[%s8175_s1 + $0x500] ss:$8 sps:$4 sm:$0xff]   ;;  %v5650_v5 = vld [vmem:[%s8175_s1 + $0x514] ss:$8 sps:$4 sm:$0xff]  }
   0x3   :  { %3773 = vmatprep.subr.bf16.mxu0 %v5644_v1  ;;  %3209 = vmatpush1.bf16.msra.mxu1 %v5646_v2  ;;  %v5652_v6 = vld [vmem:[%s8175_s1 + $0x10] ss:$8 sps:$4 sm:$0xff]   ;;  %v5654_v8 = vld [vmem:[%s8175_s1 + $0x24] ss:$8 sps:$4 sm:$0xff]   ;;  %v5658_v10 = vld [vmem:[%s8175_s1 + $0x20] ss:$8 sps:$4 sm:$0xff]  }
   0x4   :  { %3774 = vmatpush1.bf16.msra.mxu0 %v5647_v3  ;;  %3210 = vmatprep.subr.bf16.mxu1 %v5648_v4  ;;  %v5653_v7 = vld [vmem:[%s8175_s1 + $0x510] ss:$8 sps:$4 sm:$0xff]   ;;  %v5656_v9 = vld [vmem:[%s8175_s1 + $0x524] ss:$8 sps:$4 sm:$0xff]   ;;  %v5659_v11 = vld [vmem:[%s8175_s1 + $0x520] ss:$8 sps:$4 sm:$0xff]  }
   0x5   :  { %3775 = vmatprep.subr.bf16.mxu0 %v5650_v5  ;;  %v5660_v12 = vld [vmem:[%s8175_s1 + $0x34] ss:$8 sps:$4 sm:$0xff]   ;;  %v5664_v14 = vld [vmem:[%s8175_s1 + $0x30] ss:$8 sps:$4 sm:$0xff]   ;;  %v5666_v16 = vld [vmem:[%s8175_s1 + $0x44] ss:$8 sps:$4 sm:$0xff]  }
   0x6   :  { %v5662_v13 = vld [vmem:[%s8175_s1 + $0x534] ss:$8 sps:$4 sm:$0xff]   ;;  %v5665_v15 = vld [vmem:[%s8175_s1 + $0x530] ss:$8 sps:$4 sm:$0xff]   ;;  %v5668_v17 = vld [vmem:[%s8175_s1 + $0x544] ss:$8 sps:$4 sm:$0xff]  }
   0x7   :  { %3211 = vmatpush1.bf16.msra.mxu1 %v5652_v6  ;;  %v5670_v18 = vld [vmem:[%s8175_s1 + $0x40] ss:$8 sps:$4 sm:$0xff]   ;;  %v5672_v20 = vld [vmem:[%s8175_s1 + $0x54] ss:$8 sps:$4 sm:$0xff]   ;;  %v5676_v22 = vld [vmem:[%s8175_s1 + $0x50] ss:$8 sps:$4 sm:$0xff]  }
   0x8   :  { %3776 = vmatpush1.bf16.msra.mxu0 %v5653_v7  ;;  %3212 = vmatprep.subr.bf16.mxu1 %v5654_v8  ;;  %v5671_v19 = vld [vmem:[%s8175_s1 + $0x540] ss:$8 sps:$4 sm:$0xff]   ;;  %v5674_v21 = vld [vmem:[%s8175_s1 + $0x554] ss:$8 sps:$4 sm:$0xff]   ;;  %v5677_v23 = vld [vmem:[%s8175_s1 + $0x550] ss:$8 sps:$4 sm:$0xff]  }
   0x9   :  { %3777 = vmatprep.subr.bf16.mxu0 %v5656_v9  ;;  %v5678_v24 = vld [vmem:[%s8175_s1 + $0x64] ss:$8 sps:$4 sm:$0xff]   ;;  %v5682_v26 = vld [vmem:[%s8175_s1 + $0x60] ss:$8 sps:$4 sm:$0xff]   ;;  %v5684_v28 = vld [vmem:[%s8175_s1 + $0x74] ss:$8 sps:$4 sm:$0xff]  }
   0xa   :  { %v5680_v25 = vld [vmem:[%s8175_s1 + $0x564] ss:$8 sps:$4 sm:$0xff]   ;;  %v5683_v27 = vld [vmem:[%s8175_s1 + $0x560] ss:$8 sps:$4 sm:$0xff]   ;;  %v5686_v29 = vld [vmem:[%s8175_s1 + $0x574] ss:$8 sps:$4 sm:$0xff]  }
   0xb   :  { %3213 = vmatpush1.bf16.msra.mxu1 %v5658_v10  ;;  %v5688_v30 = vld [vmem:[%s8175_s1 + $0x70] ss:$8 sps:$4 sm:$0xff]   ;;  %v5690_v32 = vld [vmem:[%s8175_s1 + $0x84] ss:$8 sps:$4 sm:$0xff]   ;;  %v5694_v34 = vld [vmem:[%s8175_s1 + $0x80] ss:$8 sps:$4 sm:$0xff]  }
   0xc   :  { %3778 = vmatpush1.bf16.msra.mxu0 %v5659_v11  ;;  %3214 = vmatprep.subr.bf16.mxu1 %v5660_v12  ;;  %v5689_v31 = vld [vmem:[%s8175_s1 + $0x570] ss:$8 sps:$4 sm:$0xff]   ;;  %v5692_v33 = vld [vmem:[%s8175_s1 + $0x584] ss:$8 sps:$4 sm:$0xff]   ;;  %v5695_v35 = vld [vmem:[%s8175_s1 + $0x580] ss:$8 sps:$4 sm:$0xff]  }
   0xd   :  { %3779 = vmatprep.subr.bf16.mxu0 %v5662_v13  ;;  %v5696_v36 = vld [vmem:[%s8175_s1 + $0x94] ss:$8 sps:$4 sm:$0xff]   ;;  %v5700_v38 = vld [vmem:[%s8175_s1 + $0x90] ss:$8 sps:$4 sm:$0xff]   ;;  %v5702_v40 = vld [vmem:[%s8175_s1 + $0xa4] ss:$8 sps:$4 sm:$0xff]  }
   0xe   :  { %v5698_v37 = vld [vmem:[%s8175_s1 + $0x594] ss:$8 sps:$4 sm:$0xff]   ;;  %v5701_v39 = vld [vmem:[%s8175_s1 + $0x590] ss:$8 sps:$4 sm:$0xff]   ;;  %v5704_v41 = vld [vmem:[%s8175_s1 + $0x5a4] ss:$8 sps:$4 sm:$0xff]  }
   0xf   :  { %3215 = vmatpush1.bf16.msra.mxu1 %v5664_v14  ;;  %v5706_v42 = vld [vmem:[%s8175_s1 + $0xa0] ss:$8 sps:$4 sm:$0xff]   ;;  %v5708_v44 = vld [vmem:[%s8175_s1 + $0xb4] ss:$8 sps:$4 sm:$0xff]   ;;  %v5712_v46 = vld [vmem:[%s8175_s1 + $0xb0] ss:$8 sps:$4 sm:$0xff]  }
  0x10   :  { %3780 = vmatpush1.bf16.msra.mxu0 %v5665_v15  ;;  %3216 = vmatprep.subr.bf16.mxu1 %v5666_v16  ;;  %v5707_v43 = vld [vmem:[%s8175_s1 + $0x5a0] ss:$8 sps:$4 sm:$0xff]   ;;  %v5710_v45 = vld [vmem:[%s8175_s1 + $0x5b4] ss:$8 sps:$4 sm:$0xff]   ;;  %v5713_v47 = vld [vmem:[%s8175_s1 + $0x5b0] ss:$8 sps:$4 sm:$0xff]  }
  0x11   :  { %3781 = vmatprep.subr.bf16.mxu0 %v5668_v17  ;;  %v5714_v48 = vld [vmem:[%s8175_s1 + $0xc4] ss:$8 sps:$4 sm:$0xff]   ;;  %v5718_v52 = vld [vmem:[%s8175_s1 + $0xc0] ss:$8 sps:$4 sm:$0xff]   ;;  %v5720_v54 = vld [vmem:[%s8175_s1 + $0xd4] ss:$8 sps:$4 sm:$0xff]  }
  0x12   :  { %v5740_v49 = vld [vmem:[%s8176_s0 + $0x4] ss:$88 sps:$4 sm:$0xff]   ;;  %v5719_v53 = vld [vmem:[%s8175_s1 + $0x5c0] ss:$8 sps:$4 sm:$0xff]   ;;  %v5724_v56 = vld [vmem:[%s8175_s1 + $0xd0] ss:$8 sps:$4 sm:$0xff]  }
  0x13   :  { %3217 = vmatpush1.bf16.msra.mxu1 %v5670_v18  ;;  %v5716_v50 = vld [vmem:[%s8175_s1 + $0x5c4] ss:$8 sps:$4 sm:$0xff]   ;;  %3240 = vmatprep.mubr.bf16.mxu1 %v5740_v49  ;;  %v5722_v55 = vld [vmem:[%s8175_s1 + $0x5d4] ss:$8 sps:$4 sm:$0xff]   ;;  %v5725_v57 = vld [vmem:[%s8175_s1 + $0x5d0] ss:$8 sps:$4 sm:$0xff]  }
  0x14   :  { %3782 = vmatpush1.bf16.msra.mxu0 %v5671_v19  ;;  %3218 = vmatprep.subr.bf16.mxu1 %v5672_v20  ;;  %v5743_v51 = vld [vmem:[%s8176_s0 + $0x2c] ss:$88 sps:$4 sm:$0xff]   ;;  %v5730_v60 = vld [vmem:[%s8175_s1 + $0xe0] ss:$8 sps:$4 sm:$0xff]   ;;  %v5732_v62 = vld [vmem:[%s8175_s1 + $0xf4] ss:$8 sps:$4 sm:$0xff]  }
  0x15   :  { %3783 = vmatprep.subr.bf16.mxu0 %v5674_v21  ;;  %3805 = vmatprep.mubr.bf16.mxu0 %v5743_v51  ;;  %v5726_v58 = vld [vmem:[%s8175_s1 + $0xe4] ss:$8 sps:$4 sm:$0xff]   ;;  %v5731_v61 = vld [vmem:[%s8175_s1 + $0x5e0] ss:$8 sps:$4 sm:$0xff]   ;;  %v5734_v63 = vld [vmem:[%s8175_s1 + $0x5f4] ss:$8 sps:$4 sm:$0xff]  }
  0x16   :  { %v5728_v59 = vld [vmem:[%s8175_s1 + $0x5e4] ss:$8 sps:$4 sm:$0xff]   ;;  %v5736_v0 = vld [vmem:[%s8175_s1 + $0xf0] ss:$8 sps:$4 sm:$0xff]   ;;  %v5741_v5 = vld [vmem:[%s8176_s0 + $0x28] ss:$88 sps:$4 sm:$0xff]  }
  0x17   :  { %3219 = vmatpush1.bf16.msra.mxu1 %v5676_v22  ;;  %v5737_v1 = vld [vmem:[%s8175_s1 + $0x5f0] ss:$8 sps:$4 sm:$0xff]   ;;  %v5746_v2 = vld [vmem:[%s8175_s1 + $0x104] ss:$8 sps:$4 sm:$0xff]   ;;  %v5744_v6 = vld [vmem:[%s8175_s1 + $0x100] ss:$8 sps:$4 sm:$0xff]  }
  0x18   :  { %3784 = vmatpush1.bf16.msra.mxu0 %v5677_v23  ;;  %3220 = vmatprep.subr.bf16.mxu1 %v5678_v24  ;;  %v5749_v3 = vld [vmem:[%s8175_s1 + $0x604] ss:$8 sps:$4 sm:$0xff]   ;;  %v5738_v4 = vld [vmem:[%s8176_s0] ss:$88 sps:$4 sm:$0xff]   ;;  %v5752_v8 = vld [vmem:[%s8175_s1 + $0x114] ss:$8 sps:$4 sm:$0xff]  }
  0x19   :  { %3785 = vmatprep.subr.bf16.mxu0 %v5680_v25  ;;  %v5747_v7 = vld [vmem:[%s8175_s1 + $0x600] ss:$8 sps:$4 sm:$0xff]   ;;  %v5755_v9 = vld [vmem:[%s8175_s1 + $0x614] ss:$8 sps:$4 sm:$0xff]   ;;  %v5750_v12 = vld [vmem:[%s8175_s1 + $0x110] ss:$8 sps:$4 sm:$0xff]  }
  0x1a   :  { %v5756_v10 = vld [vmem:[%s8176_s0 + $0xb4] ss:$88 sps:$4 sm:$0xff]   ;;  %v5753_v13 = vld [vmem:[%s8175_s1 + $0x610] ss:$8 sps:$4 sm:$0xff]   ;;  %v5761_v17 = vld [vmem:[%s8175_s1 + $0x120] ss:$8 sps:$4 sm:$0xff]  }
  0x1b   :  { %3221 = vmatpush1.bf16.msra.mxu1 %v5682_v26  ;;  %v5758_v11 = vld [vmem:[%s8176_s0 + $0xdc] ss:$88 sps:$4 sm:$0xff]   ;;  %v5763_v14 = vld [vmem:[%s8175_s1 + $0x124] ss:$8 sps:$4 sm:$0xff]   ;;  %v5760_v16 = vld [vmem:[%s8176_s0 + $0xb0] ss:$88 sps:$4 sm:$0xff]  }
  0x1c   :  { %3786 = vmatpush1.bf16.msra.mxu0 %v5683_v27  ;;  %3222 = vmatprep.subr.bf16.mxu1 %v5684_v28  ;;  %v5767_v15 = vld [vmem:[%s8175_s1 + $0x624] ss:$8 sps:$4 sm:$0xff]   ;;  %v5764_v18 = vld [vmem:[%s8176_s0 + $0xd8] ss:$88 sps:$4 sm:$0xff]   ;;  %v5765_v19 = vld [vmem:[%s8175_s1 + $0x620] ss:$8 sps:$4 sm:$0xff]  }
  0x1d   :  { %3787 = vmatprep.subr.bf16.mxu0 %v5686_v29  ;;  %v5770_v20 = vld [vmem:[%s8175_s1 + $0x134] ss:$8 sps:$4 sm:$0xff]   ;;  %v5776_v23 = vld [vmem:[%s8176_s0 + $0x18c] ss:$88 sps:$4 sm:$0xff]   ;;  %v5768_v24 = vld [vmem:[%s8175_s1 + $0x130] ss:$8 sps:$4 sm:$0xff]  }
  0x1e   :  { %v5773_v21 = vld [vmem:[%s8175_s1 + $0x634] ss:$8 sps:$4 sm:$0xff]   ;;  %v5771_v25 = vld [vmem:[%s8175_s1 + $0x630] ss:$8 sps:$4 sm:$0xff]   ;;  %v5781_v26 = vld [vmem:[%s8175_s1 + $0x144] ss:$8 sps:$4 sm:$0xff]  }
  0x1f   :  { %3223 = vmatpush1.bf16.msra.mxu1 %v5688_v30  ;;  %v5774_v22 = vld [vmem:[%s8176_s0 + $0x164] ss:$88 sps:$4 sm:$0xff]   ;;  %v5778_v28 = vld [vmem:[%s8176_s0 + $0x160] ss:$88 sps:$4 sm:$0xff]  }
  0x20   :  { %3788 = vmatpush1.bf16.msra.mxu0 %v5689_v31  ;;  %3224 = vmatprep.subr.bf16.mxu1 %v5690_v32  ;;  %v5785_v27 = vld [vmem:[%s8175_s1 + $0x644] ss:$8 sps:$4 sm:$0xff]   ;;  %v5779_v29 = vld [vmem:[%s8175_s1 + $0x140] ss:$8 sps:$4 sm:$0xff]   ;;  %v5788_v32 = vld [vmem:[%s8175_s1 + $0x154] ss:$8 sps:$4 sm:$0xff]  }
  0x21   :  { %3789 = vmatprep.subr.bf16.mxu0 %v5692_v33  ;;  %v5782_v30 = vld [vmem:[%s8176_s0 + $0x188] ss:$88 sps:$4 sm:$0xff]   ;;  %v5791_v33 = vld [vmem:[%s8175_s1 + $0x654] ss:$8 sps:$4 sm:$0xff]   ;;  %v5807_v49 = vld [vmem:[%s8175_s1 + $0x670] ss:$8 sps:$4 sm:$0xff]  }
  0x22   :  { %v5783_v31 = vld [vmem:[%s8175_s1 + $0x640] ss:$8 sps:$4 sm:$0xff]   ;;  %v5821_v51 = vld [vmem:[%s8175_s1 + $0x684] ss:$8 sps:$4 sm:$0xff]  }
  0x23   :  { %3225 = vmatpush1.bf16.msra.mxu1 %v5694_v34  ;;  %v5792_v34 = vld [vmem:[%s8176_s0 + $0x214] ss:$88 sps:$4 sm:$0xff]  }
  0x24   :  { %3790 = vmatpush1.bf16.msra.mxu0 %v5695_v35  ;;  %3226 = vmatprep.subr.bf16.mxu1 %v5696_v36  ;;  %v5794_v35 = vld [vmem:[%s8176_s0 + $0x23c] ss:$88 sps:$4 sm:$0xff]   ;;  %v5786_v36 = vld [vmem:[%s8175_s1 + $0x150] ss:$8 sps:$4 sm:$0xff]  }
  0x25   :  { %3791 = vmatprep.subr.bf16.mxu0 %v5698_v37  ;;  %v5789_v37 = vld [vmem:[%s8175_s1 + $0x650] ss:$8 sps:$4 sm:$0xff]  }
  0x27   :  { %3227 = vmatpush1.bf16.msra.mxu1 %v5700_v38  ;;  %v5799_v38 = vld [vmem:[%s8175_s1 + $0x164] ss:$8 sps:$4 sm:$0xff]  }
  0x28   :  { %3792 = vmatpush1.bf16.msra.mxu0 %v5701_v39  ;;  %3228 = vmatprep.subr.bf16.mxu1 %v5702_v40  ;;  %v5803_v39 = vld [vmem:[%s8175_s1 + $0x664] ss:$8 sps:$4 sm:$0xff]   ;;  %v5796_v40 = vld [vmem:[%s8176_s0 + $0x210] ss:$88 sps:$4 sm:$0xff]  }
  0x29   :  { %3793 = vmatprep.subr.bf16.mxu0 %v5704_v41  ;;  %v5797_v41 = vld [vmem:[%s8175_s1 + $0x160] ss:$8 sps:$4 sm:$0xff]  }
  0x2b   :  { %3229 = vmatpush1.bf16.msra.mxu1 %v5706_v42  ;;  %v5800_v42 = vld [vmem:[%s8176_s0 + $0x238] ss:$88 sps:$4 sm:$0xff]  }
  0x2c   :  { %3794 = vmatpush1.bf16.msra.mxu0 %v5707_v43  ;;  %3230 = vmatprep.subr.bf16.mxu1 %v5708_v44  ;;  %v5801_v43 = vld [vmem:[%s8175_s1 + $0x660] ss:$8 sps:$4 sm:$0xff]   ;;  %v5806_v44 = vld [vmem:[%s8175_s1 + $0x174] ss:$8 sps:$4 sm:$0xff]  }
  0x2d   :  { %3795 = vmatprep.subr.bf16.mxu0 %v5710_v45  ;;  %v5809_v45 = vld [vmem:[%s8175_s1 + $0x674] ss:$8 sps:$4 sm:$0xff]  }
  0x2f   :  { %3231 = vmatpush1.bf16.msra.mxu1 %v5712_v46  ;;  %v5810_v46 = vld [vmem:[%s8176_s0 + $0x2c4] ss:$88 sps:$4 sm:$0xff]  }
  0x30   :  { %3796 = vmatpush1.bf16.msra.mxu0 %v5713_v47  ;;  %3232 = vmatprep.subr.bf16.mxu1 %v5714_v48  ;;  %v5812_v47 = vld [vmem:[%s8176_s0 + $0x2ec] ss:$88 sps:$4 sm:$0xff]   ;;  %v5804_v48 = vld [vmem:[%s8175_s1 + $0x170] ss:$8 sps:$4 sm:$0xff]  }
  0x31   :  { %3797 = vmatprep.subr.bf16.mxu0 %v5716_v50  ;;  %v5817_v50 = vld [vmem:[%s8175_s1 + $0x184] ss:$8 sps:$4 sm:$0xff]  }
  0x33   :  { %3233 = vmatpush1.bf16.msra.mxu1 %v5718_v52  ;;  %v5814_v52 = vld [vmem:[%s8176_s0 + $0x2c0] ss:$88 sps:$4 sm:$0xff]  }
  0x34   :  { %3798 = vmatpush1.bf16.msra.mxu0 %v5719_v53  ;;  %3234 = vmatprep.subr.bf16.mxu1 %v5720_v54  ;;  %v5815_v53 = vld [vmem:[%s8175_s1 + $0x180] ss:$8 sps:$4 sm:$0xff]  }
  0x35   :  { %3799 = vmatprep.subr.bf16.mxu0 %v5722_v55  ;;  %v5818_v54 = vld [vmem:[%s8176_s0 + $0x2e8] ss:$88 sps:$4 sm:$0xff]  }
  0x36   :  { %v5819_v55 = vld [vmem:[%s8175_s1 + $0x680] ss:$8 sps:$4 sm:$0xff]  }
  0x37   :  { %3235 = vmatpush1.bf16.msra.mxu1 %v5724_v56  ;;  %v5824_v56 = vld [vmem:[%s8175_s1 + $0x194] ss:$8 sps:$4 sm:$0xff]  }
  0x38   :  { %3800 = vmatpush1.bf16.msra.mxu0 %v5725_v57  ;;  %3236 = vmatprep.subr.bf16.mxu1 %v5726_v58  ;;  %v5827_v57 = vld [vmem:[%s8175_s1 + $0x694] ss:$8 sps:$4 sm:$0xff]  }
  0x39   :  { %3801 = vmatprep.subr.bf16.mxu0 %v5728_v59  ;;  %v5828_v58 = vld [vmem:[%s8176_s0 + $0x374] ss:$88 sps:$4 sm:$0xff]  }
  0x3a   :  { %v5830_v59 = vld [vmem:[%s8176_s0 + $0x39c] ss:$88 sps:$4 sm:$0xff]  }
  0x3b   :  { %3237 = vmatpush1.bf16.msra.mxu1 %v5730_v60  ;;  %v5822_v60 = vld [vmem:[%s8175_s1 + $0x190] ss:$8 sps:$4 sm:$0xff]  }
  0x3c   :  { %3802 = vmatpush1.bf16.msra.mxu0 %v5731_v61  ;;  %3238 = vmatprep.subr.bf16.mxu1 %v5732_v62  ;;  %v5825_v61 = vld [vmem:[%s8175_s1 + $0x690] ss:$8 sps:$4 sm:$0xff]   ;;  %v5835_v62 = vld [vmem:[%s8175_s1 + $0x1a4] ss:$8 sps:$4 sm:$0xff]  }
  0x3d   :  { %3803 = vmatprep.subr.bf16.mxu0 %v5734_v63  ;;  %v5839_v63 = vld [vmem:[%s8175_s1 + $0x6a4] ss:$8 sps:$4 sm:$0xff]  }
  0x3f   :  { %3239 = vmatpush1.bf16.msra.mxu1 %v5736_v0  ;;  %v5832_v0 = vld [vmem:[%s8176_s0 + $0x370] ss:$88 sps:$4 sm:$0xff]  }
  0x40   :  { %3804 = vmatpush1.bf16.msra.mxu0 %v5737_v1  ;;  %3321 = vmatprep.subr.bf16.mxu1 %v5746_v2  ;;  %v5833_v1 = vld [vmem:[%s8175_s1 + $0x1a0] ss:$8 sps:$4 sm:$0xff]   ;;  %v5836_v2 = vld [vmem:[%s8176_s0 + $0x398] ss:$88 sps:$4 sm:$0xff]  }
  0x41   :  { %3886 = vmatprep.subr.bf16.mxu0 %v5749_v3  ;;  %v5837_v3 = vld [vmem:[%s8175_s1 + $0x6a0] ss:$8 sps:$4 sm:$0xff]  }
  0x42   :  { %3241 = vmatmul.mubr.bf16.vlgmr.msra.gmra.mrb[0].mxu1 %v5738_v4  ;;  %v5842_v4 = vld [vmem:[%s8175_s1 + $0x1b4] ss:$8 sps:$4 sm:$0xff]  }
  0x43   :  { %3806 = vmatmul.mubr.bf16.vlgmr.msra.gmra.mrb[0].mxu0 %v5741_v5  ;;  %3322 = vmatpush1.bf16.msra.mxu1 %v5744_v6  ;;  %v5845_v5 = vld [vmem:[%s8175_s1 + $0x6b4] ss:$8 sps:$4 sm:$0xff]  }
  0x44   :  { %3887 = vmatpush1.bf16.msra.mxu0 %v5747_v7  ;;  %3323 = vmatprep.subr.bf16.mxu1 %v5752_v8  ;;  %v5846_v6 = vld [vmem:[%s8176_s0 + $0x424] ss:$88 sps:$4 sm:$0xff]   ;;  %v5840_v8 = vld [vmem:[%s8175_s1 + $0x1b0] ss:$8 sps:$4 sm:$0xff]  }
  0x45   :  { %3888 = vmatprep.subr.bf16.mxu0 %v5755_v9  ;;  %3250 = vmatprep.mubr.bf16.mxu1 %v5756_v10  ;;  %v5848_v7 = vld [vmem:[%s8176_s0 + $0x44c] ss:$88 sps:$4 sm:$0xff]   ;;  %v5843_v9 = vld [vmem:[%s8175_s1 + $0x6b0] ss:$8 sps:$4 sm:$0xff]  }
  0x46   :  { %3815 = vmatprep.mubr.bf16.mxu0 %v5758_v11  ;;  %v5853_v10 = vld [vmem:[%s8175_s1 + $0x1c4] ss:$8 sps:$4 sm:$0xff]  }
  0x47   :  { %3324 = vmatpush1.bf16.msra.mxu1 %v5750_v12  ;;  %v5857_v11 = vld [vmem:[%s8175_s1 + $0x6c4] ss:$8 sps:$4 sm:$0xff]   ;;  %v5850_v12 = vld [vmem:[%s8176_s0 + $0x420] ss:$88 sps:$4 sm:$0xff]  }
  0x48   :  { %3889 = vmatpush1.bf16.msra.mxu0 %v5753_v13  ;;  %3325 = vmatprep.subr.bf16.mxu1 %v5763_v14  ;;  %v5851_v13 = vld [vmem:[%s8175_s1 + $0x1c0] ss:$8 sps:$4 sm:$0xff]  }
  0x49   :  { %3890 = vmatprep.subr.bf16.mxu0 %v5767_v15  ;;  %v5854_v14 = vld [vmem:[%s8176_s0 + $0x448] ss:$88 sps:$4 sm:$0xff]  }
  0x4a   :  { %3251 = vmatmul.mubr.bf16.gmra.mrb[4].mxu1 %v5760_v16  ;;  %v5855_v15 = vld [vmem:[%s8175_s1 + $0x6c0] ss:$8 sps:$4 sm:$0xff]   ;;  %v5860_v16 = vld [vmem:[%s8175_s1 + $0x1d4] ss:$8 sps:$4 sm:$0xff]  }
  0x4b   :  { %3816 = vmatmul.mubr.bf16.gmra.mrb[4].mxu0 %v5764_v18  ;;  %3326 = vmatpush1.bf16.msra.mxu1 %v5761_v17  ;;  %v5863_v17 = vld [vmem:[%s8175_s1 + $0x6d4] ss:$8 sps:$4 sm:$0xff]  }
  0x4c   :  { %3891 = vmatpush1.bf16.msra.mxu0 %v5765_v19  ;;  %3327 = vmatprep.subr.bf16.mxu1 %v5770_v20  ;;  %v5864_v18 = vld [vmem:[%s8176_s0 + $0x4d4] ss:$88 sps:$4 sm:$0xff]   ;;  %v5858_v20 = vld [vmem:[%s8175_s1 + $0x1d0] ss:$8 sps:$4 sm:$0xff]  }
  0x4d   :  { %3892 = vmatprep.subr.bf16.mxu0 %v5773_v21  ;;  %3260 = vmatprep.mubr.bf16.mxu1 %v5774_v22  ;;  %v5866_v19 = vld [vmem:[%s8176_s0 + $0x4fc] ss:$88 sps:$4 sm:$0xff]   ;;  %v5861_v21 = vld [vmem:[%s8175_s1 + $0x6d0] ss:$8 sps:$4 sm:$0xff]   ;;  %v5871_v22 = vld [vmem:[%s8175_s1 + $0x1e4] ss:$8 sps:$4 sm:$0xff]  }
  0x4e   :  { %3825 = vmatprep.mubr.bf16.mxu0 %v5776_v23  ;;  %v5875_v23 = vld [vmem:[%s8175_s1 + $0x6e4] ss:$8 sps:$4 sm:$0xff]  }
  0x4f   :  { %3328 = vmatpush1.bf16.msra.mxu1 %v5768_v24  ;;  %v5868_v24 = vld [vmem:[%s8176_s0 + $0x4d0] ss:$88 sps:$4 sm:$0xff]  }
  0x50   :  { %3893 = vmatpush1.bf16.msra.mxu0 %v5771_v25  ;;  %3329 = vmatprep.subr.bf16.mxu1 %v5781_v26  ;;  %v5869_v25 = vld [vmem:[%s8175_s1 + $0x1e0] ss:$8 sps:$4 sm:$0xff]   ;;  %v5872_v26 = vld [vmem:[%s8176_s0 + $0x4f8] ss:$88 sps:$4 sm:$0xff]  }
  0x51   :  { %3894 = vmatprep.subr.bf16.mxu0 %v5785_v27  ;;  %v5873_v27 = vld [vmem:[%s8175_s1 + $0x6e0] ss:$8 sps:$4 sm:$0xff]  }
  0x52   :  { %3261 = vmatmul.mubr.bf16.gmra.mrb[8].mxu1 %v5778_v28  ;;  %v5878_v28 = vld [vmem:[%s8175_s1 + $0x1f4] ss:$8 sps:$4 sm:$0xff]  }
  0x53   :  { %3826 = vmatmul.mubr.bf16.gmra.mrb[8].mxu0 %v5782_v30  ;;  %3330 = vmatpush1.bf16.msra.mxu1 %v5779_v29  ;;  %v5881_v29 = vld [vmem:[%s8175_s1 + $0x6f4] ss:$8 sps:$4 sm:$0xff]   ;;  %v5884_v30 = vld [vmem:[%s8176_s0 + $0xc] ss:$88 sps:$4 sm:$0xff]  }
  0x54   :  { %3895 = vmatpush1.bf16.msra.mxu0 %v5783_v31  ;;  %3331 = vmatprep.subr.bf16.mxu1 %v5788_v32  ;;  %v5887_v31 = vld [vmem:[%s8176_s0 + $0x34] ss:$88 sps:$4 sm:$0xff]   ;;  %v5876_v32 = vld [vmem:[%s8175_s1 + $0x1f0] ss:$8 sps:$4 sm:$0xff]  }
  0x55   :  { %3896 = vmatprep.subr.bf16.mxu0 %v5791_v33  ;;  %3270 = vmatprep.mubr.bf16.mxu1 %v5792_v34  ;;  %v5879_v33 = vld [vmem:[%s8175_s1 + $0x6f0] ss:$8 sps:$4 sm:$0xff]   ;;  %v5890_v34 = vld [vmem:[%s8175_s1 + $0x204] ss:$8 sps:$4 sm:$0xff]  }
  0x56   :  { %3835 = vmatprep.mubr.bf16.mxu0 %v5794_v35  ;;  %v5893_v35 = vld [vmem:[%s8175_s1 + $0x704] ss:$8 sps:$4 sm:$0xff]  }
  0x57   :  { %3332 = vmatpush1.bf16.msra.mxu1 %v5786_v36  ;;  %v5882_v36 = vld [vmem:[%s8176_s0 + $0x8] ss:$88 sps:$4 sm:$0xff]  }
  0x58   :  { %3897 = vmatpush1.bf16.msra.mxu0 %v5789_v37  ;;  %3333 = vmatprep.subr.bf16.mxu1 %v5799_v38  ;;  %v5885_v37 = vld [vmem:[%s8176_s0 + $0x30] ss:$88 sps:$4 sm:$0xff]  }
  0x59   :  { %3898 = vmatprep.subr.bf16.mxu0 %v5803_v39  ;;  %v5888_v38 = vld [vmem:[%s8175_s1 + $0x200] ss:$8 sps:$4 sm:$0xff]  }
  0x5a   :  { %3271 = vmatmul.mubr.bf16.gmra.mrb[12].mxu1 %v5796_v40  ;;  %v5891_v39 = vld [vmem:[%s8175_s1 + $0x700] ss:$8 sps:$4 sm:$0xff]   ;;  %v5896_v40 = vld [vmem:[%s8175_s1 + $0x214] ss:$8 sps:$4 sm:$0xff]  }
  0x5b   :  { %3836 = vmatmul.mubr.bf16.gmra.mrb[12].mxu0 %v5800_v42  ;;  %3334 = vmatpush1.bf16.msra.mxu1 %v5797_v41  ;;  %v5899_v41 = vld [vmem:[%s8175_s1 + $0x714] ss:$8 sps:$4 sm:$0xff]  }
  0x5c   :  { %3899 = vmatpush1.bf16.msra.mxu0 %v5801_v43  ;;  %3335 = vmatprep.subr.bf16.mxu1 %v5806_v44  ;;  %v5900_v42 = vld [vmem:[%s8176_s0 + $0xbc] ss:$88 sps:$4 sm:$0xff]   ;;  %v5894_v44 = vld [vmem:[%s8175_s1 + $0x210] ss:$8 sps:$4 sm:$0xff]  }
  0x5d   :  { %3900 = vmatprep.subr.bf16.mxu0 %v5809_v45  ;;  %3280 = vmatprep.mubr.bf16.mxu1 %v5810_v46  ;;  %v5902_v43 = vld [vmem:[%s8176_s0 + $0xe4] ss:$88 sps:$4 sm:$0xff]   ;;  %v5897_v45 = vld [vmem:[%s8175_s1 + $0x710] ss:$8 sps:$4 sm:$0xff]  }
  0x5e   :  { %3845 = vmatprep.mubr.bf16.mxu0 %v5812_v47  ;;  %v5907_v46 = vld [vmem:[%s8175_s1 + $0x224] ss:$8 sps:$4 sm:$0xff]  }
  0x5f   :  { %3336 = vmatpush1.bf16.msra.mxu1 %v5804_v48  ;;  %v5911_v47 = vld [vmem:[%s8175_s1 + $0x724] ss:$8 sps:$4 sm:$0xff]   ;;  %v5904_v48 = vld [vmem:[%s8176_s0 + $0xb8] ss:$88 sps:$4 sm:$0xff]  }
  0x60   :  { %3901 = vmatpush1.bf16.msra.mxu0 %v5807_v49  ;;  %3337 = vmatprep.subr.bf16.mxu1 %v5817_v50  ;;  %v5905_v49 = vld [vmem:[%s8175_s1 + $0x220] ss:$8 sps:$4 sm:$0xff]  }
  0x61   :  { %3902 = vmatprep.subr.bf16.mxu0 %v5821_v51  ;;  %v5908_v50 = vld [vmem:[%s8176_s0 + $0xe0] ss:$88 sps:$4 sm:$0xff]  }
  0x62   :  { %3281 = vmatmul.mubr.bf16.gmra.mrb[16].mxu1 %v5814_v52  ;;  %v5909_v51 = vld [vmem:[%s8175_s1 + $0x720] ss:$8 sps:$4 sm:$0xff]   ;;  %v5914_v52 = vld [vmem:[%s8175_s1 + $0x234] ss:$8 sps:$4 sm:$0xff]  }
  0x63   :  { %3846 = vmatmul.mubr.bf16.gmra.mrb[16].mxu0 %v5818_v54  ;;  %3338 = vmatpush1.bf16.msra.mxu1 %v5815_v53  ;;  %v5917_v53 = vld [vmem:[%s8175_s1 + $0x734] ss:$8 sps:$4 sm:$0xff]   ;;  %v5918_v54 = vld [vmem:[%s8176_s0 + $0x16c] ss:$88 sps:$4 sm:$0xff]  }
  0x64   :  { %3903 = vmatpush1.bf16.msra.mxu0 %v5819_v55  ;;  %3339 = vmatprep.subr.bf16.mxu1 %v5824_v56  ;;  %v5920_v55 = vld [vmem:[%s8176_s0 + $0x194] ss:$88 sps:$4 sm:$0xff]   ;;  %v5912_v56 = vld [vmem:[%s8175_s1 + $0x230] ss:$8 sps:$4 sm:$0xff]  }
  0x65   :  { %3904 = vmatprep.subr.bf16.mxu0 %v5827_v57  ;;  %3290 = vmatprep.mubr.bf16.mxu1 %v5828_v58  ;;  %v5915_v57 = vld [vmem:[%s8175_s1 + $0x730] ss:$8 sps:$4 sm:$0xff]   ;;  %v5925_v58 = vld [vmem:[%s8175_s1 + $0x244] ss:$8 sps:$4 sm:$0xff]  }
  0x66   :  { %3855 = vmatprep.mubr.bf16.mxu0 %v5830_v59  ;;  %v5929_v59 = vld [vmem:[%s8175_s1 + $0x744] ss:$8 sps:$4 sm:$0xff]  }
  0x67   :  { %3340 = vmatpush1.bf16.msra.mxu1 %v5822_v60  ;;  %v5922_v60 = vld [vmem:[%s8176_s0 + $0x168] ss:$88 sps:$4 sm:$0xff]  }
  0x68   :  { %3905 = vmatpush1.bf16.msra.mxu0 %v5825_v61  ;;  %3341 = vmatprep.subr.bf16.mxu1 %v5835_v62  ;;  %v5923_v61 = vld [vmem:[%s8175_s1 + $0x240] ss:$8 sps:$4 sm:$0xff]  }
  0x69   :  { %3906 = vmatprep.subr.bf16.mxu0 %v5839_v63  ;;  %v5926_v62 = vld [vmem:[%s8176_s0 + $0x190] ss:$88 sps:$4 sm:$0xff]  }
  0x6a   :  { %3291 = vmatmul.mubr.bf16.gmra.mrb[20].mxu1 %v5832_v0  ;;  %v5927_v63 = vld [vmem:[%s8175_s1 + $0x740] ss:$8 sps:$4 sm:$0xff]   ;;  %v5932_v0 = vld [vmem:[%s8175_s1 + $0x254] ss:$8 sps:$4 sm:$0xff]  }
  0x6b   :  { %3856 = vmatmul.mubr.bf16.gmra.mrb[20].mxu0 %v5836_v2  ;;  %3342 = vmatpush1.bf16.msra.mxu1 %v5833_v1  ;;  %v5935_v1 = vld [vmem:[%s8175_s1 + $0x754] ss:$8 sps:$4 sm:$0xff]  }
  0x6c   :  { %3907 = vmatpush1.bf16.msra.mxu0 %v5837_v3  ;;  %3343 = vmatprep.subr.bf16.mxu1 %v5842_v4  ;;  %v5936_v2 = vld [vmem:[%s8176_s0 + $0x21c] ss:$88 sps:$4 sm:$0xff]   ;;  %v5930_v4 = vld [vmem:[%s8175_s1 + $0x250] ss:$8 sps:$4 sm:$0xff]  }
  0x6d   :  { %3908 = vmatprep.subr.bf16.mxu0 %v5845_v5  ;;  %3300 = vmatprep.mubr.bf16.mxu1 %v5846_v6  ;;  %v5938_v3 = vld [vmem:[%s8176_s0 + $0x244] ss:$88 sps:$4 sm:$0xff]   ;;  %v5933_v5 = vld [vmem:[%s8175_s1 + $0x750] ss:$8 sps:$4 sm:$0xff]  }
  0x6e   :  { %3865 = vmatprep.mubr.bf16.mxu0 %v5848_v7  ;;  %v5943_v6 = vld [vmem:[%s8175_s1 + $0x264] ss:$8 sps:$4 sm:$0xff]  }
  0x6f   :  { %3344 = vmatpush1.bf16.msra.mxu1 %v5840_v8  ;;  %v5947_v7 = vld [vmem:[%s8175_s1 + $0x764] ss:$8 sps:$4 sm:$0xff]   ;;  %v5940_v8 = vld [vmem:[%s8176_s0 + $0x218] ss:$88 sps:$4 sm:$0xff]  }
  0x70   :  { %3909 = vmatpush1.bf16.msra.mxu0 %v5843_v9  ;;  %3345 = vmatprep.subr.bf16.mxu1 %v5853_v10  ;;  %v5941_v9 = vld [vmem:[%s8175_s1 + $0x260] ss:$8 sps:$4 sm:$0xff]  }
  0x71   :  { %3910 = vmatprep.subr.bf16.mxu0 %v5857_v11  ;;  %v5944_v10 = vld [vmem:[%s8176_s0 + $0x240] ss:$88 sps:$4 sm:$0xff]  }
  0x72   :  { %3301 = vmatmul.mubr.bf16.gmra.mrb[24].mxu1 %v5850_v12  ;;  %v5945_v11 = vld [vmem:[%s8175_s1 + $0x760] ss:$8 sps:$4 sm:$0xff]   ;;  %v5950_v12 = vld [vmem:[%s8175_s1 + $0x274] ss:$8 sps:$4 sm:$0xff]  }
  0x73   :  { %3866 = vmatmul.mubr.bf16.gmra.mrb[24].mxu0 %v5854_v14  ;;  %3346 = vmatpush1.bf16.msra.mxu1 %v5851_v13  ;;  %v5953_v13 = vld [vmem:[%s8175_s1 + $0x774] ss:$8 sps:$4 sm:$0xff]   ;;  %v5954_v14 = vld [vmem:[%s8176_s0 + $0x2cc] ss:$88 sps:$4 sm:$0xff]  }
  0x74   :  { %3911 = vmatpush1.bf16.msra.mxu0 %v5855_v15  ;;  %3347 = vmatprep.subr.bf16.mxu1 %v5860_v16  ;;  %v5956_v15 = vld [vmem:[%s8176_s0 + $0x2f4] ss:$88 sps:$4 sm:$0xff]   ;;  %v5948_v16 = vld [vmem:[%s8175_s1 + $0x270] ss:$8 sps:$4 sm:$0xff]  }
  0x75   :  { %3912 = vmatprep.subr.bf16.mxu0 %v5863_v17  ;;  %3310 = vmatprep.mubr.bf16.mxu1 %v5864_v18  ;;  %v5951_v17 = vld [vmem:[%s8175_s1 + $0x770] ss:$8 sps:$4 sm:$0xff]   ;;  %v5961_v18 = vld [vmem:[%s8175_s1 + $0x284] ss:$8 sps:$4 sm:$0xff]  }
  0x76   :  { %3875 = vmatprep.mubr.bf16.mxu0 %v5866_v19  ;;  %v5965_v19 = vld [vmem:[%s8175_s1 + $0x784] ss:$8 sps:$4 sm:$0xff]  }
  0x77   :  { %3348 = vmatpush1.bf16.msra.mxu1 %v5858_v20  ;;  %v5958_v20 = vld [vmem:[%s8176_s0 + $0x2c8] ss:$88 sps:$4 sm:$0xff]  }
  0x78   :  { %3913 = vmatpush1.bf16.msra.mxu0 %v5861_v21  ;;  %3349 = vmatprep.subr.bf16.mxu1 %v5871_v22  ;;  %v5959_v21 = vld [vmem:[%s8175_s1 + $0x280] ss:$8 sps:$4 sm:$0xff]  }
  0x79   :  { %3914 = vmatprep.subr.bf16.mxu0 %v5875_v23  ;;  %v5962_v22 = vld [vmem:[%s8176_s0 + $0x2f0] ss:$88 sps:$4 sm:$0xff]  }
  0x7a   :  { %3311 = vmatmul.mubr.bf16.gmra.mrb[28].mxu1 %v5868_v24  ;;  %v5963_v23 = vld [vmem:[%s8175_s1 + $0x780] ss:$8 sps:$4 sm:$0xff]   ;;  %v5968_v24 = vld [vmem:[%s8175_s1 + $0x294] ss:$8 sps:$4 sm:$0xff]  }
  0x7b   :  { %3876 = vmatmul.mubr.bf16.gmra.mrb[28].mxu0 %v5872_v26  ;;  %3350 = vmatpush1.bf16.msra.mxu1 %v5869_v25  ;;  %v5971_v25 = vld [vmem:[%s8175_s1 + $0x794] ss:$8 sps:$4 sm:$0xff]  }
  0x7c   :  { %3915 = vmatpush1.bf16.msra.mxu0 %v5873_v27  ;;  %3351 = vmatprep.subr.bf16.mxu1 %v5878_v28  ;;  %v5972_v26 = vld [vmem:[%s8176_s0 + $0x37c] ss:$88 sps:$4 sm:$0xff]   ;;  %v5966_v28 = vld [vmem:[%s8175_s1 + $0x290] ss:$8 sps:$4 sm:$0xff]  }
  0x7d   :  { %3916 = vmatprep.subr.bf16.mxu0 %v5881_v29  ;;  %3353 = vmatprep.mubr.bf16.mxu1 %v5884_v30  ;;  %v5974_v27 = vld [vmem:[%s8176_s0 + $0x3a4] ss:$88 sps:$4 sm:$0xff]   ;;  %v5969_v29 = vld [vmem:[%s8175_s1 + $0x790] ss:$8 sps:$4 sm:$0xff]  }
  0x7e   :  { %3918 = vmatprep.mubr.bf16.mxu0 %v5887_v31  ;;  %v5979_v30 = vld [vmem:[%s8175_s1 + $0x2a4] ss:$8 sps:$4 sm:$0xff]  }
  0x7f   :  { %3352 = vmatpush1.bf16.msra.mxu1 %v5876_v32  ;;  %v5983_v31 = vld [vmem:[%s8175_s1 + $0x7a4] ss:$8 sps:$4 sm:$0xff]   ;;  %v5976_v32 = vld [vmem:[%s8176_s0 + $0x378] ss:$88 sps:$4 sm:$0xff]  }
  0x80   :  { %3917 = vmatpush1.bf16.msra.mxu0 %v5879_v33  ;;  %3434 = vmatprep.subr.bf16.mxu1 %v5890_v34  ;;  %v5977_v33 = vld [vmem:[%s8175_s1 + $0x2a0] ss:$8 sps:$4 sm:$0xff]  }
  0x81   :  { %3999 = vmatprep.subr.bf16.mxu0 %v5893_v35  ;;  %v5980_v34 = vld [vmem:[%s8176_s0 + $0x3a0] ss:$88 sps:$4 sm:$0xff]  }
  0x82   :  { %3354 = vmatmul.mubr.bf16.vlgmr.msra.gmra.mrb[0].mxu1 %v5882_v36  ;;  %v5981_v35 = vld [vmem:[%s8175_s1 + $0x7a0] ss:$8 sps:$4 sm:$0xff]   ;;  %v5986_v36 = vld [vmem:[%s8175_s1 + $0x2b4] ss:$8 sps:$4 sm:$0xff]  }
  0x83   :  { %3919 = vmatmul.mubr.bf16.vlgmr.msra.gmra.mrb[0].mxu0 %v5885_v37  ;;  %3435 = vmatpush1.bf16.msra.mxu1 %v5888_v38  ;;  %v5989_v37 = vld [vmem:[%s8175_s1 + $0x7b4] ss:$8 sps:$4 sm:$0xff]   ;;  %v5990_v38 = vld [vmem:[%s8176_s0 + $0x42c] ss:$88 sps:$4 sm:$0xff]  }
  0x84   :  { %4000 = vmatpush1.bf16.msra.mxu0 %v5891_v39  ;;  %3436 = vmatprep.subr.bf16.mxu1 %v5896_v40  ;;  %v5992_v39 = vld [vmem:[%s8176_s0 + $0x454] ss:$88 sps:$4 sm:$0xff]   ;;  %v5984_v40 = vld [vmem:[%s8175_s1 + $0x2b0] ss:$8 sps:$4 sm:$0xff]  }
  0x85   :  { %4001 = vmatprep.subr.bf16.mxu0 %v5899_v41  ;;  %3363 = vmatprep.mubr.bf16.mxu1 %v5900_v42  ;;  %v5987_v41 = vld [vmem:[%s8175_s1 + $0x7b0] ss:$8 sps:$4 sm:$0xff]   ;;  %v5997_v42 = vld [vmem:[%s8175_s1 + $0x2c4] ss:$8 sps:$4 sm:$0xff]  }
  0x86   :  { %3928 = vmatprep.mubr.bf16.mxu0 %v5902_v43  ;;  %v6001_v43 = vld [vmem:[%s8175_s1 + $0x7c4] ss:$8 sps:$4 sm:$0xff]  }
  0x87   :  { %3437 = vmatpush1.bf16.msra.mxu1 %v5894_v44  ;;  %v5994_v44 = vld [vmem:[%s8176_s0 + $0x428] ss:$88 sps:$4 sm:$0xff]  }
  0x88   :  { %4002 = vmatpush1.bf16.msra.mxu0 %v5897_v45  ;;  %3438 = vmatprep.subr.bf16.mxu1 %v5907_v46  ;;  %v5995_v45 = vld [vmem:[%s8175_s1 + $0x2c0] ss:$8 sps:$4 sm:$0xff]  }
  0x89   :  { %4003 = vmatprep.subr.bf16.mxu0 %v5911_v47  ;;  %v5998_v46 = vld [vmem:[%s8176_s0 + $0x450] ss:$88 sps:$4 sm:$0xff]  }
  0x8a   :  { %3364 = vmatmul.mubr.bf16.gmra.mrb[4].mxu1 %v5904_v48  ;;  %v5999_v47 = vld [vmem:[%s8175_s1 + $0x7c0] ss:$8 sps:$4 sm:$0xff]   ;;  %v6004_v48 = vld [vmem:[%s8175_s1 + $0x2d4] ss:$8 sps:$4 sm:$0xff]  }
  0x8b   :  { %3929 = vmatmul.mubr.bf16.gmra.mrb[4].mxu0 %v5908_v50  ;;  %3439 = vmatpush1.bf16.msra.mxu1 %v5905_v49  ;;  %v6007_v49 = vld [vmem:[%s8175_s1 + $0x7d4] ss:$8 sps:$4 sm:$0xff]  }
  0x8c   :  { %4004 = vmatpush1.bf16.msra.mxu0 %v5909_v51  ;;  %3440 = vmatprep.subr.bf16.mxu1 %v5914_v52  ;;  %v6008_v50 = vld [vmem:[%s8176_s0 + $0x4dc] ss:$88 sps:$4 sm:$0xff]   ;;  %v6002_v52 = vld [vmem:[%s8175_s1 + $0x2d0] ss:$8 sps:$4 sm:$0xff]  }
  0x8d   :  { %4005 = vmatprep.subr.bf16.mxu0 %v5917_v53  ;;  %3373 = vmatprep.mubr.bf16.mxu1 %v5918_v54  ;;  %v6010_v51 = vld [vmem:[%s8176_s0 + $0x504] ss:$88 sps:$4 sm:$0xff]   ;;  %v6005_v53 = vld [vmem:[%s8175_s1 + $0x7d0] ss:$8 sps:$4 sm:$0xff]  }
  0x8e   :  { %3938 = vmatprep.mubr.bf16.mxu0 %v5920_v55  ;;  %v6015_v54 = vld [vmem:[%s8175_s1 + $0x2e4] ss:$8 sps:$4 sm:$0xff]  }
  0x8f   :  { %3441 = vmatpush1.bf16.msra.mxu1 %v5912_v56  ;;  %v6019_v55 = vld [vmem:[%s8175_s1 + $0x7e4] ss:$8 sps:$4 sm:$0xff]   ;;  %v6012_v56 = vld [vmem:[%s8176_s0 + $0x4d8] ss:$88 sps:$4 sm:$0xff]  }
  0x90   :  { %4006 = vmatpush1.bf16.msra.mxu0 %v5915_v57  ;;  %3442 = vmatprep.subr.bf16.mxu1 %v5925_v58  ;;  %v6013_v57 = vld [vmem:[%s8175_s1 + $0x2e0] ss:$8 sps:$4 sm:$0xff]  }
  0x91   :  { %4007 = vmatprep.subr.bf16.mxu0 %v5929_v59  ;;  %v6016_v58 = vld [vmem:[%s8176_s0 + $0x500] ss:$88 sps:$4 sm:$0xff]  }
  0x92   :  { %3374 = vmatmul.mubr.bf16.gmra.mrb[8].mxu1 %v5922_v60  ;;  %v6017_v59 = vld [vmem:[%s8175_s1 + $0x7e0] ss:$8 sps:$4 sm:$0xff]   ;;  %v6022_v60 = vld [vmem:[%s8175_s1 + $0x2f4] ss:$8 sps:$4 sm:$0xff]  }
  0x93   :  { %3939 = vmatmul.mubr.bf16.gmra.mrb[8].mxu0 %v5926_v62  ;;  %3443 = vmatpush1.bf16.msra.mxu1 %v5923_v61  ;;  %v6025_v61 = vld [vmem:[%s8175_s1 + $0x7f4] ss:$8 sps:$4 sm:$0xff]  }
  0x94   :  { %4008 = vmatpush1.bf16.msra.mxu0 %v5927_v63  ;;  %3444 = vmatprep.subr.bf16.mxu1 %v5932_v0  ;;  %v6028_v62 = vld [vmem:[%s8176_s0 + $0x14] ss:$88 sps:$4 sm:$0xff]   ;;  %v6020_v0 = vld [vmem:[%s8175_s1 + $0x2f0] ss:$8 sps:$4 sm:$0xff]  }
  0x95   :  { %4009 = vmatprep.subr.bf16.mxu0 %v5935_v1  ;;  %3383 = vmatprep.mubr.bf16.mxu1 %v5936_v2  ;;  %v6031_v63 = vld [vmem:[%s8176_s0 + $0x3c] ss:$88 sps:$4 sm:$0xff]   ;;  %v6023_v1 = vld [vmem:[%s8175_s1 + $0x7f0] ss:$8 sps:$4 sm:$0xff]   ;;  %v6034_v2 = vld [vmem:[%s8175_s1 + $0x304] ss:$8 sps:$4 sm:$0xff]  }
  0x96   :  { %3948 = vmatprep.mubr.bf16.mxu0 %v5938_v3  ;;  %v6037_v3 = vld [vmem:[%s8175_s1 + $0x804] ss:$8 sps:$4 sm:$0xff]  }
  0x97   :  { %3445 = vmatpush1.bf16.msra.mxu1 %v5930_v4  ;;  %v6026_v4 = vld [vmem:[%s8176_s0 + $0x10] ss:$88 sps:$4 sm:$0xff]  }
  0x98   :  { %4010 = vmatpush1.bf16.msra.mxu0 %v5933_v5  ;;  %3446 = vmatprep.subr.bf16.mxu1 %v5943_v6  ;;  %v6029_v5 = vld [vmem:[%s8176_s0 + $0x38] ss:$88 sps:$4 sm:$0xff]   ;;  %v6032_v6 = vld [vmem:[%s8175_s1 + $0x300] ss:$8 sps:$4 sm:$0xff]  }
  0x99   :  { %4011 = vmatprep.subr.bf16.mxu0 %v5947_v7  ;;  %v6035_v7 = vld [vmem:[%s8175_s1 + $0x800] ss:$8 sps:$4 sm:$0xff]  }
  0x9a   :  { %3384 = vmatmul.mubr.bf16.gmra.mrb[12].mxu1 %v5940_v8  ;;  %v6040_v8 = vld [vmem:[%s8175_s1 + $0x314] ss:$8 sps:$4 sm:$0xff]  }
  0x9b   :  { %3949 = vmatmul.mubr.bf16.gmra.mrb[12].mxu0 %v5944_v10  ;;  %3447 = vmatpush1.bf16.msra.mxu1 %v5941_v9  ;;  %v6043_v9 = vld [vmem:[%s8175_s1 + $0x814] ss:$8 sps:$4 sm:$0xff]  }
  0x9c   :  { %4012 = vmatpush1.bf16.msra.mxu0 %v5945_v11  ;;  %3448 = vmatprep.subr.bf16.mxu1 %v5950_v12  ;;  %v6044_v10 = vld [vmem:[%s8176_s0 + $0xc4] ss:$88 sps:$4 sm:$0xff]   ;;  %v6038_v12 = vld [vmem:[%s8175_s1 + $0x310] ss:$8 sps:$4 sm:$0xff]  }
  0x9d   :  { %4013 = vmatprep.subr.bf16.mxu0 %v5953_v13  ;;  %3393 = vmatprep.mubr.bf16.mxu1 %v5954_v14  ;;  %v6046_v11 = vld [vmem:[%s8176_s0 + $0xec] ss:$88 sps:$4 sm:$0xff]   ;;  %v6041_v13 = vld [vmem:[%s8175_s1 + $0x810] ss:$8 sps:$4 sm:$0xff]  }
  0x9e   :  { %3958 = vmatprep.mubr.bf16.mxu0 %v5956_v15  ;;  %v6051_v14 = vld [vmem:[%s8175_s1 + $0x324] ss:$8 sps:$4 sm:$0xff]  }
  0x9f   :  { %3449 = vmatpush1.bf16.msra.mxu1 %v5948_v16  ;;  %v6055_v15 = vld [vmem:[%s8175_s1 + $0x824] ss:$8 sps:$4 sm:$0xff]   ;;  %v6048_v16 = vld [vmem:[%s8176_s0 + $0xc0] ss:$88 sps:$4 sm:$0xff]  }
  0xa0   :  { %4014 = vmatpush1.bf16.msra.mxu0 %v5951_v17  ;;  %3450 = vmatprep.subr.bf16.mxu1 %v5961_v18  ;;  %v6049_v17 = vld [vmem:[%s8175_s1 + $0x320] ss:$8 sps:$4 sm:$0xff]  }
  0xa1   :  { %4015 = vmatprep.subr.bf16.mxu0 %v5965_v19  ;;  %v6052_v18 = vld [vmem:[%s8176_s0 + $0xe8] ss:$88 sps:$4 sm:$0xff]  }
  0xa2   :  { %3394 = vmatmul.mubr.bf16.gmra.mrb[16].mxu1 %v5958_v20  ;;  %v6053_v19 = vld [vmem:[%s8175_s1 + $0x820] ss:$8 sps:$4 sm:$0xff]   ;;  %v6058_v20 = vld [vmem:[%s8175_s1 + $0x334] ss:$8 sps:$4 sm:$0xff]  }
  0xa3   :  { %3959 = vmatmul.mubr.bf16.gmra.mrb[16].mxu0 %v5962_v22  ;;  %3451 = vmatpush1.bf16.msra.mxu1 %v5959_v21  ;;  %v6061_v21 = vld [vmem:[%s8175_s1 + $0x834] ss:$8 sps:$4 sm:$0xff]  }
  0xa4   :  { %4016 = vmatpush1.bf16.msra.mxu0 %v5963_v23  ;;  %3452 = vmatprep.subr.bf16.mxu1 %v5968_v24  ;;  %v6062_v22 = vld [vmem:[%s8176_s0 + $0x174] ss:$88 sps:$4 sm:$0xff]   ;;  %v6056_v24 = vld [vmem:[%s8175_s1 + $0x330] ss:$8 sps:$4 sm:$0xff]  }
  0xa5   :  { %4017 = vmatprep.subr.bf16.mxu0 %v5971_v25  ;;  %3403 = vmatprep.mubr.bf16.mxu1 %v5972_v26  ;;  %v6064_v23 = vld [vmem:[%s8176_s0 + $0x19c] ss:$88 sps:$4 sm:$0xff]   ;;  %v6059_v25 = vld [vmem:[%s8175_s1 + $0x830] ss:$8 sps:$4 sm:$0xff]   ;;  %v6069_v26 = vld [vmem:[%s8175_s1 + $0x344] ss:$8 sps:$4 sm:$0xff]  }
  0xa6   :  { %3968 = vmatprep.mubr.bf16.mxu0 %v5974_v27  ;;  %v6073_v27 = vld [vmem:[%s8175_s1 + $0x844] ss:$8 sps:$4 sm:$0xff]  }
  0xa7   :  { %3453 = vmatpush1.bf16.msra.mxu1 %v5966_v28  ;;  %v6066_v28 = vld [vmem:[%s8176_s0 + $0x170] ss:$88 sps:$4 sm:$0xff]  }
  0xa8   :  { %4018 = vmatpush1.bf16.msra.mxu0 %v5969_v29  ;;  %3454 = vmatprep.subr.bf16.mxu1 %v5979_v30  ;;  %v6067_v29 = vld [vmem:[%s8175_s1 + $0x340] ss:$8 sps:$4 sm:$0xff]   ;;  %v6070_v30 = vld [vmem:[%s8176_s0 + $0x198] ss:$88 sps:$4 sm:$0xff]  }
  0xa9   :  { %4019 = vmatprep.subr.bf16.mxu0 %v5983_v31  ;;  %v6071_v31 = vld [vmem:[%s8175_s1 + $0x840] ss:$8 sps:$4 sm:$0xff]  }
  0xaa   :  { %3404 = vmatmul.mubr.bf16.gmra.mrb[20].mxu1 %v5976_v32  ;;  %v6076_v32 = vld [vmem:[%s8175_s1 + $0x354] ss:$8 sps:$4 sm:$0xff]  }
  0xab   :  { %3969 = vmatmul.mubr.bf16.gmra.mrb[20].mxu0 %v5980_v34  ;;  %3455 = vmatpush1.bf16.msra.mxu1 %v5977_v33  ;;  %v6079_v33 = vld [vmem:[%s8175_s1 + $0x854] ss:$8 sps:$4 sm:$0xff]  }
  0xac   :  { %4020 = vmatpush1.bf16.msra.mxu0 %v5981_v35  ;;  %3456 = vmatprep.subr.bf16.mxu1 %v5986_v36  ;;  %v6080_v34 = vld [vmem:[%s8176_s0 + $0x224] ss:$88 sps:$4 sm:$0xff]   ;;  %v6074_v36 = vld [vmem:[%s8175_s1 + $0x350] ss:$8 sps:$4 sm:$0xff]  }
  0xad   :  { %4021 = vmatprep.subr.bf16.mxu0 %v5989_v37  ;;  %3413 = vmatprep.mubr.bf16.mxu1 %v5990_v38  ;;  %v6082_v35 = vld [vmem:[%s8176_s0 + $0x24c] ss:$88 sps:$4 sm:$0xff]   ;;  %v6077_v37 = vld [vmem:[%s8175_s1 + $0x850] ss:$8 sps:$4 sm:$0xff]  }
  0xae   :  { %3978 = vmatprep.mubr.bf16.mxu0 %v5992_v39  ;;  %v6087_v38 = vld [vmem:[%s8175_s1 + $0x364] ss:$8 sps:$4 sm:$0xff]  }
  0xaf   :  { %3457 = vmatpush1.bf16.msra.mxu1 %v5984_v40  ;;  %v6091_v39 = vld [vmem:[%s8175_s1 + $0x864] ss:$8 sps:$4 sm:$0xff]   ;;  %v6084_v40 = vld [vmem:[%s8176_s0 + $0x220] ss:$88 sps:$4 sm:$0xff]  }
  0xb0   :  { %4022 = vmatpush1.bf16.msra.mxu0 %v5987_v41  ;;  %3458 = vmatprep.subr.bf16.mxu1 %v5997_v42  ;;  %v6085_v41 = vld [vmem:[%s8175_s1 + $0x360] ss:$8 sps:$4 sm:$0xff]  }
  0xb1   :  { %4023 = vmatprep.subr.bf16.mxu0 %v6001_v43  ;;  %v6088_v42 = vld [vmem:[%s8176_s0 + $0x248] ss:$88 sps:$4 sm:$0xff]  }
  0xb2   :  { %3414 = vmatmul.mubr.bf16.gmra.mrb[24].mxu1 %v5994_v44  ;;  %v6089_v43 = vld [vmem:[%s8175_s1 + $0x860] ss:$8 sps:$4 sm:$0xff]   ;;  %v6094_v44 = vld [vmem:[%s8175_s1 + $0x374] ss:$8 sps:$4 sm:$0xff]  }
  0xb3   :  { %3979 = vmatmul.mubr.bf16.gmra.mrb[24].mxu0 %v5998_v46  ;;  %3459 = vmatpush1.bf16.msra.mxu1 %v5995_v45  ;;  %v6097_v45 = vld [vmem:[%s8175_s1 + $0x874] ss:$8 sps:$4 sm:$0xff]  }
  0xb4   :  { %4024 = vmatpush1.bf16.msra.mxu0 %v5999_v47  ;;  %3460 = vmatprep.subr.bf16.mxu1 %v6004_v48  ;;  %v6098_v46 = vld [vmem:[%s8176_s0 + $0x2d4] ss:$88 sps:$4 sm:$0xff]   ;;  %v6092_v48 = vld [vmem:[%s8175_s1 + $0x370] ss:$8 sps:$4 sm:$0xff]  }
  0xb5   :  { %4025 = vmatprep.subr.bf16.mxu0 %v6007_v49  ;;  %3423 = vmatprep.mubr.bf16.mxu1 %v6008_v50  ;;  %v6100_v47 = vld [vmem:[%s8176_s0 + $0x2fc] ss:$88 sps:$4 sm:$0xff]   ;;  %v6095_v49 = vld [vmem:[%s8175_s1 + $0x870] ss:$8 sps:$4 sm:$0xff]   ;;  %v6105_v50 = vld [vmem:[%s8175_s1 + $0x384] ss:$8 sps:$4 sm:$0xff]  }
  0xb6   :  { %3988 = vmatprep.mubr.bf16.mxu0 %v6010_v51  ;;  %v6109_v51 = vld [vmem:[%s8175_s1 + $0x884] ss:$8 sps:$4 sm:$0xff]  }
  0xb7   :  { %3461 = vmatpush1.bf16.msra.mxu1 %v6002_v52  ;;  %v6102_v52 = vld [vmem:[%s8176_s0 + $0x2d0] ss:$88 sps:$4 sm:$0xff]  }
  0xb8   :  { %4026 = vmatpush1.bf16.msra.mxu0 %v6005_v53  ;;  %3462 = vmatprep.subr.bf16.mxu1 %v6015_v54  ;;  %v6103_v53 = vld [vmem:[%s8175_s1 + $0x380] ss:$8 sps:$4 sm:$0xff]   ;;  %v6106_v54 = vld [vmem:[%s8176_s0 + $0x2f8] ss:$88 sps:$4 sm:$0xff]  }
  0xb9   :  { %4027 = vmatprep.subr.bf16.mxu0 %v6019_v55  ;;  %v6107_v55 = vld [vmem:[%s8175_s1 + $0x880] ss:$8 sps:$4 sm:$0xff]  }
  0xba   :  { %3424 = vmatmul.mubr.bf16.gmra.mrb[28].mxu1 %v6012_v56  ;;  %v6112_v56 = vld [vmem:[%s8175_s1 + $0x394] ss:$8 sps:$4 sm:$0xff]  }
  0xbb   :  { %3989 = vmatmul.mubr.bf16.gmra.mrb[28].mxu0 %v6016_v58  ;;  %3463 = vmatpush1.bf16.msra.mxu1 %v6013_v57  ;;  %v6115_v57 = vld [vmem:[%s8175_s1 + $0x894] ss:$8 sps:$4 sm:$0xff]  }
  0xbc   :  { %4028 = vmatpush1.bf16.msra.mxu0 %v6017_v59  ;;  %3464 = vmatprep.subr.bf16.mxu1 %v6022_v60  ;;  %v6116_v58 = vld [vmem:[%s8176_s0 + $0x384] ss:$88 sps:$4 sm:$0xff]   ;;  %v6110_v60 = vld [vmem:[%s8175_s1 + $0x390] ss:$8 sps:$4 sm:$0xff]  }
  0xbd   :  { %4029 = vmatprep.subr.bf16.mxu0 %v6025_v61  ;;  %3466 = vmatprep.mubr.bf16.mxu1 %v6028_v62  ;;  %v6118_v59 = vld [vmem:[%s8176_s0 + $0x3ac] ss:$88 sps:$4 sm:$0xff]   ;;  %v6113_v61 = vld [vmem:[%s8175_s1 + $0x890] ss:$8 sps:$4 sm:$0xff]  }
  0xbe   :  { %4031 = vmatprep.mubr.bf16.mxu0 %v6031_v63  ;;  %v6123_v62 = vld [vmem:[%s8175_s1 + $0x3a4] ss:$8 sps:$4 sm:$0xff]  }
  0xbf   :  { %3465 = vmatpush1.bf16.msra.mxu1 %v6020_v0  ;;  %v6127_v63 = vld [vmem:[%s8175_s1 + $0x8a4] ss:$8 sps:$4 sm:$0xff]   ;;  %v6120_v0 = vld [vmem:[%s8176_s0 + $0x380] ss:$88 sps:$4 sm:$0xff]  }
  0xc0   :  { %4030 = vmatpush1.bf16.msra.mxu0 %v6023_v1  ;;  %3547 = vmatprep.subr.bf16.mxu1 %v6034_v2  ;;  %v6121_v1 = vld [vmem:[%s8175_s1 + $0x3a0] ss:$8 sps:$4 sm:$0xff]  }
  0xc1   :  { %4112 = vmatprep.subr.bf16.mxu0 %v6037_v3  ;;  %v6124_v2 = vld [vmem:[%s8176_s0 + $0x3a8] ss:$88 sps:$4 sm:$0xff]  }
  0xc2   :  { %3467 = vmatmul.mubr.bf16.vlgmr.msra.gmra.mrb[0].mxu1 %v6026_v4  ;;  %v6125_v3 = vld [vmem:[%s8175_s1 + $0x8a0] ss:$8 sps:$4 sm:$0xff]   ;;  %v6130_v4 = vld [vmem:[%s8175_s1 + $0x3b4] ss:$8 sps:$4 sm:$0xff]  }
  0xc3   :  { %4032 = vmatmul.mubr.bf16.vlgmr.msra.gmra.mrb[0].mxu0 %v6029_v5  ;;  %3548 = vmatpush1.bf16.msra.mxu1 %v6032_v6  ;;  %v6133_v5 = vld [vmem:[%s8175_s1 + $0x8b4] ss:$8 sps:$4 sm:$0xff]  }
  0xc4   :  { %4113 = vmatpush1.bf16.msra.mxu0 %v6035_v7  ;;  %3549 = vmatprep.subr.bf16.mxu1 %v6040_v8  ;;  %v6134_v6 = vld [vmem:[%s8176_s0 + $0x434] ss:$88 sps:$4 sm:$0xff]   ;;  %v6128_v8 = vld [vmem:[%s8175_s1 + $0x3b0] ss:$8 sps:$4 sm:$0xff]  }
  0xc5   :  { %4114 = vmatprep.subr.bf16.mxu0 %v6043_v9  ;;  %3476 = vmatprep.mubr.bf16.mxu1 %v6044_v10  ;;  %v6136_v7 = vld [vmem:[%s8176_s0 + $0x45c] ss:$88 sps:$4 sm:$0xff]   ;;  %v6131_v9 = vld [vmem:[%s8175_s1 + $0x8b0] ss:$8 sps:$4 sm:$0xff]   ;;  %v6141_v10 = vld [vmem:[%s8175_s1 + $0x3c4] ss:$8 sps:$4 sm:$0xff]  }
  0xc6   :  { %4041 = vmatprep.mubr.bf16.mxu0 %v6046_v11  ;;  %v6145_v11 = vld [vmem:[%s8175_s1 + $0x8c4] ss:$8 sps:$4 sm:$0xff]  }
  0xc7   :  { %3550 = vmatpush1.bf16.msra.mxu1 %v6038_v12  ;;  %v6138_v12 = vld [vmem:[%s8176_s0 + $0x430] ss:$88 sps:$4 sm:$0xff]  }
  0xc8   :  { %4115 = vmatpush1.bf16.msra.mxu0 %v6041_v13  ;;  %3551 = vmatprep.subr.bf16.mxu1 %v6051_v14  ;;  %v6139_v13 = vld [vmem:[%s8175_s1 + $0x3c0] ss:$8 sps:$4 sm:$0xff]   ;;  %v6142_v14 = vld [vmem:[%s8176_s0 + $0x458] ss:$88 sps:$4 sm:$0xff]  }
  0xc9   :  { %4116 = vmatprep.subr.bf16.mxu0 %v6055_v15  ;;  %v6143_v15 = vld [vmem:[%s8175_s1 + $0x8c0] ss:$8 sps:$4 sm:$0xff]  }
  0xca   :  { %3477 = vmatmul.mubr.bf16.gmra.mrb[4].mxu1 %v6048_v16  ;;  %v6148_v16 = vld [vmem:[%s8175_s1 + $0x3d4] ss:$8 sps:$4 sm:$0xff]  }
  0xcb   :  { %4042 = vmatmul.mubr.bf16.gmra.mrb[4].mxu0 %v6052_v18  ;;  %3552 = vmatpush1.bf16.msra.mxu1 %v6049_v17  ;;  %v6151_v17 = vld [vmem:[%s8175_s1 + $0x8d4] ss:$8 sps:$4 sm:$0xff]  }
  0xcc   :  { %4117 = vmatpush1.bf16.msra.mxu0 %v6053_v19  ;;  %3553 = vmatprep.subr.bf16.mxu1 %v6058_v20  ;;  %v6152_v18 = vld [vmem:[%s8176_s0 + $0x4e4] ss:$88 sps:$4 sm:$0xff]   ;;  %v6146_v20 = vld [vmem:[%s8175_s1 + $0x3d0] ss:$8 sps:$4 sm:$0xff]  }
  0xcd   :  { %4118 = vmatprep.subr.bf16.mxu0 %v6061_v21  ;;  %3486 = vmatprep.mubr.bf16.mxu1 %v6062_v22  ;;  %v6154_v19 = vld [vmem:[%s8176_s0 + $0x50c] ss:$88 sps:$4 sm:$0xff]   ;;  %v6149_v21 = vld [vmem:[%s8175_s1 + $0x8d0] ss:$8 sps:$4 sm:$0xff]  }
  0xce   :  { %4051 = vmatprep.mubr.bf16.mxu0 %v6064_v23  ;;  %v6159_v22 = vld [vmem:[%s8175_s1 + $0x3e4] ss:$8 sps:$4 sm:$0xff]  }
  0xcf   :  { %3554 = vmatpush1.bf16.msra.mxu1 %v6056_v24  ;;  %v6163_v23 = vld [vmem:[%s8175_s1 + $0x8e4] ss:$8 sps:$4 sm:$0xff]   ;;  %v6156_v24 = vld [vmem:[%s8176_s0 + $0x4e0] ss:$88 sps:$4 sm:$0xff]  }
  0xd0   :  { %4119 = vmatpush1.bf16.msra.mxu0 %v6059_v25  ;;  %3555 = vmatprep.subr.bf16.mxu1 %v6069_v26  ;;  %v6157_v25 = vld [vmem:[%s8175_s1 + $0x3e0] ss:$8 sps:$4 sm:$0xff]  }
  0xd1   :  { %4120 = vmatprep.subr.bf16.mxu0 %v6073_v27  ;;  %v6160_v26 = vld [vmem:[%s8176_s0 + $0x508] ss:$88 sps:$4 sm:$0xff]  }
  0xd2   :  { %3487 = vmatmul.mubr.bf16.gmra.mrb[8].mxu1 %v6066_v28  ;;  %v6161_v27 = vld [vmem:[%s8175_s1 + $0x8e0] ss:$8 sps:$4 sm:$0xff]   ;;  %v6166_v28 = vld [vmem:[%s8175_s1 + $0x3f4] ss:$8 sps:$4 sm:$0xff]  }
  0xd3   :  { %4052 = vmatmul.mubr.bf16.gmra.mrb[8].mxu0 %v6070_v30  ;;  %3556 = vmatpush1.bf16.msra.mxu1 %v6067_v29  ;;  %v6169_v29 = vld [vmem:[%s8175_s1 + $0x8f4] ss:$8 sps:$4 sm:$0xff]  }
  0xd4   :  { %4121 = vmatpush1.bf16.msra.mxu0 %v6071_v31  ;;  %3557 = vmatprep.subr.bf16.mxu1 %v6076_v32  ;;  %v6172_v30 = vld [vmem:[%s8176_s0 + $0x1c] ss:$88 sps:$4 sm:$0xff]   ;;  %v6164_v32 = vld [vmem:[%s8175_s1 + $0x3f0] ss:$8 sps:$4 sm:$0xff]  }
  0xd5   :  { %4122 = vmatprep.subr.bf16.mxu0 %v6079_v33  ;;  %3496 = vmatprep.mubr.bf16.mxu1 %v6080_v34  ;;  %v6175_v31 = vld [vmem:[%s8176_s0 + $0x44] ss:$88 sps:$4 sm:$0xff]   ;;  %v6167_v33 = vld [vmem:[%s8175_s1 + $0x8f0] ss:$8 sps:$4 sm:$0xff]  }
  0xd6   :  { %4061 = vmatprep.mubr.bf16.mxu0 %v6082_v35  ;;  %v6178_v34 = vld [vmem:[%s8175_s1 + $0x404] ss:$8 sps:$4 sm:$0xff]  }
  0xd7   :  { %3558 = vmatpush1.bf16.msra.mxu1 %v6074_v36  ;;  %v6181_v35 = vld [vmem:[%s8175_s1 + $0x904] ss:$8 sps:$4 sm:$0xff]   ;;  %v6170_v36 = vld [vmem:[%s8176_s0 + $0x18] ss:$88 sps:$4 sm:$0xff]  }
  0xd8   :  { %4123 = vmatpush1.bf16.msra.mxu0 %v6077_v37  ;;  %3559 = vmatprep.subr.bf16.mxu1 %v6087_v38  ;;  %v6173_v37 = vld [vmem:[%s8176_s0 + $0x40] ss:$88 sps:$4 sm:$0xff]  }
  0xd9   :  { %4124 = vmatprep.subr.bf16.mxu0 %v6091_v39  ;;  %v6176_v38 = vld [vmem:[%s8175_s1 + $0x400] ss:$8 sps:$4 sm:$0xff]  }
  0xda   :  { %3497 = vmatmul.mubr.bf16.gmra.mrb[12].mxu1 %v6084_v40  ;;  %v6179_v39 = vld [vmem:[%s8175_s1 + $0x900] ss:$8 sps:$4 sm:$0xff]   ;;  %v6184_v40 = vld [vmem:[%s8175_s1 + $0x414] ss:$8 sps:$4 sm:$0xff]  }
  0xdb   :  { %4062 = vmatmul.mubr.bf16.gmra.mrb[12].mxu0 %v6088_v42  ;;  %3560 = vmatpush1.bf16.msra.mxu1 %v6085_v41  ;;  %v6187_v41 = vld [vmem:[%s8175_s1 + $0x914] ss:$8 sps:$4 sm:$0xff]   ;;  %v6188_v42 = vld [vmem:[%s8176_s0 + $0xcc] ss:$88 sps:$4 sm:$0xff]  }
  0xdc   :  { %4125 = vmatpush1.bf16.msra.mxu0 %v6089_v43  ;;  %3561 = vmatprep.subr.bf16.mxu1 %v6094_v44  ;;  %v6190_v43 = vld [vmem:[%s8176_s0 + $0xf4] ss:$88 sps:$4 sm:$0xff]   ;;  %v6182_v44 = vld [vmem:[%s8175_s1 + $0x410] ss:$8 sps:$4 sm:$0xff]  }
  0xdd   :  { %4126 = vmatprep.subr.bf16.mxu0 %v6097_v45  ;;  %3506 = vmatprep.mubr.bf16.mxu1 %v6098_v46  ;;  %v6185_v45 = vld [vmem:[%s8175_s1 + $0x910] ss:$8 sps:$4 sm:$0xff]   ;;  %v6195_v46 = vld [vmem:[%s8175_s1 + $0x424] ss:$8 sps:$4 sm:$0xff]  }
  0xde   :  { %4071 = vmatprep.mubr.bf16.mxu0 %v6100_v47  ;;  %v6199_v47 = vld [vmem:[%s8175_s1 + $0x924] ss:$8 sps:$4 sm:$0xff]  }
  0xdf   :  { %3562 = vmatpush1.bf16.msra.mxu1 %v6092_v48  ;;  %v6192_v48 = vld [vmem:[%s8176_s0 + $0xc8] ss:$88 sps:$4 sm:$0xff]  }
  0xe0   :  { %4127 = vmatpush1.bf16.msra.mxu0 %v6095_v49  ;;  %3563 = vmatprep.subr.bf16.mxu1 %v6105_v50  ;;  %v6193_v49 = vld [vmem:[%s8175_s1 + $0x420] ss:$8 sps:$4 sm:$0xff]  }
  0xe1   :  { %4128 = vmatprep.subr.bf16.mxu0 %v6109_v51  ;;  %v6196_v50 = vld [vmem:[%s8176_s0 + $0xf0] ss:$88 sps:$4 sm:$0xff]  }
  0xe2   :  { %3507 = vmatmul.mubr.bf16.gmra.mrb[16].mxu1 %v6102_v52  ;;  %v6197_v51 = vld [vmem:[%s8175_s1 + $0x920] ss:$8 sps:$4 sm:$0xff]   ;;  %v6202_v52 = vld [vmem:[%s8175_s1 + $0x434] ss:$8 sps:$4 sm:$0xff]  }
  0xe3   :  { %4072 = vmatmul.mubr.bf16.gmra.mrb[16].mxu0 %v6106_v54  ;;  %3564 = vmatpush1.bf16.msra.mxu1 %v6103_v53  ;;  %v6205_v53 = vld [vmem:[%s8175_s1 + $0x934] ss:$8 sps:$4 sm:$0xff]  }
  0xe4   :  { %4129 = vmatpush1.bf16.msra.mxu0 %v6107_v55  ;;  %3565 = vmatprep.subr.bf16.mxu1 %v6112_v56  ;;  %v6206_v54 = vld [vmem:[%s8176_s0 + $0x17c] ss:$88 sps:$4 sm:$0xff]   ;;  %v6200_v56 = vld [vmem:[%s8175_s1 + $0x430] ss:$8 sps:$4 sm:$0xff]  }
  0xe5   :  { %4130 = vmatprep.subr.bf16.mxu0 %v6115_v57  ;;  %3516 = vmatprep.mubr.bf16.mxu1 %v6116_v58  ;;  %v6208_v55 = vld [vmem:[%s8176_s0 + $0x1a4] ss:$88 sps:$4 sm:$0xff]   ;;  %v6203_v57 = vld [vmem:[%s8175_s1 + $0x930] ss:$8 sps:$4 sm:$0xff]  }
  0xe6   :  { %4081 = vmatprep.mubr.bf16.mxu0 %v6118_v59  ;;  %v6213_v58 = vld [vmem:[%s8175_s1 + $0x444] ss:$8 sps:$4 sm:$0xff]  }
  0xe7   :  { %3566 = vmatpush1.bf16.msra.mxu1 %v6110_v60  ;;  %v6217_v59 = vld [vmem:[%s8175_s1 + $0x944] ss:$8 sps:$4 sm:$0xff]   ;;  %v6210_v60 = vld [vmem:[%s8176_s0 + $0x178] ss:$88 sps:$4 sm:$0xff]  }
  0xe8   :  { %4131 = vmatpush1.bf16.msra.mxu0 %v6113_v61  ;;  %3567 = vmatprep.subr.bf16.mxu1 %v6123_v62  ;;  %v6211_v61 = vld [vmem:[%s8175_s1 + $0x440] ss:$8 sps:$4 sm:$0xff]  }
  0xe9   :  { %4132 = vmatprep.subr.bf16.mxu0 %v6127_v63  ;;  %v6214_v62 = vld [vmem:[%s8176_s0 + $0x1a0] ss:$88 sps:$4 sm:$0xff]  }
  0xea   :  { %3517 = vmatmul.mubr.bf16.gmra.mrb[20].mxu1 %v6120_v0  ;;  %v6215_v63 = vld [vmem:[%s8175_s1 + $0x940] ss:$8 sps:$4 sm:$0xff]   ;;  %v6220_v0 = vld [vmem:[%s8175_s1 + $0x454] ss:$8 sps:$4 sm:$0xff]  }
  0xeb   :  { %4082 = vmatmul.mubr.bf16.gmra.mrb[20].mxu0 %v6124_v2  ;;  %3568 = vmatpush1.bf16.msra.mxu1 %v6121_v1  ;;  %v6223_v1 = vld [vmem:[%s8175_s1 + $0x954] ss:$8 sps:$4 sm:$0xff]   ;;  %v6224_v2 = vld [vmem:[%s8176_s0 + $0x22c] ss:$88 sps:$4 sm:$0xff]  }
  0xec   :  { %4133 = vmatpush1.bf16.msra.mxu0 %v6125_v3  ;;  %3569 = vmatprep.subr.bf16.mxu1 %v6130_v4  ;;  %v6226_v3 = vld [vmem:[%s8176_s0 + $0x254] ss:$88 sps:$4 sm:$0xff]   ;;  %v6218_v4 = vld [vmem:[%s8175_s1 + $0x450] ss:$8 sps:$4 sm:$0xff]  }
  0xed   :  { %4134 = vmatprep.subr.bf16.mxu0 %v6133_v5  ;;  %3526 = vmatprep.mubr.bf16.mxu1 %v6134_v6  ;;  %v6221_v5 = vld [vmem:[%s8175_s1 + $0x950] ss:$8 sps:$4 sm:$0xff]   ;;  %v6231_v6 = vld [vmem:[%s8175_s1 + $0x464] ss:$8 sps:$4 sm:$0xff]  }
  0xee   :  { %4091 = vmatprep.mubr.bf16.mxu0 %v6136_v7  ;;  %v6235_v7 = vld [vmem:[%s8175_s1 + $0x964] ss:$8 sps:$4 sm:$0xff]  }
  0xef   :  { %3570 = vmatpush1.bf16.msra.mxu1 %v6128_v8  ;;  %v6228_v8 = vld [vmem:[%s8176_s0 + $0x228] ss:$88 sps:$4 sm:$0xff]  }
  0xf0   :  { %4135 = vmatpush1.bf16.msra.mxu0 %v6131_v9  ;;  %3571 = vmatprep.subr.bf16.mxu1 %v6141_v10  ;;  %v6229_v9 = vld [vmem:[%s8175_s1 + $0x460] ss:$8 sps:$4 sm:$0xff]  }
  0xf1   :  { %4136 = vmatprep.subr.bf16.mxu0 %v6145_v11  ;;  %v6232_v10 = vld [vmem:[%s8176_s0 + $0x250] ss:$88 sps:$4 sm:$0xff]  }
  0xf2   :  { %3527 = vmatmul.mubr.bf16.gmra.mrb[24].mxu1 %v6138_v12  ;;  %v6233_v11 = vld [vmem:[%s8175_s1 + $0x960] ss:$8 sps:$4 sm:$0xff]   ;;  %v6238_v12 = vld [vmem:[%s8175_s1 + $0x474] ss:$8 sps:$4 sm:$0xff]  }
  0xf3   :  { %4092 = vmatmul.mubr.bf16.gmra.mrb[24].mxu0 %v6142_v14  ;;  %3572 = vmatpush1.bf16.msra.mxu1 %v6139_v13  ;;  %v6241_v13 = vld [vmem:[%s8175_s1 + $0x974] ss:$8 sps:$4 sm:$0xff]  }
  0xf4   :  { %4137 = vmatpush1.bf16.msra.mxu0 %v6143_v15  ;;  %3573 = vmatprep.subr.bf16.mxu1 %v6148_v16  ;;  %v6242_v14 = vld [vmem:[%s8176_s0 + $0x2dc] ss:$88 sps:$4 sm:$0xff]   ;;  %v6236_v16 = vld [vmem:[%s8175_s1 + $0x470] ss:$8 sps:$4 sm:$0xff]  }
  0xf5   :  { %4138 = vmatprep.subr.bf16.mxu0 %v6151_v17  ;;  %3536 = vmatprep.mubr.bf16.mxu1 %v6152_v18  ;;  %v6244_v15 = vld [vmem:[%s8176_s0 + $0x304] ss:$88 sps:$4 sm:$0xff]   ;;  %v6239_v17 = vld [vmem:[%s8175_s1 + $0x970] ss:$8 sps:$4 sm:$0xff]  }
  0xf6   :  { %4101 = vmatprep.mubr.bf16.mxu0 %v6154_v19  ;;  %v6249_v18 = vld [vmem:[%s8175_s1 + $0x484] ss:$8 sps:$4 sm:$0xff]  }
  0xf7   :  { %3574 = vmatpush1.bf16.msra.mxu1 %v6146_v20  ;;  %v6253_v19 = vld [vmem:[%s8175_s1 + $0x984] ss:$8 sps:$4 sm:$0xff]   ;;  %v6246_v20 = vld [vmem:[%s8176_s0 + $0x2d8] ss:$88 sps:$4 sm:$0xff]  }
  0xf8   :  { %4139 = vmatpush1.bf16.msra.mxu0 %v6149_v21  ;;  %3575 = vmatprep.subr.bf16.mxu1 %v6159_v22  ;;  %v6247_v21 = vld [vmem:[%s8175_s1 + $0x480] ss:$8 sps:$4 sm:$0xff]  }
  0xf9   :  { %4140 = vmatprep.subr.bf16.mxu0 %v6163_v23  ;;  %v6250_v22 = vld [vmem:[%s8176_s0 + $0x300] ss:$88 sps:$4 sm:$0xff]  }
  0xfa   :  { %3537 = vmatmul.mubr.bf16.gmra.mrb[28].mxu1 %v6156_v24  ;;  %v6251_v23 = vld [vmem:[%s8175_s1 + $0x980] ss:$8 sps:$4 sm:$0xff]   ;;  %v6256_v24 = vld [vmem:[%s8175_s1 + $0x494] ss:$8 sps:$4 sm:$0xff]  }
  0xfb   :  { %4102 = vmatmul.mubr.bf16.gmra.mrb[28].mxu0 %v6160_v26  ;;  %3576 = vmatpush1.bf16.msra.mxu1 %v6157_v25  ;;  %v6259_v25 = vld [vmem:[%s8175_s1 + $0x994] ss:$8 sps:$4 sm:$0xff]   ;;  %v6260_v26 = vld [vmem:[%s8176_s0 + $0x38c] ss:$88 sps:$4 sm:$0xff]  }
  0xfc   :  { %4141 = vmatpush1.bf16.msra.mxu0 %v6161_v27  ;;  %3577 = vmatprep.subr.bf16.mxu1 %v6166_v28  ;;  %v6262_v27 = vld [vmem:[%s8176_s0 + $0x3b4] ss:$88 sps:$4 sm:$0xff]   ;;  %v6254_v28 = vld [vmem:[%s8175_s1 + $0x490] ss:$8 sps:$4 sm:$0xff]  }
  0xfd   :  { %4142 = vmatprep.subr.bf16.mxu0 %v6169_v29  ;;  %3579 = vmatprep.mubr.bf16.mxu1 %v6172_v30  ;;  %v6257_v29 = vld [vmem:[%s8175_s1 + $0x990] ss:$8 sps:$4 sm:$0xff]   ;;  %v6267_v30 = vld [vmem:[%s8175_s1 + $0x4a4] ss:$8 sps:$4 sm:$0xff]  }
  0xfe   :  { %4144 = vmatprep.mubr.bf16.mxu0 %v6175_v31  ;;  %v6271_v31 = vld [vmem:[%s8175_s1 + $0x9a4] ss:$8 sps:$4 sm:$0xff]  }
  0xff   :  { %3578 = vmatpush1.bf16.msra.mxu1 %v6164_v32  ;;  %v6264_v32 = vld [vmem:[%s8176_s0 + $0x388] ss:$88 sps:$4 sm:$0xff]  }
 0x100   :  { %4143 = vmatpush1.bf16.msra.mxu0 %v6167_v33  ;;  %3660 = vmatprep.subr.bf16.mxu1 %v6178_v34  ;;  %v6265_v33 = vld [vmem:[%s8175_s1 + $0x4a0] ss:$8 sps:$4 sm:$0xff]  }
 0x101   :  { %4225 = vmatprep.subr.bf16.mxu0 %v6181_v35  ;;  %v6268_v34 = vld [vmem:[%s8176_s0 + $0x3b0] ss:$88 sps:$4 sm:$0xff]  }
 0x102   :  { %3580 = vmatmul.mubr.bf16.vlgmr.msra.gmra.mrb[0].mxu1 %v6170_v36  ;;  %v6269_v35 = vld [vmem:[%s8175_s1 + $0x9a0] ss:$8 sps:$4 sm:$0xff]   ;;  %v6274_v36 = vld [vmem:[%s8175_s1 + $0x4b4] ss:$8 sps:$4 sm:$0xff]  }
 0x103   :  { %4145 = vmatmul.mubr.bf16.vlgmr.msra.gmra.mrb[0].mxu0 %v6173_v37  ;;  %3661 = vmatpush1.bf16.msra.mxu1 %v6176_v38  ;;  %v6277_v37 = vld [vmem:[%s8175_s1 + $0x9b4] ss:$8 sps:$4 sm:$0xff]  }
 0x104   :  { %4226 = vmatpush1.bf16.msra.mxu0 %v6179_v39  ;;  %3662 = vmatprep.subr.bf16.mxu1 %v6184_v40  ;;  %v6278_v38 = vld [vmem:[%s8176_s0 + $0x43c] ss:$88 sps:$4 sm:$0xff]   ;;  %v6272_v40 = vld [vmem:[%s8175_s1 + $0x4b0] ss:$8 sps:$4 sm:$0xff]  }
 0x105   :  { %4227 = vmatprep.subr.bf16.mxu0 %v6187_v41  ;;  %3589 = vmatprep.mubr.bf16.mxu1 %v6188_v42  ;;  %v6280_v39 = vld [vmem:[%s8176_s0 + $0x464] ss:$88 sps:$4 sm:$0xff]   ;;  %v6275_v41 = vld [vmem:[%s8175_s1 + $0x9b0] ss:$8 sps:$4 sm:$0xff]  }
 0x106   :  { %4154 = vmatprep.mubr.bf16.mxu0 %v6190_v43  ;;  %v6285_v42 = vld [vmem:[%s8175_s1 + $0x4c4] ss:$8 sps:$4 sm:$0xff]  }
 0x107   :  { %3663 = vmatpush1.bf16.msra.mxu1 %v6182_v44  ;;  %v6289_v43 = vld [vmem:[%s8175_s1 + $0x9c4] ss:$8 sps:$4 sm:$0xff]   ;;  %v6282_v44 = vld [vmem:[%s8176_s0 + $0x438] ss:$88 sps:$4 sm:$0xff]  }
 0x108   :  { %4228 = vmatpush1.bf16.msra.mxu0 %v6185_v45  ;;  %3664 = vmatprep.subr.bf16.mxu1 %v6195_v46  ;;  %v6283_v45 = vld [vmem:[%s8175_s1 + $0x4c0] ss:$8 sps:$4 sm:$0xff]  }
 0x109   :  { %4229 = vmatprep.subr.bf16.mxu0 %v6199_v47  ;;  %v6286_v46 = vld [vmem:[%s8176_s0 + $0x460] ss:$88 sps:$4 sm:$0xff]  }
 0x10a   :  { %3590 = vmatmul.mubr.bf16.gmra.mrb[4].mxu1 %v6192_v48  ;;  %v6287_v47 = vld [vmem:[%s8175_s1 + $0x9c0] ss:$8 sps:$4 sm:$0xff]   ;;  %v6292_v48 = vld [vmem:[%s8175_s1 + $0x4d4] ss:$8 sps:$4 sm:$0xff]  }
 0x10b   :  { %4155 = vmatmul.mubr.bf16.gmra.mrb[4].mxu0 %v6196_v50  ;;  %3665 = vmatpush1.bf16.msra.mxu1 %v6193_v49  ;;  %v6295_v49 = vld [vmem:[%s8175_s1 + $0x9d4] ss:$8 sps:$4 sm:$0xff]   ;;  %v6296_v50 = vld [vmem:[%s8176_s0 + $0x4ec] ss:$88 sps:$4 sm:$0xff]  }
 0x10c   :  { %4230 = vmatpush1.bf16.msra.mxu0 %v6197_v51  ;;  %3666 = vmatprep.subr.bf16.mxu1 %v6202_v52  ;;  %v6298_v51 = vld [vmem:[%s8176_s0 + $0x514] ss:$88 sps:$4 sm:$0xff]   ;;  %v6290_v52 = vld [vmem:[%s8175_s1 + $0x4d0] ss:$8 sps:$4 sm:$0xff]  }
 0x10d   :  { %4231 = vmatprep.subr.bf16.mxu0 %v6205_v53  ;;  %3599 = vmatprep.mubr.bf16.mxu1 %v6206_v54  ;;  %v6293_v53 = vld [vmem:[%s8175_s1 + $0x9d0] ss:$8 sps:$4 sm:$0xff]   ;;  %v6303_v54 = vld [vmem:[%s8175_s1 + $0x4e4] ss:$8 sps:$4 sm:$0xff]  }
 0x10e   :  { %4164 = vmatprep.mubr.bf16.mxu0 %v6208_v55  ;;  %v6307_v55 = vld [vmem:[%s8175_s1 + $0x9e4] ss:$8 sps:$4 sm:$0xff]  }
 0x10f   :  { %3667 = vmatpush1.bf16.msra.mxu1 %v6200_v56  ;;  %v6300_v56 = vld [vmem:[%s8176_s0 + $0x4e8] ss:$88 sps:$4 sm:$0xff]  }
 0x110   :  { %4232 = vmatpush1.bf16.msra.mxu0 %v6203_v57  ;;  %3668 = vmatprep.subr.bf16.mxu1 %v6213_v58  ;;  %v6301_v57 = vld [vmem:[%s8175_s1 + $0x4e0] ss:$8 sps:$4 sm:$0xff]  }
 0x111   :  { %4233 = vmatprep.subr.bf16.mxu0 %v6217_v59  ;;  %v6304_v58 = vld [vmem:[%s8176_s0 + $0x510] ss:$88 sps:$4 sm:$0xff]  }
 0x112   :  { %3600 = vmatmul.mubr.bf16.gmra.mrb[8].mxu1 %v6210_v60  ;;  %v6305_v59 = vld [vmem:[%s8175_s1 + $0x9e0] ss:$8 sps:$4 sm:$0xff]   ;;  %v6310_v60 = vld [vmem:[%s8175_s1 + $0x4f4] ss:$8 sps:$4 sm:$0xff]  }
 0x113   :  { %4165 = vmatmul.mubr.bf16.gmra.mrb[8].mxu0 %v6214_v62  ;;  %3669 = vmatpush1.bf16.msra.mxu1 %v6211_v61  ;;  %v6313_v61 = vld [vmem:[%s8175_s1 + $0x9f4] ss:$8 sps:$4 sm:$0xff]  }
 0x114   :  { %4234 = vmatpush1.bf16.msra.mxu0 %v6215_v63  ;;  %3670 = vmatprep.subr.bf16.mxu1 %v6220_v0  ;;  %v6316_v62 = vld [vmem:[%s8176_s0 + $0x24] ss:$88 sps:$4 sm:$0xff]   ;;  %v6308_v0 = vld [vmem:[%s8175_s1 + $0x4f0] ss:$8 sps:$4 sm:$0xff]  }
 0x115   :  { %4235 = vmatprep.subr.bf16.mxu0 %v6223_v1  ;;  %3609 = vmatprep.mubr.bf16.mxu1 %v6224_v2  ;;  %v6319_v63 = vld [vmem:[%s8176_s0 + $0x4c] ss:$88 sps:$4 sm:$0xff]   ;;  %v6311_v1 = vld [vmem:[%s8175_s1 + $0x9f0] ss:$8 sps:$4 sm:$0xff]  }
 0x116   :  { %4174 = vmatprep.mubr.bf16.mxu0 %v6226_v3  ;;  %v6322_v2 = vld [vmem:[%s8175_s1 + $0xa04] ss:$8 sps:$4 sm:$0xff]   ;;  %v6314_v3 = vld [vmem:[%s8176_s0 + $0x20] ss:$88 sps:$4 sm:$0xff]  }
 0x117   :  { %3671 = vmatpush1.bf16.msra.mxu1 %v6218_v4  ;;  %v6317_v4 = vld [vmem:[%s8176_s0 + $0x48] ss:$88 sps:$4 sm:$0xff]  }
 0x118   :  { %4236 = vmatpush1.bf16.msra.mxu0 %v6221_v5  ;;  %3672 = vmatprep.subr.bf16.mxu1 %v6231_v6  ;;  %v6320_v5 = vld [vmem:[%s8175_s1 + $0xa00] ss:$8 sps:$4 sm:$0xff]   ;;  %v6325_v6 = vld [vmem:[%s8175_s1 + $0xa14] ss:$8 sps:$4 sm:$0xff]  }
 0x119   :  { %4237 = vmatprep.subr.bf16.mxu0 %v6235_v7  ;;  %v6326_v7 = vld [vmem:[%s8176_s0 + $0xd4] ss:$88 sps:$4 sm:$0xff]  }
 0x11a   :  { %3610 = vmatmul.mubr.bf16.gmra.mrb[12].mxu1 %v6228_v8  ;;  %v6328_v8 = vld [vmem:[%s8176_s0 + $0xfc] ss:$88 sps:$4 sm:$0xff]  }
 0x11b   :  { %4175 = vmatmul.mubr.bf16.gmra.mrb[12].mxu0 %v6232_v10  ;;  %3673 = vmatpush1.bf16.msra.mxu1 %v6229_v9  ;;  %v6323_v9 = vld [vmem:[%s8175_s1 + $0xa10] ss:$8 sps:$4 sm:$0xff]   ;;  %v6334_v10 = vld [vmem:[%s8175_s1 + $0xa24] ss:$8 sps:$4 sm:$0xff]  }
 0x11c   :  { %4238 = vmatpush1.bf16.msra.mxu0 %v6233_v11  ;;  %3674 = vmatprep.subr.bf16.mxu1 %v6238_v12  ;;  %v6330_v11 = vld [vmem:[%s8176_s0 + $0xd0] ss:$88 sps:$4 sm:$0xff]  }
 0x11d   :  { %4239 = vmatprep.subr.bf16.mxu0 %v6241_v13  ;;  %3619 = vmatprep.mubr.bf16.mxu1 %v6242_v14  ;;  %v6331_v12 = vld [vmem:[%s8176_s0 + $0xf8] ss:$88 sps:$4 sm:$0xff]   ;;  %v6332_v13 = vld [vmem:[%s8175_s1 + $0xa20] ss:$8 sps:$4 sm:$0xff]   ;;  %v6335_v14 = vld [vmem:[%s8176_s0 + $0x184] ss:$88 sps:$4 sm:$0xff]  }
 0x11e   :  { %4184 = vmatprep.mubr.bf16.mxu0 %v6244_v15  ;;  %v6337_v15 = vld [vmem:[%s8176_s0 + $0x1ac] ss:$88 sps:$4 sm:$0xff]  }
 0x11f   :  { %3675 = vmatpush1.bf16.msra.mxu1 %v6236_v16  ;;  %v6343_v16 = vld [vmem:[%s8175_s1 + $0xa34] ss:$8 sps:$4 sm:$0xff]  }
 0x120   :  { %4240 = vmatpush1.bf16.msra.mxu0 %v6239_v17  ;;  %3676 = vmatprep.subr.bf16.mxu1 %v6249_v18  ;;  %v6341_v17 = vld [vmem:[%s8175_s1 + $0xa30] ss:$8 sps:$4 sm:$0xff]   ;;  %v6352_v18 = vld [vmem:[%s8175_s1 + $0xa44] ss:$8 sps:$4 sm:$0xff]  }
 0x121   :  { %4241 = vmatprep.subr.bf16.mxu0 %v6253_v19  ;;  %v6339_v19 = vld [vmem:[%s8176_s0 + $0x180] ss:$88 sps:$4 sm:$0xff]  }
 0x122   :  { %3620 = vmatmul.mubr.bf16.gmra.mrb[16].mxu1 %v6246_v20  ;;  %v6340_v20 = vld [vmem:[%s8176_s0 + $0x1a8] ss:$88 sps:$4 sm:$0xff]  }
 0x123   :  { %4185 = vmatmul.mubr.bf16.gmra.mrb[16].mxu0 %v6250_v22  ;;  %3677 = vmatpush1.bf16.msra.mxu1 %v6247_v21  ;;  %v6344_v21 = vld [vmem:[%s8176_s0 + $0x234] ss:$88 sps:$4 sm:$0xff]  }
 0x124   :  { %4242 = vmatpush1.bf16.msra.mxu0 %v6251_v23  ;;  %3678 = vmatprep.subr.bf16.mxu1 %v6256_v24  ;;  %v6346_v22 = vld [vmem:[%s8176_s0 + $0x25c] ss:$88 sps:$4 sm:$0xff]   ;;  %v6350_v23 = vld [vmem:[%s8175_s1 + $0xa40] ss:$8 sps:$4 sm:$0xff]  }
 0x125   :  { %4243 = vmatprep.subr.bf16.mxu0 %v6259_v25  ;;  %3629 = vmatprep.mubr.bf16.mxu1 %v6260_v26  ;;  %v6355_v24 = vld [vmem:[%s8175_s1 + $0xa54] ss:$8 sps:$4 sm:$0xff]   ;;  %v6353_v25 = vld [vmem:[%s8175_s1 + $0xa50] ss:$8 sps:$4 sm:$0xff]  }
 0x126   :  { %4194 = vmatprep.mubr.bf16.mxu0 %v6262_v27  ;;  %v6348_v26 = vld [vmem:[%s8176_s0 + $0x230] ss:$88 sps:$4 sm:$0xff]   ;;  %v6364_v27 = vld [vmem:[%s8175_s1 + $0xa64] ss:$8 sps:$4 sm:$0xff]  }
 0x127   :  { %3679 = vmatpush1.bf16.msra.mxu1 %v6254_v28  ;;  %v6349_v28 = vld [vmem:[%s8176_s0 + $0x258] ss:$88 sps:$4 sm:$0xff]  }
 0x128   :  { %4244 = vmatpush1.bf16.msra.mxu0 %v6257_v29  ;;  %3680 = vmatprep.subr.bf16.mxu1 %v6267_v30  ;;  %v6356_v29 = vld [vmem:[%s8176_s0 + $0x2e4] ss:$88 sps:$4 sm:$0xff]  }
 0x129   :  { %4245 = vmatprep.subr.bf16.mxu0 %v6271_v31  ;;  %v6358_v30 = vld [vmem:[%s8176_s0 + $0x30c] ss:$88 sps:$4 sm:$0xff]   ;;  %v6362_v31 = vld [vmem:[%s8175_s1 + $0xa60] ss:$8 sps:$4 sm:$0xff]  }
 0x12a   :  { %3630 = vmatmul.mubr.bf16.gmra.mrb[20].mxu1 %v6264_v32  ;;  %v6373_v32 = vld [vmem:[%s8175_s1 + $0xa74] ss:$8 sps:$4 sm:$0xff]  }
 0x12b   :  { %4195 = vmatmul.mubr.bf16.gmra.mrb[20].mxu0 %v6268_v34  ;;  %3681 = vmatpush1.bf16.msra.mxu1 %v6265_v33  ;;  %v6371_v33 = vld [vmem:[%s8175_s1 + $0xa70] ss:$8 sps:$4 sm:$0xff]   ;;  %v6380_v34 = vld [vmem:[%s8175_s1 + $0xa84] ss:$8 sps:$4 sm:$0xff]  }
 0x12c   :  { %4246 = vmatpush1.bf16.msra.mxu0 %v6269_v35  ;;  %3682 = vmatprep.subr.bf16.mxu1 %v6274_v36  ;;  %v6360_v35 = vld [vmem:[%s8176_s0 + $0x2e0] ss:$88 sps:$4 sm:$0xff]  }
 0x12d   :  { %4247 = vmatprep.subr.bf16.mxu0 %v6277_v37  ;;  %3639 = vmatprep.mubr.bf16.mxu1 %v6278_v38  ;;  %v6361_v36 = vld [vmem:[%s8176_s0 + $0x308] ss:$88 sps:$4 sm:$0xff]   ;;  %v6365_v37 = vld [vmem:[%s8176_s0 + $0x394] ss:$88 sps:$4 sm:$0xff]  }
 0x12e   :  { %4204 = vmatprep.mubr.bf16.mxu0 %v6280_v39  ;;  %v6367_v38 = vld [vmem:[%s8176_s0 + $0x3bc] ss:$88 sps:$4 sm:$0xff]   ;;  %v6378_v39 = vld [vmem:[%s8175_s1 + $0xa80] ss:$8 sps:$4 sm:$0xff]  }
 0x12f   :  { %3683 = vmatpush1.bf16.msra.mxu1 %v6272_v40  ;;  %v6385_v40 = vld [vmem:[%s8175_s1 + $0xa94] ss:$8 sps:$4 sm:$0xff]  }
 0x130   :  { %4248 = vmatpush1.bf16.msra.mxu0 %v6275_v41  ;;  %3684 = vmatprep.subr.bf16.mxu1 %v6285_v42  ;;  %v6383_v41 = vld [vmem:[%s8175_s1 + $0xa90] ss:$8 sps:$4 sm:$0xff]   ;;  %v6394_v42 = vld [vmem:[%s8175_s1 + $0xaa4] ss:$8 sps:$4 sm:$0xff]  }
 0x131   :  { %4249 = vmatprep.subr.bf16.mxu0 %v6289_v43  ;;  %v6369_v43 = vld [vmem:[%s8176_s0 + $0x390] ss:$88 sps:$4 sm:$0xff]  }
 0x132   :  { %3640 = vmatmul.mubr.bf16.gmra.mrb[24].mxu1 %v6282_v44  ;;  %v6370_v44 = vld [vmem:[%s8176_s0 + $0x3b8] ss:$88 sps:$4 sm:$0xff]  }
 0x133   :  { %4205 = vmatmul.mubr.bf16.gmra.mrb[24].mxu0 %v6286_v46  ;;  %3685 = vmatpush1.bf16.msra.mxu1 %v6283_v45  ;;  %v6374_v45 = vld [vmem:[%s8176_s0 + $0x444] ss:$88 sps:$4 sm:$0xff]  }
 0x134   :  { %4250 = vmatpush1.bf16.msra.mxu0 %v6287_v47  ;;  %3686 = vmatprep.subr.bf16.mxu1 %v6292_v48  ;;  %v6376_v46 = vld [vmem:[%s8176_s0 + $0x46c] ss:$88 sps:$4 sm:$0xff]   ;;  %v6392_v47 = vld [vmem:[%s8175_s1 + $0xaa0] ss:$8 sps:$4 sm:$0xff]  }
 0x135   :  { %4251 = vmatprep.subr.bf16.mxu0 %v6295_v49  ;;  %3649 = vmatprep.mubr.bf16.mxu1 %v6296_v50  ;;  %v6381_v48 = vld [vmem:[%s8176_s0 + $0x440] ss:$88 sps:$4 sm:$0xff]   ;;  %v6386_v50 = vld [vmem:[%s8176_s0 + $0x4f4] ss:$88 sps:$4 sm:$0xff]  }
 0x136   :  { %4214 = vmatprep.mubr.bf16.mxu0 %v6298_v51  ;;  %v6382_v49 = vld [vmem:[%s8176_s0 + $0x468] ss:$88 sps:$4 sm:$0xff]   ;;  %v6388_v51 = vld [vmem:[%s8176_s0 + $0x51c] ss:$88 sps:$4 sm:$0xff]  }
 0x137   :  { %3687 = vmatpush1.bf16.msra.mxu1 %v6290_v52  ;;  %v6390_v52 = vld [vmem:[%s8176_s0 + $0x4f0] ss:$88 sps:$4 sm:$0xff]  }
 0x138   :  { %4252 = vmatpush1.bf16.msra.mxu0 %v6293_v53  ;;  %3688 = vmatprep.subr.bf16.mxu1 %v6303_v54  ;;  %v6391_v53 = vld [vmem:[%s8176_s0 + $0x518] ss:$88 sps:$4 sm:$0xff]   ;;  %v6397_v54 = vld [vmem:[%s8176_s0 + $0x54] ss:$88 sps:$4 sm:$0xff]  }
 0x139   :  { %4253 = vmatprep.subr.bf16.mxu0 %v6307_v55  ;;  %v6400_v55 = vld [vmem:[%s8176_s0 + $0x314] ss:$88 sps:$4 sm:$0xff]  }
 0x13a   :  { %3650 = vmatmul.mubr.bf16.gmra.mrb[28].mxu1 %v6300_v56  ;;  %v6395_v56 = vld [vmem:[%s8176_s0 + $0x50] ss:$88 sps:$4 sm:$0xff]  }
 0x13b   :  { %4215 = vmatmul.mubr.bf16.gmra.mrb[28].mxu0 %v6304_v58  ;;  %3689 = vmatpush1.bf16.msra.mxu1 %v6301_v57  ;;  %v6398_v57 = vld [vmem:[%s8176_s0 + $0x310] ss:$88 sps:$4 sm:$0xff]   ;;  %v6401_v58 = vld [vmem:[%s8176_s0 + $0x104] ss:$88 sps:$4 sm:$0xff]  }
 0x13c   :  { %4254 = vmatpush1.bf16.msra.mxu0 %v6305_v59  ;;  %3690 = vmatprep.subr.bf16.mxu1 %v6310_v60  ;;  %v6403_v59 = vld [vmem:[%s8176_s0 + $0x3c4] ss:$88 sps:$4 sm:$0xff]   ;;  %v6405_v60 = vld [vmem:[%s8176_s0 + $0x100] ss:$88 sps:$4 sm:$0xff]  }
 0x13d   :  { %4255 = vmatprep.subr.bf16.mxu0 %v6313_v61  ;;  %3692 = vmatprep.mubr.bf16.mxu1 %v6316_v62  ;;  %v6406_v61 = vld [vmem:[%s8176_s0 + $0x3c0] ss:$88 sps:$4 sm:$0xff]   ;;  %v6407_v62 = vld [vmem:[%s8176_s0 + $0x1b4] ss:$88 sps:$4 sm:$0xff]  }
 0x13e   :  { %4257 = vmatprep.mubr.bf16.mxu0 %v6319_v63  ;;  %v6409_v63 = vld [vmem:[%s8176_s0 + $0x474] ss:$88 sps:$4 sm:$0xff]  }
 0x13f   :  { %3691 = vmatpush1.bf16.msra.mxu1 %v6308_v0  ;;  %v6411_v0 = vld [vmem:[%s8176_s0 + $0x1b0] ss:$88 sps:$4 sm:$0xff]  }
 0x140   :  { %4256 = vmatpush1.bf16.msra.mxu0 %v6311_v1  ;;  %5300 = vmatprep.subr.bf16.mxu1 %v6322_v2  ;;  %v6412_v1 = vld [vmem:[%s8176_s0 + $0x470] ss:$88 sps:$4 sm:$0xff]  }
 0x141   :  { %4338 = vmatprep.subr.bf16.mxu0 %v6322_v2  ;;  %v6413_v2 = vld [vmem:[%s8176_s0 + $0x264] ss:$88 sps:$4 sm:$0xff]  }
 0x142   :  { %3693 = vmatmul.mubr.bf16.vlgmr.msra.gmra.mrb[0].mxu1 %v6314_v3  ;;  %v6415_v3 = vld [vmem:[%s8176_s0 + $0x524] ss:$88 sps:$4 sm:$0xff]  }
 0x143   :  { %4258 = vmatmul.mubr.bf16.vlgmr.msra.gmra.mrb[0].mxu0 %v6317_v4  ;;  %5311 = vmatpush1.bf16.msra.mxu1 %v6320_v5  ;;  %v6417_v4 = vld [vmem:[%s8176_s0 + $0x260] ss:$88 sps:$4 sm:$0xff]  }
 0x144   :  { %4339 = vmatpush1.bf16.msra.mxu0 %v6320_v5  ;;  %5301 = vmatprep.subr.bf16.mxu1 %v6325_v6  ;;  %v6418_v5 = vld [vmem:[%s8176_s0 + $0x520] ss:$88 sps:$4 sm:$0xff]  }
 0x145   :  { %4340 = vmatprep.subr.bf16.mxu0 %v6325_v6  ;;  %3702 = vmatprep.mubr.bf16.mxu1 %v6326_v7 }
 0x146   :  { %4267 = vmatprep.mubr.bf16.mxu0 %v6328_v8 }
 0x147   :  { %5312 = vmatpush1.bf16.msra.mxu1 %v6323_v9 }
 0x148   :  { %4341 = vmatpush1.bf16.msra.mxu0 %v6323_v9  ;;  %5302 = vmatprep.subr.bf16.mxu1 %v6334_v10 }
 0x149   :  { %4342 = vmatprep.subr.bf16.mxu0 %v6334_v10 }
 0x14a   :  { %3703 = vmatmul.mubr.bf16.gmra.mrb[4].mxu1 %v6330_v11 }
 0x14b   :  { %4268 = vmatmul.mubr.bf16.gmra.mrb[4].mxu0 %v6331_v12  ;;  %5313 = vmatpush1.bf16.msra.mxu1 %v6332_v13 }
 0x14c   :  { %4343 = vmatpush1.bf16.msra.mxu0 %v6332_v13  ;;  %3712 = vmatprep.mubr.bf16.mxu1 %v6335_v14 }
 0x14d   :  { %4277 = vmatprep.mubr.bf16.mxu0 %v6337_v15  ;;  %4344 = vmatprep.subr.bf16.mxu0 %v6343_v16 }
 0x14e   :  { %5303 = vmatprep.subr.bf16.mxu1 %v6343_v16 }
 0x14f   :  { %5314 = vmatpush1.bf16.msra.mxu1 %v6341_v17 }
 0x150   :  { %4345 = vmatpush1.bf16.msra.mxu0 %v6341_v17  ;;  %5304 = vmatprep.subr.bf16.mxu1 %v6352_v18 }
 0x151   :  { %4346 = vmatprep.subr.bf16.mxu0 %v6352_v18 }
 0x152   :  { %3713 = vmatmul.mubr.bf16.gmra.mrb[8].mxu1 %v6339_v19 }
 0x153   :  { %4278 = vmatmul.mubr.bf16.gmra.mrb[8].mxu0 %v6340_v20  ;;  %3722 = vmatprep.mubr.bf16.mxu1 %v6344_v21 }
 0x154   :  { %4287 = vmatprep.mubr.bf16.mxu0 %v6346_v22  ;;  %4347 = vmatpush1.bf16.msra.mxu0 %v6350_v23 }
 0x155   :  { %5315 = vmatpush1.bf16.msra.mxu1 %v6350_v23  ;;  %4348 = vmatprep.subr.bf16.mxu0 %v6355_v24 }
 0x156   :  { %5305 = vmatprep.subr.bf16.mxu1 %v6355_v24 }
 0x158   :  { %4349 = vmatpush1.bf16.msra.mxu0 %v6353_v25 }
 0x159   :  { %5316 = vmatpush1.bf16.msra.mxu1 %v6353_v25  ;;  %4350 = vmatprep.subr.bf16.mxu0 %v6364_v27 }
 0x15a   :  { %5306 = vmatprep.subr.bf16.mxu1 %v6364_v27  ;;  %3723 = vmatmul.mubr.bf16.gmra.mrb[12].mxu1 %v6348_v26 }
 0x15b   :  { %4288 = vmatmul.mubr.bf16.gmra.mrb[12].mxu0 %v6349_v28  ;;  %3732 = vmatprep.mubr.bf16.mxu1 %v6356_v29 }
 0x15c   :  { %4297 = vmatprep.mubr.bf16.mxu0 %v6358_v30  ;;  %4351 = vmatpush1.bf16.msra.mxu0 %v6362_v31 }
 0x15d   :  { %5317 = vmatpush1.bf16.msra.mxu1 %v6362_v31  ;;  %4352 = vmatprep.subr.bf16.mxu0 %v6373_v32 }
 0x15e   :  { %5307 = vmatprep.subr.bf16.mxu1 %v6373_v32 }
 0x160   :  { %4353 = vmatpush1.bf16.msra.mxu0 %v6371_v33 }
 0x161   :  { %5318 = vmatpush1.bf16.msra.mxu1 %v6371_v33  ;;  %4354 = vmatprep.subr.bf16.mxu0 %v6380_v34 }
 0x162   :  { %5308 = vmatprep.subr.bf16.mxu1 %v6380_v34  ;;  %3733 = vmatmul.mubr.bf16.gmra.mrb[16].mxu1 %v6360_v35 }
 0x163   :  { %4298 = vmatmul.mubr.bf16.gmra.mrb[16].mxu0 %v6361_v36  ;;  %3742 = vmatprep.mubr.bf16.mxu1 %v6365_v37 }
 0x164   :  { %4307 = vmatprep.mubr.bf16.mxu0 %v6367_v38  ;;  %4355 = vmatpush1.bf16.msra.mxu0 %v6378_v39 }
 0x165   :  { %5319 = vmatpush1.bf16.msra.mxu1 %v6378_v39  ;;  %4356 = vmatprep.subr.bf16.mxu0 %v6385_v40 }
 0x166   :  { %5309 = vmatprep.subr.bf16.mxu1 %v6385_v40 }
 0x168   :  { %4357 = vmatpush1.bf16.msra.mxu0 %v6383_v41 }
 0x169   :  { %5320 = vmatpush1.bf16.msra.mxu1 %v6383_v41  ;;  %4358 = vmatprep.subr.bf16.mxu0 %v6394_v42 }
 0x16a   :  { %5310 = vmatprep.subr.bf16.mxu1 %v6394_v42  ;;  %3743 = vmatmul.mubr.bf16.gmra.mrb[20].mxu1 %v6369_v43 }
 0x16b   :  { %4308 = vmatmul.mubr.bf16.gmra.mrb[20].mxu0 %v6370_v44  ;;  %3752 = vmatprep.mubr.bf16.mxu1 %v6374_v45 }
 0x16c   :  { %4317 = vmatprep.mubr.bf16.mxu0 %v6376_v46  ;;  %4359 = vmatpush1.bf16.msra.mxu0 %v6392_v47 }
 0x16d   :  { %5321 = vmatpush1.bf16.msra.mxu1 %v6392_v47 }
 0x172   :  { %3753 = vmatmul.mubr.bf16.gmra.mrb[24].mxu1 %v6381_v48 }
 0x173   :  { %4318 = vmatmul.mubr.bf16.gmra.mrb[24].mxu0 %v6382_v49  ;;  %3762 = vmatprep.mubr.bf16.mxu1 %v6386_v50 }
 0x174   :  { %4327 = vmatprep.mubr.bf16.mxu0 %v6388_v51 }
 0x17a   :  { %3763 = vmatmul.mubr.bf16.gmra.mrb[28].mxu1 %v6390_v52 }
 0x17b   :  { %4328 = vmatmul.mubr.bf16.gmra.mrb[28].mxu0 %v6391_v53  ;;  %5264 = vmatprep.mubr.msk.bf16.mxu1 %vm3183_vm0, %v6400_v55 }
 0x17c   :  { %5260 = vmatprep.mubr.msk.bf16.mxu0 %vm3183_vm0, %v6397_v54 }
 0x182   :  { %4411 = vmatmul.mubr.bf16.vlgmr.msra.gmra.mrb[32].mxu1 %v6398_v57  ;;  %v4552_v57 = vlaneseq }
 0x183   :  { %4371 = vmatmul.mubr.bf16.vlgmr.msra.gmra.mrb[0].mxu0 %v6395_v56  ;;  %5265 = vmatprep.mubr.msk.bf16.mxu1 %vm3183_vm0, %v6403_v59 }
 0x184   :  { %5261 = vmatprep.mubr.msk.bf16.mxu0 %vm3183_vm0, %v6401_v58  ;;  %v4553_v59 = vshrl.u32 %v4552_v57, 7 }
 0x18a   :  { %4421 = vmatmul.mubr.bf16.gmra.mrb[36].mxu1 %v6406_v61 }
 0x18b   :  { %4381 = vmatmul.mubr.bf16.gmra.mrb[4].mxu0 %v6405_v60  ;;  %5266 = vmatprep.mubr.msk.bf16.mxu1 %vm3183_vm0, %v6409_v63 }
 0x18c   :  { %5262 = vmatprep.mubr.msk.bf16.mxu0 %vm3183_vm0, %v6407_v62 }
 0x192   :  { %4431 = vmatmul.mubr.bf16.gmra.mrb[40].mxu1 %v6412_v1 }
 0x193   :  { %4391 = vmatmul.mubr.bf16.gmra.mrb[8].mxu0 %v6411_v0  ;;  %5267 = vmatprep.mubr.msk.bf16.mxu1 %vm3183_vm0, %v6415_v3 }
 0x194   :  { %5263 = vmatprep.mubr.msk.bf16.mxu0 %vm3183_vm0, %v6413_v2 }
 0x19a   :  { %4441 = vmatmul.mubr.bf16.gmra.mrb[44].mxu1 %v6418_v5 }
 0x19b   :  { %4401 = vmatmul.mubr.bf16.gmra.mrb[12].mxu0 %v6417_v4 }
 0x215   :  { %v8001_v6 = vpop.f32.mrb[0].mxu1 }
 0x216   :  { %v8003_v7 = vpop.f32.mrb[1].mxu1 }
 0x217   :  { %v8005_v8 = vpop.f32.mrb[2].mxu1 }
 0x218   :  { %v8007_v9 = vpop.f32.mrb[3].mxu1 }
 0x21d   :  { %v8009_v10 = vpop.f32.mrb[4].mxu1 }
 0x21e   :  { %v8011_v11 = vpop.f32.mrb[5].mxu1 }
 0x21f   :  { %v8013_v12 = vpop.f32.mrb[6].mxu1 }
 0x220   :  { %v8015_v13 = vpop.f32.mrb[7].mxu1 }
 0x225   :  { %v8017_v14 = vpop.f32.mrb[8].mxu1 }
 0x226   :  { %v8019_v15 = vpop.f32.mrb[9].mxu1 }
 0x227   :  { %v8021_v16 = vpop.f32.mrb[10].mxu1 }
 0x228   :  { %v8023_v17 = vpop.f32.mrb[11].mxu1 }
 0x22d   :  { %v8025_v18 = vpop.f32.mrb[12].mxu1 }
 0x22e   :  { %v8027_v19 = vpop.f32.mrb[13].mxu1 }
 0x22f   :  { %v8029_v20 = vpop.f32.mrb[14].mxu1 }
 0x230   :  { %v8031_v21 = vpop.f32.mrb[15].mxu1 }
 0x235   :  { %v3734_v22 = vpop.f32.mrb[16].mxu1 }
 0x236   :  { %v4299_v23 = vpop.f32.mrb[16].mxu0  ;;  %v3736_v25 = vpop.f32.mrb[17].mxu1 }
 0x237   :  { %v5338_v24 = vadd.f32 %v4299_v23, %v3734_v22  ;;  %v4301_v26 = vpop.f32.mrb[17].mxu0  ;;  %v3738_v28 = vpop.f32.mrb[18].mxu1  ;;  %v4554_v23 = vsub.s32 0, %v4553_v59 }
 0x238   :  { %v5340_v27 = vadd.f32 %v4301_v26, %v3736_v25  ;;  %v4303_v29 = vpop.f32.mrb[18].mxu0  ;;  %v3740_v31 = vpop.f32.mrb[19].mxu1  ;;  %v4550_v26 = vld [vmem:[%s8177_s2] sm:$0x3] }
 0x239   :  { %v5342_v30 = vadd.f32 %v4303_v29, %v3738_v28  ;;  %v4305_v32 = vpop.f32.mrb[19].mxu0  ;;  %v4558_v28 = vsub.s32 1, %v4553_v59  ;;  %v8062_v29 = vrot.slane %v4550_v26, %v4554_v23 }
 0x23a   :  { %v8033_v33 = vadd.f32 %v4305_v32, %v3740_v31 }
 0x23d   :  { %v3744_v34 = vpop.f32.mrb[20].mxu1 }
 0x23e   :  { %v4309_v35 = vpop.f32.mrb[20].mxu0  ;;  %v3746_v37 = vpop.f32.mrb[21].mxu1 }
 0x23f   :  { %v8035_v36 = vadd.f32 %v4309_v35, %v3744_v34  ;;  %v4311_v38 = vpop.f32.mrb[21].mxu0  ;;  %v3748_v40 = vpop.f32.mrb[22].mxu1  ;;  %v8064_v34 = vrot.slane %v4550_v26, %v4558_v28 }
 0x240   :  { %v8037_v39 = vadd.f32 %v4311_v38, %v3746_v37  ;;  %v4313_v41 = vpop.f32.mrb[22].mxu0  ;;  %v3750_v43 = vpop.f32.mrb[23].mxu1 }
 0x241   :  { %v8039_v42 = vadd.f32 %v4313_v41, %v3748_v40  ;;  %v4315_v44 = vpop.f32.mrb[23].mxu0 }
 0x242   :  { %v8041_v45 = vadd.f32 %v4315_v44, %v3750_v43 }
 0x245   :  { %v3754_v46 = vpop.f32.mrb[24].mxu1 }
 0x246   :  { %v4319_v47 = vpop.f32.mrb[24].mxu0  ;;  %v3756_v49 = vpop.f32.mrb[25].mxu1 }
 0x247   :  { %v8043_v48 = vadd.f32 %v4319_v47, %v3754_v46  ;;  %v4321_v50 = vpop.f32.mrb[25].mxu0  ;;  %v3758_v52 = vpop.f32.mrb[26].mxu1 }
 0x248   :  { %v8045_v51 = vadd.f32 %v4321_v50, %v3756_v49  ;;  %v4323_v53 = vpop.f32.mrb[26].mxu0  ;;  %v3760_v55 = vpop.f32.mrb[27].mxu1 }
 0x249   :  { %v8047_v54 = vadd.f32 %v4323_v53, %v3758_v52  ;;  %v4325_v56 = vpop.f32.mrb[27].mxu0 }
 0x24a   :  { %v8049_v58 = vadd.f32 %v4325_v56, %v3760_v55 }
 0x24d   :  { %v3764_v60 = vpop.f32.mrb[28].mxu1 }
 0x24e   :  { %v4329_v61 = vpop.f32.mrb[28].mxu0  ;;  %v3766_v63 = vpop.f32.mrb[29].mxu1 }
 0x24f   :  { %v8051_v62 = vadd.f32 %v4329_v61, %v3764_v60  ;;  %v4331_v0 = vpop.f32.mrb[29].mxu0  ;;  %v3768_v2 = vpop.f32.mrb[30].mxu1 }
 0x250   :  { %v8053_v1 = vadd.f32 %v4331_v0, %v3766_v63  ;;  %v4333_v3 = vpop.f32.mrb[30].mxu0  ;;  %v3770_v5 = vpop.f32.mrb[31].mxu1 }
 0x251   :  { %v8055_v4 = vadd.f32 %v4333_v3, %v3768_v2  ;;  %v4335_v22 = vpop.f32.mrb[31].mxu0 }
 0x252   :  { %v8057_v25 = vadd.f32 %v4335_v22, %v3770_v5 }
 0x255   :  { %v4412_v32 = vpop.f32.mrb[32].mxu1 }
 0x256   :  { %v4372_v31 = vpop.f32.mrb[0].mxu0  ;;  %v5339_v37 = vadd.f32 %v5338_v24, %v4412_v32  ;;  %v4414_v40 = vpop.f32.mrb[33].mxu1 }
 0x257   :  { %v5322_v35 = vadd.f32 %v4372_v31, %v8001_v6  ;;  %v4374_v38 = vpop.f32.mrb[1].mxu0  ;;  %v5341_v43 = vadd.f32 %v5340_v27, %v4414_v40  ;;  %v4416_v46 = vpop.f32.mrb[34].mxu1 }
 0x258   :  { %v5323_v41 = vadd.f32 %v4374_v38, %v8003_v7  ;;  %v4376_v44 = vpop.f32.mrb[2].mxu0  ;;  %v4578_v49 = vadd.f32 %v5339_v37, %v8062_v29  ;;  %v5343_v52 = vadd.f32 %v5342_v30, %v4416_v46  ;;  %v4418_v55 = vpop.f32.mrb[35].mxu1 }
 0x259   :  { %v4562_v47 = vadd.f32 %v5322_v35, %v8062_v29  ;;  %v5324_v50 = vadd.f32 %v4376_v44, %v8005_v8  ;;  %v4378_v53 = vpop.f32.mrb[3].mxu0  ;;  %v4579_v6 = vadd.f32 %v5341_v43, %v8064_v34  ;;  %v5345_v7 = vadd.f32 %v8033_v33, %v4418_v55 }
 0x25a   :  { %v4563_v56 = vadd.f32 %v5323_v41, %v8064_v34  ;;  %v5325_v24 = vadd.f32 %v4378_v53, %v8007_v9  ;;  %v4610_v57 = vmax.f32 %v4578_v49, 0.0  ;;  %v4580_v60 = vadd.f32 %v5343_v52, %v8062_v29 }
 0x25b   :  { %v4594_v27 = vmax.f32 %v4562_v47, 0.0  ;;  %v4564_v59 = vadd.f32 %v5324_v50, %v8062_v29  ;;  %v4611_v63 = vmax.f32 %v4579_v6, 0.0  ;;  %v4581_v30 = vadd.f32 %v5345_v7, %v8064_v34 }
 0x25c   :  { %v4595_v61 = vmax.f32 %v4563_v56, 0.0  ;;  %v4565_v8 = vadd.f32 %v5325_v24, %v8064_v34  ;;  %v4612_v2 = vmax.f32 %v4580_v60, 0.0 }
 0x25d   :  { %v4596_v0 = vmax.f32 %v4564_v59, 0.0  ;;  %v5292_v5 = vpack.c.bf16 %v4611_v63, %v4610_v57  ;;  %v4613_v9 = vmax.f32 %v4581_v30, 0.0  ;;  %v4422_v33 = vpop.f32.mrb[36].mxu1 }
 0x25e   :  { %v5284_v3 = vpack.c.bf16 %v4595_v61, %v4594_v27  ;;  %v4597_v22 = vmax.f32 %v4565_v8, 0.0  ;;  %v4382_v23 = vpop.f32.mrb[4].mxu0  ;;  %v5347_v28 = vadd.f32 %v8035_v36, %v4422_v33  ;;  %v4424_v32 = vpop.f32.mrb[37].mxu1 }
 0x25f   :  { %v5326_v26 = vadd.f32 %v4382_v23, %v8009_v10  ;;  %v4384_v31 = vpop.f32.mrb[5].mxu0  ;;  %4730 = vst [vmem:[%s8178_s3 + $0x40] sm:$0xff] %v5292_v5  ;;  %v5293_v37 = vpack.c.bf16 %v4613_v9, %v4612_v2  ;;  %v5349_v40 = vadd.f32 %v8037_v39, %v4424_v32  ;;  %v4426_v10 = vpop.f32.mrb[38].mxu1 }
 0x260   :  { %4722 = vst [vmem:[%s8178_s3] sm:$0xff] %v5284_v3  ;;  %v5285_v35 = vpack.c.bf16 %v4597_v22, %v4596_v0  ;;  %v5327_v38 = vadd.f32 %v4384_v31, %v8011_v11  ;;  %v4386_v41 = vpop.f32.mrb[6].mxu0  ;;  %v4582_v43 = vadd.f32 %v5347_v28, %v8062_v29  ;;  %v5351_v46 = vadd.f32 %v8039_v42, %v4426_v10  ;;  %v4428_v49 = vpop.f32.mrb[39].mxu1 }
 0x261   :  { %v4566_v36 = vadd.f32 %v5326_v26, %v8062_v29  ;;  %v5328_v44 = vadd.f32 %v4386_v41, %v8013_v12  ;;  %v4388_v47 = vpop.f32.mrb[7].mxu0  ;;  %4731 = vst [vmem:[%s8178_s3 + $0x48] sm:$0xff] %v5293_v37  ;;  %v4583_v39 = vadd.f32 %v5349_v40, %v8064_v34  ;;  %v5353_v12 = vadd.f32 %v8041_v45, %v4428_v49 }
 0x262   :  { %4723 = vst [vmem:[%s8178_s3 + $0x8] sm:$0xff] %v5285_v35  ;;  %v4567_v11 = vadd.f32 %v5327_v38, %v8064_v34  ;;  %v5329_v50 = vadd.f32 %v4388_v47, %v8015_v13  ;;  %v4614_v42 = vmax.f32 %v4582_v43, 0.0  ;;  %v4584_v55 = vadd.f32 %v5351_v46, %v8062_v29 }
 0x263   :  { %v4598_v52 = vmax.f32 %v4566_v36, 0.0  ;;  %v4568_v53 = vadd.f32 %v5328_v44, %v8062_v29  ;;  %v4615_v6 = vmax.f32 %v4583_v39, 0.0  ;;  %v4585_v7 = vadd.f32 %v5353_v12, %v8064_v34 }
 0x264   :  { %v4599_v56 = vmax.f32 %v4567_v11, 0.0  ;;  %v4569_v24 = vadd.f32 %v5329_v50, %v8064_v34  ;;  %v4616_v57 = vmax.f32 %v4584_v55, 0.0 }
 0x265   :  { %v4600_v27 = vmax.f32 %v4568_v53, 0.0  ;;  %v5294_v60 = vpack.c.bf16 %v4615_v6, %v4614_v42  ;;  %v4617_v13 = vmax.f32 %v4585_v7, 0.0  ;;  %v4432_v45 = vpop.f32.mrb[40].mxu1 }
 0x266   :  { %v5286_v59 = vpack.c.bf16 %v4599_v56, %v4598_v52  ;;  %v4601_v61 = vmax.f32 %v4569_v24, 0.0  ;;  %v4392_v63 = vpop.f32.mrb[8].mxu0  ;;  %v5355_v30 = vadd.f32 %v8043_v48, %v4432_v45  ;;  %v4434_v2 = vpop.f32.mrb[41].mxu1 }
 0x267   :  { %v5330_v8 = vadd.f32 %v4392_v63, %v8017_v14  ;;  %v4394_v0 = vpop.f32.mrb[9].mxu0  ;;  %4732 = vst [vmem:[%s8178_s3 + $0x50] sm:$0xff] %v5294_v60  ;;  %v5295_v5 = vpack.c.bf16 %v4617_v13, %v4616_v57  ;;  %v5357_v9 = vadd.f32 %v8045_v51, %v4434_v2  ;;  %v4436_v14 = vpop.f32.mrb[42].mxu1 }
 0x268   :  { %4724 = vst [vmem:[%s8178_s3 + $0x10] sm:$0xff] %v5286_v59  ;;  %v5287_v3 = vpack.c.bf16 %v4601_v61, %v4600_v27  ;;  %v5331_v22 = vadd.f32 %v4394_v0, %v8019_v15  ;;  %v4396_v23 = vpop.f32.mrb[10].mxu0  ;;  %v4586_v33 = vadd.f32 %v5355_v30, %v8062_v29  ;;  %v5359_v28 = vadd.f32 %v8047_v54, %v4436_v14  ;;  %v4438_v32 = vpop.f32.mrb[43].mxu1 }
 0x269   :  { %v4570_v48 = vadd.f32 %v5330_v8, %v8062_v29  ;;  %v5332_v26 = vadd.f32 %v4396_v23, %v8021_v16  ;;  %v4398_v31 = vpop.f32.mrb[11].mxu0  ;;  %4733 = vst [vmem:[%s8178_s3 + $0x58] sm:$0xff] %v5295_v5  ;;  %v4587_v51 = vadd.f32 %v5357_v9, %v8064_v34  ;;  %v5361_v16 = vadd.f32 %v8049_v58, %v4438_v32 }
 0x26a   :  { %4725 = vst [vmem:[%s8178_s3 + $0x18] sm:$0xff] %v5287_v3  ;;  %v4571_v15 = vadd.f32 %v5331_v22, %v8064_v34  ;;  %v5333_v35 = vadd.f32 %v4398_v31, %v8023_v17  ;;  %v4618_v54 = vmax.f32 %v4586_v33, 0.0  ;;  %v4588_v40 = vadd.f32 %v5359_v28, %v8062_v29 }
 0x26b   :  { %v4602_v37 = vmax.f32 %v4570_v48, 0.0  ;;  %v4572_v38 = vadd.f32 %v5332_v26, %v8062_v29  ;;  %v4619_v10 = vmax.f32 %v4587_v51, 0.0  ;;  %v4589_v43 = vadd.f32 %v5361_v16, %v8064_v34 }
 0x26c   :  { %v4603_v41 = vmax.f32 %v4571_v15, 0.0  ;;  %v4573_v36 = vadd.f32 %v5333_v35, %v8064_v34  ;;  %v4620_v46 = vmax.f32 %v4588_v40, 0.0 }
 0x26d   :  { %v4604_v44 = vmax.f32 %v4572_v38, 0.0  ;;  %v5296_v49 = vpack.c.bf16 %v4619_v10, %v4618_v54  ;;  %v4621_v17 = vmax.f32 %v4589_v43, 0.0  ;;  %v4442_v58 = vpop.f32.mrb[44].mxu1 }
 0x26e   :  { %v5288_v47 = vpack.c.bf16 %v4603_v41, %v4602_v37  ;;  %v4605_v11 = vmax.f32 %v4573_v36, 0.0  ;;  %v4402_v39 = vpop.f32.mrb[12].mxu0  ;;  %v5363_v12 = vadd.f32 %v8051_v62, %v4442_v58  ;;  %v4444_v42 = vpop.f32.mrb[45].mxu1 }
 0x26f   :  { %v5334_v50 = vadd.f32 %v4402_v39, %v8025_v18  ;;  %v4404_v52 = vpop.f32.mrb[13].mxu0  ;;  %4734 = vst [vmem:[%s8178_s3 + $0x60] sm:$0xff] %v5296_v49  ;;  %v5297_v55 = vpack.c.bf16 %v4621_v17, %v4620_v46  ;;  %v5365_v6 = vadd.f32 %v8053_v1, %v4444_v42  ;;  %v4446_v18 = vpop.f32.mrb[46].mxu1 }
 0x270   :  { %4726 = vst [vmem:[%s8178_s3 + $0x20] sm:$0xff] %v5288_v47  ;;  %v5289_v53 = vpack.c.bf16 %v4605_v11, %v4604_v44  ;;  %v5335_v56 = vadd.f32 %v4404_v52, %v8027_v19  ;;  %v4406_v24 = vpop.f32.mrb[14].mxu0  ;;  %v4590_v7 = vadd.f32 %v5363_v12, %v8062_v29  ;;  %v5367_v57 = vadd.f32 %v8055_v4, %v4446_v18  ;;  %v4448_v60 = vpop.f32.mrb[47].mxu1 }
 0x271   :  { %v4574_v62 = vadd.f32 %v5334_v50, %v8062_v29  ;;  %v5336_v27 = vadd.f32 %v4406_v24, %v8029_v20  ;;  %v4408_v59 = vpop.f32.mrb[15].mxu0  ;;  %4735 = vst [vmem:[%s8178_s3 + $0x68] sm:$0xff] %v5297_v55  ;;  %v4591_v1 = vadd.f32 %v5365_v6, %v8064_v34  ;;  %v5369_v20 = vadd.f32 %v8057_v25, %v4448_v60 }
 0x272   :  { %4727 = vst [vmem:[%s8178_s3 + $0x28] sm:$0xff] %v5289_v53  ;;  %v4575_v19 = vadd.f32 %v5335_v56, %v8064_v34  ;;  %v5337_v61 = vadd.f32 %v4408_v59, %v8031_v21  ;;  %v4622_v4 = vmax.f32 %v4590_v7, 0.0  ;;  %v4592_v45 = vadd.f32 %v5367_v57, %v8062_v29 }
 0x273   :  { %v4606_v13 = vmax.f32 %v4574_v62, 0.0  ;;  %v4576_v63 = vadd.f32 %v5336_v27, %v8062_v29  ;;  %v4623_v30 = vmax.f32 %v4591_v1, 0.0  ;;  %v4593_v2 = vadd.f32 %v5369_v20, %v8064_v34 }
 0x274   :  { %v4607_v8 = vmax.f32 %v4575_v19, 0.0  ;;  %v4577_v0 = vadd.f32 %v5337_v61, %v8064_v34  ;;  %v4624_v5 = vmax.f32 %v4592_v45, 0.0 }
 0x275   :  { %v4608_v3 = vmax.f32 %v4576_v63, 0.0  ;;  %v5298_v9 = vpack.c.bf16 %v4623_v30, %v4622_v4  ;;  %v4625_v21 = vmax.f32 %v4593_v2, 0.0 }
 0x276   :  { %v5290_v22 = vpack.c.bf16 %v4607_v8, %v4606_v13  ;;  %v4609_v23 = vmax.f32 %v4577_v0, 0.0 }
 0x277   :  { %4736 = vst [vmem:[%s8178_s3 + $0x70] sm:$0xff] %v5298_v9  ;;  %v5299_v29 = vpack.c.bf16 %v4625_v21, %v4624_v5 }
 0x278   :  { %4728 = vst [vmem:[%s8178_s3 + $0x30] sm:$0xff] %v5290_v22  ;;  %v5291_v25 = vpack.c.bf16 %v4609_v23, %v4608_v3 }
 0x279   :  { %4737 = vst [vmem:[%s8178_s3 + $0x78] sm:$0xff] %v5299_v29 }
 0x27a   :  { %4729 = vst [vmem:[%s8178_s3 + $0x38] sm:$0xff] %v5291_v25 }

</bundles_post_ra>
